<compile_context>
chip_gen: v7x
topology: tpu7x:2x2x1
jax: 0.10.0
libtpu: 0.0.40
codegen_flags: <defaults>
</compile_context>

<pallas_src>
import functools

import jax
import jax.numpy as jnp
from jax.experimental import pallas as pl
from jax.experimental.pallas import tpu as pltpu

EPS = 1e-5


def _default_vmem_limit():
    try:
        cap = pltpu.get_tpu_info().vmem_capacity_bytes
        return min(int(cap * 3 // 4), 100 * 1024 * 1024)
    except Exception:
        return 48 * 1024 * 1024          # safe on v5e / v6e / v7x


VMEM_LIMIT = _default_vmem_limit()


def _round_up(x, m):
    return ((x + m - 1) // m) * m


def _pick_tile(dim, target, unit, min_steps=1):
    """Largest tile <= target that divides `dim`, is a multiple of `unit` and
    (when possible) leaves at least `min_steps` grid steps."""
    cap = min(target, dim)
    if min_steps > 1 and dim >= min_steps * unit:
        cap = min(cap, dim // min_steps)
    t = (cap // unit) * unit
    while t >= unit:
        if dim % t == 0:
            return t
        t -= unit
    # Fallback: single full-dim block (fine for this block's shapes).
    return dim


def _pad_to(a, shape):
    pads = [(0, t - s) for s, t in zip(a.shape, shape)]
    if not any(p for _, p in pads):
        return a
    return jnp.pad(a, pads)


# --------------------------------------------------------------------------
# Kernel 1: tiled matmul (1x1 conv) with optional fused BN+ReLU prologue on
#           the input and per-channel (sum, sum-of-squares) output stats.
#           Also reused (k_axis=None) for the strided projection shortcut.
# --------------------------------------------------------------------------
def _mm_kernel(*refs, nk, k_axis, apply_in_bn, compute_dtype):
    if apply_in_bn:
        a_ref, b_ref, scale_ref, shift_ref, y_ref, sum_ref, sq_ref, acc_ref = refs
    else:
        a_ref, b_ref, y_ref, sum_ref, sq_ref, acc_ref = refs

    a = a_ref[...]
    a = a.reshape(-1, a.shape[-1])            # collapse any leading block dims
    if apply_in_bn:
        a = jnp.maximum(a.astype(jnp.float32) * scale_ref[...] + shift_ref[...],
                        0.0)
    a = a.astype(compute_dtype)
    contrib = jnp.dot(a, b_ref[...], preferred_element_type=jnp.float32)

    def _finalize():
        y = acc_ref[...].astype(y_ref.dtype)
        y_ref[...] = y
        yf = y.astype(jnp.float32)            # stats of the *stored* values
        sum_ref[0] = jnp.sum(yf, axis=0, keepdims=True)
        sq_ref[0] = jnp.sum(yf * yf, axis=0, keepdims=True)

    if k_axis is None:                        # no reduction grid axis
        acc_ref[...] = contrib
        _finalize()
    else:
        k = pl.program_id(k_axis)

        @pl.when(k == 0)
        def _():
            acc_ref[...] = jnp.zeros_like(acc_ref)

        acc_ref[...] += contrib
        pl.when(k == nk - 1)(_finalize)


def conv1x1_bn_stats(a, w, scale=None, shift=None, *, out_dtype,
                     tm_target=512, tk_target=1024):
    """y = a @ w (optionally BN+ReLU'd a), plus per-channel partial sums /
    sums-of-squares of y for the following BatchNorm."""
    m, k = a.shape
    k2, coutp = w.shape
    assert k == k2 and coutp % 128 == 0
    tm = _pick_tile(m, tm_target, 8, min_steps=2)
    tk = _pick_tile(k, tk_target, 128)        # tk == K whenever it fits
    gm, gk = m // tm, k // tk
    apply_in_bn = scale is not None

    in_specs = [pl.BlockSpec((tm, tk), lambda i, j: (i, j)),
                pl.BlockSpec((tk, coutp), lambda i, j: (j, 0))]
    args = [a, w]
    if apply_in_bn:
        in_specs += [pl.BlockSpec((1, tk), lambda i, j: (0, j)),
                     pl.BlockSpec((1, tk), lambda i, j: (0, j))]
        args += [scale.reshape(1, k).astype(jnp.float32),
                 shift.reshape(1, k).astype(jnp.float32)]

    out_shape = (jax.ShapeDtypeStruct((m, coutp), out_dtype),
                 jax.ShapeDtypeStruct((gm, 1, coutp), jnp.float32),
                 jax.ShapeDtypeStruct((gm, 1, coutp), jnp.float32))
    out_specs = (pl.BlockSpec((tm, coutp), lambda i, j: (i, 0)),
                 pl.BlockSpec((1, 1, coutp), lambda i, j: (i, 0, 0)),
                 pl.BlockSpec((1, 1, coutp), lambda i, j: (i, 0, 0)))

    kernel = functools.partial(_mm_kernel, nk=gk, k_axis=1,
                               apply_in_bn=apply_in_bn, compute_dtype=a.dtype)
    y, psum, psq = pl.pallas_call(
        kernel,
        grid=(gm, gk),
        in_specs=in_specs,
        out_specs=out_specs,
        out_shape=out_shape,
        scratch_shapes=[pltpu.VMEM((tm, coutp), jnp.float32)],
        compiler_params=pltpu.CompilerParams(
            dimension_semantics=("parallel", "arbitrary"),
            vmem_limit_bytes=VMEM_LIMIT),
    )(*args)
    return y, psum, psq


def _shortcut_conv(x, w2c, *, out_dtype, tro_target=8):
    """Stride-2 1x1 projection shortcut.  Even rows are selected by the
    BlockSpec on a free reshape view, even columns by zero weight rows; no
    host-side strided slice."""
    n, h, w, cin = x.shape
    assert h % 2 == 0 and w % 2 == 0
    ho, wo = h // 2, w // 2
    coutp = w2c.shape[-1]
    xv = x.reshape(n * ho, 2, wo, 2 * cin)        # free view
    tro = _pick_tile(ho, tro_target, 1)
    rbn = ho // tro
    m2 = n * ho * wo
    tm = tro * wo

    kernel = functools.partial(_mm_kernel, nk=1, k_axis=None,
                               apply_in_bn=False, compute_dtype=x.dtype)
    out_shape = (jax.ShapeDtypeStruct((m2, coutp), out_dtype),
                 jax.ShapeDtypeStruct((n * rbn, 1, coutp), jnp.float32),
                 jax.ShapeDtypeStruct((n * rbn, 1, coutp), jnp.float32))
    y, psum, psq = pl.pallas_call(
        kernel,
        grid=(n, rbn),
        in_specs=[pl.BlockSpec((tro, 1, wo, 2 * cin),
                               lambda b, rb: (b * rbn + rb, 0, 0, 0)),
                  pl.BlockSpec((2 * cin, coutp), lambda b, rb: (0, 0))],
        out_specs=(pl.BlockSpec((tm, coutp), lambda b, rb: (b * rbn + rb, 0)),
                   pl.BlockSpec((1, 1, coutp),
                                lambda b, rb: (b * rbn + rb, 0, 0)),
                   pl.BlockSpec((1, 1, coutp),
                                lambda b, rb: (b * rbn + rb, 0, 0))),
        out_shape=out_shape,
        scratch_shapes=[pltpu.VMEM((tm, coutp), jnp.float32)],
        compiler_params=pltpu.CompilerParams(
            dimension_semantics=("parallel", "arbitrary"),
            vmem_limit_bytes=VMEM_LIMIT),
    )(xv, w2c)
    return y, psum, psq


# --------------------------------------------------------------------------
# Kernel 2: 3x3 conv (stride 1 or 2, pad 1) as a 9-tap shifted-matmul
#           accumulation.  BN(prev)+ReLU is fused into the staging of the
#           input rows; padding / stride handled entirely in-kernel.
# --------------------------------------------------------------------------
def _conv3x3_kernel(*refs, stride, h, wo, tro, compute_dtype):
    s = stride
    n_slab = s
    slab_refs = refs[:n_slab]
    w_ref, scale_ref, shift_ref = refs[n_slab:n_slab + 3]
    y_ref, sum_ref, sq_ref = refs[n_slab + 3:n_slab + 6]
    xn_refs = refs[n_slab + 6:n_slab + 6 + n_slab]
    acc_ref = refs[n_slab + 6 + n_slab]

    col_off = (1,) if s == 1 else (0, 1)
    r0 = pl.program_id(1) * tro

    scale = scale_ref[...]                     # (1, Cin) f32
    shift = shift_ref[...]

    # Zero only the halo columns of the staging scratch (all rows that the
    # taps read are rewritten below, invalid rows as zeros).
    for q in range(n_slab):
        alloc_w = xn_refs[q].shape[2]
        wq = slab_refs[q].shape[2]
        co = col_off[q]
        zcol = jnp.zeros((xn_refs[q].shape[0], xn_refs[q].shape[1], 1,
                          xn_refs[q].shape[3]), compute_dtype)
        if co > 0:
            xn_refs[q][:, :, 0:1, :] = zcol
        if co + wq < alloc_w:
            xn_refs[q][:, :, co + wq:co + wq + 1, :] = zcol

    # Stage BN(prev)+ReLU-normalised input rows needed by this row block,
    # de-interleaved into (row-phase, phase-row) so every tap slice is static.
    r_need = (tro - 1) * s + 3
    for i in range(r_need):
        src = r0 * s + (i - 1)
        valid = jnp.logical_and(src >= 0, src < h)
        src_c = jnp.clip(src, 0, h - 1)
        for q in range(n_slab):
            wq = slab_refs[q].shape[2]
            co = col_off[q]
            row = slab_refs[q][0, pl.ds(src_c, 1), :, :]        # (1, wq, Cin)
            rown = jnp.maximum(row.astype(jnp.float32) * scale + shift, 0.0)
            rown = jnp.where(valid, rown, 0.0).astype(compute_dtype)
            xn_refs[q][i % s, (i // s):(i // s) + 1, co:co + wq, :] = rown

    # 9-tap shifted-matmul accumulation into the f32 VMEM accumulator.
    for kh in range(3):
        for kw in range(3):
            if s == 1:
                q, b0 = 0, kw
            else:
                q, b0 = ((1, 0), (0, 0), (1, 1))[kw]
            rp, a0 = kh % s, kh // s
            win = xn_refs[q][rp, a0:a0 + tro, b0:b0 + wo, :]    # (tro, wo, Cin)
            lhs = win.reshape(tro * wo, win.shape[-1])
            contrib = jnp.dot(lhs, w_ref[kh * 3 + kw],
                              preferred_element_type=jnp.float32)
            if kh == 0 and kw == 0:
                acc_ref[...] = contrib
            else:
                acc_ref[...] += contrib

    y = acc_ref[...].astype(y_ref.dtype)
    y_ref[...] = y
    yf = y.astype(jnp.float32)
    sum_ref[0] = jnp.sum(yf, axis=0, keepdims=True)
    sq_ref[0] = jnp.sum(yf * yf, axis=0, keepdims=True)


def conv3x3_bn_stats(x_img, w9, in_scale, in_shift, stride, *, out_dtype,
                     tro_target=8):
    """x_img: raw previous-conv output, NHWC (Cin multiple of 128).
       w9:    (9, Cin, CoutP) HWIO weights, tap-major, CoutP multiple of 128."""
    n, h, w, cin = x_img.shape
    coutp = w9.shape[-1]
    assert cin % 128 == 0 and coutp % 128 == 0
    s = stride
    if s == 1:
        ho, wo = h, w
        slab_args = [x_img]
        slab_specs = [pl.BlockSpec((1, h, w, cin), lambda b, rb: (b, 0, 0, 0))]
    else:
        assert s == 2 and h % 2 == 0 and w % 2 == 0
        ho, wo = h // 2, w // 2
        xv = x_img.reshape(n, h, wo, 2 * cin)   # free view: channel blocks == column parity
        slab_args = [xv, xv]
        slab_specs = [
            pl.BlockSpec((1, h, wo, cin), lambda b, rb: (b, 0, 0, 0)),   # even cols
            pl.BlockSpec((1, h, wo, cin), lambda b, rb: (b, 0, 0, 1)),   # odd cols
        ]
    tro = _pick_tile(ho, tro_target, 1)
    rbn = ho // tro
    m2 = n * ho * wo
    tm = tro * wo

    if s == 1:
        xn_shapes = [(1, tro + 2, w + 2, cin)]
    else:
        xn_shapes = [(2, tro + 1, wo, cin), (2, tro + 1, wo + 1, cin)]

    in_specs = slab_specs + [
        pl.BlockSpec((9, cin, coutp), lambda b, rb: (0, 0, 0)),
        pl.BlockSpec((1, cin), lambda b, rb: (0, 0)),
        pl.BlockSpec((1, cin), lambda b, rb: (0, 0)),
    ]
    args = slab_args + [w9, in_scale.reshape(1, cin).astype(jnp.float32),
                        in_shift.reshape(1, cin).astype(jnp.float32)]

    out_shape = (jax.ShapeDtypeStruct((m2, coutp), out_dtype),
                 jax.ShapeDtypeStruct((n * rbn, 1, coutp), jnp.float32),
                 jax.ShapeDtypeStruct((n * rbn, 1, coutp), jnp.float32))
    out_specs = (pl.BlockSpec((tm, coutp), lambda b, rb: (b * rbn + rb, 0)),
                 pl.BlockSpec((1, 1, coutp), lambda b, rb: (b * rbn + rb, 0, 0)),
                 pl.BlockSpec((1, 1, coutp), lambda b, rb: (b * rbn + rb, 0, 0)))

    kernel = functools.partial(_conv3x3_kernel, stride=s, h=h, wo=wo, tro=tro,
                               compute_dtype=x_img.dtype)
    y, psum, psq = pl.pallas_call(
        kernel,
        grid=(n, rbn),
        in_specs=in_specs,
        out_specs=out_specs,
        out_shape=out_shape,
        scratch_shapes=[pltpu.VMEM(sh, x_img.dtype) for sh in xn_shapes]
                      + [pltpu.VMEM((tm, coutp), jnp.float32)],
        compiler_params=pltpu.CompilerParams(
            dimension_semantics=("parallel", "arbitrary"),
            vmem_limit_bytes=VMEM_LIMIT),
    )(*args)
    return y, psum, psq, (ho, wo)


# --------------------------------------------------------------------------
# Kernel 3: fused bn3 (+ shortcut BN) + residual add + final ReLU.
# --------------------------------------------------------------------------
def _bn_add_relu_kernel(*refs, proj_bn):
    if proj_bn:
        y_ref, s3_ref, h3_ref, sc_ref, ss_ref, hs_ref, o_ref = refs
    else:
        y_ref, s3_ref, h3_ref, sc_ref, o_ref = refs
    y = y_ref[...].astype(jnp.float32) * s3_ref[...] + h3_ref[...]
    sc = sc_ref[...].astype(jnp.float32)
    if proj_bn:
        sc = sc * ss_ref[...] + hs_ref[...]
    o_ref[...] = jnp.maximum(y + sc, 0.0).astype(o_ref.dtype)


def bn_add_relu(y3, scale3, shift3, sc, scale_s=None, shift_s=None, *,
                out_dtype=jnp.float32, tm_target=1024):
    m, c = y3.shape
    tm = _pick_tile(m, tm_target, 8, min_steps=2)
    gm = m // tm
    proj = scale_s is not None

    in_specs = [pl.BlockSpec((tm, c), lambda i: (i, 0)),
                pl.BlockSpec((1, c), lambda i: (0, 0)),
                pl.BlockSpec((1, c), lambda i: (0, 0)),
                pl.BlockSpec((tm, c), lambda i: (i, 0))]
    args = [y3, scale3.reshape(1, c).astype(jnp.float32),
            shift3.reshape(1, c).astype(jnp.float32), sc]
    if proj:
        in_specs += [pl.BlockSpec((1, c), lambda i: (0, 0)),
                     pl.BlockSpec((1, c), lambda i: (0, 0))]
        args += [scale_s.reshape(1, c).astype(jnp.float32),
                 shift_s.reshape(1, c).astype(jnp.float32)]

    return pl.pallas_call(
        functools.partial(_bn_add_relu_kernel, proj_bn=proj),
        grid=(gm,),
        in_specs=in_specs,
        out_specs=pl.BlockSpec((tm, c), lambda i: (i, 0)),
        out_shape=jax.ShapeDtypeStruct((m, c), out_dtype),
        compiler_params=pltpu.CompilerParams(
            dimension_semantics=("parallel",),
            vmem_limit_bytes=VMEM_LIMIT),
    )(*args)


# --------------------------------------------------------------------------
# JAX glue: fold BN batch stats into a single per-channel FMA (scale, shift).
# --------------------------------------------------------------------------
def _bn_scale_shift(psum, psq, count, gamma, beta):
    # Note: E[x^2]-E[x]^2 in f32; fine at these scales (see review notes).
    s = jnp.sum(psum, axis=(0, 1))
    q = jnp.sum(psq, axis=(0, 1))
    mean = s / count
    var = jnp.maximum(q / count - mean * mean, 0.0)   # biased, torch BN train
    scale = gamma * jax.lax.rsqrt(var + EPS)
    shift = beta - mean * scale
    return scale, shift


# --------------------------------------------------------------------------
# Bottleneck block forward.
# --------------------------------------------------------------------------
def bottleneck_forward(x, params, stride, *, compute_dtype=jnp.bfloat16):
    n, h, w, cin = x.shape
    planes = params["w1"].shape[1]
    cout = params["w3"].shape[1]
    cd = compute_dtype
    planes_p = _round_up(max(planes, 128), 128)   # lane-dense conv1/conv2 width
    cout_p = _round_up(max(cout, 128), 128)       # lane-dense conv3/shortcut width

    xc = x.astype(cd)
    w1 = _pad_to(params["w1"], (cin, planes_p)).astype(cd)
    w2 = _pad_to(params["w2"].reshape(9, planes, planes),
                 (9, planes_p, planes_p)).astype(cd)
    w3 = _pad_to(params["w3"], (planes_p, cout_p)).astype(cd)
    g1 = _pad_to(params["g1"], (planes_p,)); b1 = _pad_to(params["b1"], (planes_p,))
    g2 = _pad_to(params["g2"], (planes_p,)); b2 = _pad_to(params["b2"], (planes_p,))
    g3 = _pad_to(params["g3"], (cout_p,));   b3 = _pad_to(params["b3"], (cout_p,))

    m1 = n * h * w
    # conv1 (1x1) + bn1 stats
    y1, s1, q1 = conv1x1_bn_stats(xc.reshape(m1, cin), w1, out_dtype=cd)
    scale1, shift1 = _bn_scale_shift(s1, q1, m1, g1, b1)

    # conv2 (3x3, stride, pad 1), bn1-normalise+ReLU fused on the input read,
    # + bn2 stats.  All padding / stride handling is in-kernel.
    y2, s2, q2, (ho, wo) = conv3x3_bn_stats(
        y1.reshape(n, h, w, planes_p), w2, scale1, shift1, stride, out_dtype=cd)
    m2 = n * ho * wo
    scale2, shift2 = _bn_scale_shift(s2, q2, m2, g2, b2)

    # conv3 (1x1) with bn2-normalise+ReLU fused prologue, + bn3 stats.
    y3, s3, q3 = conv1x1_bn_stats(y2, w3, scale2, shift2, out_dtype=cd)
    scale3, shift3 = _bn_scale_shift(s3, q3, m2, g3, b3)

    if stride != 1 or cin != cout:
        ws = _pad_to(params["ws"], (cin, cout_p)).astype(cd)
        gs = _pad_to(params["gs"], (cout_p,)); bs = _pad_to(params["bs"], (cout_p,))
        if stride == 1:
            ysc, ss, qs = conv1x1_bn_stats(xc.reshape(m1, cin), ws, out_dtype=cd)
        else:
            # Even-col selection via zero weight rows, even-row selection via
            # the BlockSpec on a free reshape view.
            w2c = jnp.concatenate([ws, jnp.zeros_like(ws)], axis=0)
            ysc, ss, qs = _shortcut_conv(xc, w2c, out_dtype=cd)
        scs, shs = _bn_scale_shift(ss, qs, m2, gs, bs)
        out = bn_add_relu(y3, scale3, shift3, ysc, scs, shs)
    else:
        sc = xc.reshape(m2, cout)
        if cout_p != cout:
            # TODO(synk): rare path; pad identity-shortcut channels instead of
            # supporting sub-128 lane widths in the fused epilogue kernel.
            sc = jnp.pad(sc, ((0, 0), (0, cout_p - cout)))
        out = bn_add_relu(y3, scale3, shift3, sc)

    out = out.reshape(n, ho, wo, cout_p)
    if cout_p != cout:
        out = out[..., :cout]
    return out


# --------------------------------------------------------------------------
# Pure-JAX reference (dtype-parametric so the bf16 path can be checked with a
# meaningful tolerance).
# --------------------------------------------------------------------------
def bottleneck_reference(x, params, stride, compute_dtype=jnp.float32):
    cd = compute_dtype

    def conv(v, w_hwio, s, p):
        return jax.lax.conv_general_dilated(
            v.astype(cd), w_hwio.astype(cd), (s, s), [(p, p), (p, p)],
            dimension_numbers=("NHWC", "HWIO", "NHWC"),
            preferred_element_type=jnp.float32)

    def bn(v, g, b, relu):
        mean = v.mean(axis=(0, 1, 2), keepdims=True)
        var = v.var(axis=(0, 1, 2), keepdims=True)        # biased
        y = (v - mean) * jax.lax.rsqrt(var + EPS) * g + b
        return jnp.maximum(y, 0.0) if relu else y

    cin = x.shape[-1]
    planes = params["w1"].shape[1]
    cout = params["w3"].shape[1]
    out = bn(conv(x, params["w1"].reshape(1, 1, cin, planes), 1, 0),
             params["g1"], params["b1"], True)
    out = bn(conv(out, params["w2"], stride, 1), params["g2"], params["b2"], True)
    out = bn(conv(out, params["w3"].reshape(1, 1, planes, cout), 1, 0),
             params["g3"], params["b3"], False)
    if stride != 1 or cin != cout:
        sc = bn(conv(x, params["ws"].reshape(1, 1, cin, cout), stride, 0),
                params["gs"], params["bs"], False)
    else:
        sc = x.astype(cd).astype(jnp.float32)
    return jnp.maximum(out + sc, 0.0)


# --------------------------------------------------------------------------
if __name__ == "__main__":
    root = jax.random.PRNGKey(0)
    k_par_a, k_par_b, k_in_a, k_in_b = jax.random.split(root, 4)

    def make_params(k, cin, planes, expansion=4):
        cout = expansion * planes
        ks = jax.random.split(k, 12)
        return {
            "w1": 0.1 * jax.random.normal(ks[0], (cin, planes), jnp.float32),
            "g1": 1.0 + 0.1 * jax.random.normal(ks[1], (planes,), jnp.float32),
            "b1": 0.1 * jax.random.normal(ks[2], (planes,), jnp.float32),
            "w2": 0.1 * jax.random.normal(ks[3], (3, 3, planes, planes), jnp.float32),
            "g2": 1.0 + 0.1 * jax.random.normal(ks[4], (planes,), jnp.float32),
            "b2": 0.1 * jax.random.normal(ks[5], (planes,), jnp.float32),
            "w3": 0.1 * jax.random.normal(ks[6], (planes, cout), jnp.float32),
            "g3": 1.0 + 0.1 * jax.random.normal(ks[7], (cout,), jnp.float32),
            "b3": 0.1 * jax.random.normal(ks[8], (cout,), jnp.float32),
            "ws": 0.1 * jax.random.normal(ks[9], (cin, cout), jnp.float32),
            "gs": 1.0 + 0.1 * jax.random.normal(ks[10], (cout,), jnp.float32),
            "bs": 0.1 * jax.random.normal(ks[11], (cout,), jnp.float32),
        }

    fwd = jax.jit(bottleneck_forward, static_argnames=("stride", "compute_dtype"))

    # ---- config A: stride-2 projection block (layer transition) ----------
    N, H, W, cin, planes = 2, 16, 16, 64, 32
    pA = make_params(k_par_a, cin, planes)
    xA = jax.random.normal(k_in_a, (N, H, W, cin), jnp.float32)

    outA = jax.block_until_ready(fwd(xA, pA, stride=2, compute_dtype=jnp.float32))
    refA = bottleneck_reference(xA, pA, 2, jnp.float32)
    assert outA.shape == (N, H // 2, W // 2, 4 * planes), outA.shape
    errA = float(jnp.max(jnp.abs(outA - refA)))
    assert jnp.allclose(outA, refA, rtol=1e-3, atol=1e-3), ("f32 proj", errA)

    outAb = jax.block_until_ready(fwd(xA, pA, stride=2, compute_dtype=jnp.bfloat16))
    refAb = bottleneck_reference(xA, pA, 2, jnp.bfloat16)
    errAb = float(jnp.max(jnp.abs(outAb - refAb)))
    assert jnp.allclose(outAb, refAb, rtol=5e-2, atol=5e-2), ("bf16 proj", errAb)

    # ---- config B: stride-1 identity-shortcut block -----------------------
    cinB = 4 * planes
    pB = make_params(k_par_b, cinB, planes)
    xB = jnp.maximum(
        jax.random.normal(k_in_b, (N, H, W, cinB), jnp.float32), 0.0)

    outB = jax.block_until_ready(fwd(xB, pB, stride=1, compute_dtype=jnp.float32))
    refB = bottleneck_reference(xB, pB, 1, jnp.float32)
    assert outB.shape == (N, H, W, cinB), outB.shape
    errB = float(jnp.max(jnp.abs(outB - refB)))
    assert jnp.allclose(outB, refB, rtol=1e-3, atol=1e-3), ("f32 identity", errB)

    print("KERNEL_OK")
</pallas_src>

<mosaic_0001>
module attributes {stable_mosaic.version = 11 : i64} {
  func.func @_mm_kernel(%arg0: i32, %arg1: i32, %arg2: memref<256x64xf32, #tpu.memory_space<vmem>>, %arg3: memref<64x128xf32, #tpu.memory_space<vmem>>, %arg4: memref<256x128xf32, #tpu.memory_space<vmem>>, %arg5: memref<1x1x128xf32, #tpu.memory_space<vmem>>, %arg6: memref<1x1x128xf32, #tpu.memory_space<vmem>>, %arg7: memref<256x128xf32, #tpu.memory_space<vmem>>) attributes {dimension_semantics = [#tpu.dimension_semantics<parallel>, #tpu.dimension_semantics<arbitrary>], iteration_bounds = array<i64: 2, 1>, scalar_prefetch = 0 : i64, scratch_operands = 1 : i64, tpu.core_type = #tpu.core_type<tc>, window_params = [{transform_indices = @transform_0, window_bounds = array<i64: 256, 64>}, {transform_indices = @transform_1, window_bounds = array<i64: 64, 128>}, {transform_indices = @transform_2, window_bounds = array<i64: 256, 128>}, {transform_indices = @transform_3, window_bounds = array<i64: 1, 1, 128>}, {transform_indices = @transform_4, window_bounds = array<i64: 1, 1, 128>}]} {
    %c0 = arith.constant 0 : index
    %c0_0 = arith.constant 0 : index
    %0 = vector.load %arg2[%c0, %c0_0] : memref<256x64xf32, #tpu.memory_space<vmem>>, vector<256x64xf32>
    %c0_1 = arith.constant 0 : index
    %c0_2 = arith.constant 0 : index
    %1 = vector.load %arg3[%c0_1, %c0_2] : memref<64x128xf32, #tpu.memory_space<vmem>>, vector<64x128xf32>
    %cst = arith.constant dense<0.000000e+00> : vector<256x128xf32>
    %2 = tpu.matmul %0, %1, %cst {dimension_numbers = #tpu.dot_dimension_numbers<[1], [0], [0], [1], [0, 0, 1, 1], [], []>} : vector<256x64xf32>, vector<64x128xf32>, vector<256x128xf32> -> vector<256x128xf32>
    %c0_i32 = arith.constant 0 : i32
    %3 = arith.cmpi eq, %arg1, %c0_i32 : i32
    %4 = arith.extui %3 : i1 to i32
    %c0_i32_3 = arith.constant 0 : i32
    %5 = arith.cmpi ne, %4, %c0_i32_3 : i32
    scf.if %5 {
      %cst_10 = arith.constant 0.000000e+00 : f32
      %12 = vector.broadcast %cst_10 : f32 to vector<256x128xf32>
      %c0_11 = arith.constant 0 : index
      %c0_12 = arith.constant 0 : index
      %13 = vector.load %arg7[%c0_11, %c0_12] : memref<256x128xf32, #tpu.memory_space<vmem>>, vector<256x128xf32>
      tpu.vector_store %arg7[%c0_11, %c0_12], %12 {strides = array<i32>} : memref<256x128xf32, #tpu.memory_space<vmem>>, vector<256x128xf32>,
    } else {
    }
    %c0_4 = arith.constant 0 : index
    %c0_5 = arith.constant 0 : index
    %6 = vector.load %arg7[%c0_4, %c0_5] : memref<256x128xf32, #tpu.memory_space<vmem>>, vector<256x128xf32>
    %7 = arith.addf %6, %2 : vector<256x128xf32>
    %c0_6 = arith.constant 0 : index
    %c0_7 = arith.constant 0 : index
    %8 = vector.load %arg7[%c0_6, %c0_7] : memref<256x128xf32, #tpu.memory_space<vmem>>, vector<256x128xf32>
    tpu.vector_store %arg7[%c0_6, %c0_7], %7 {strides = array<i32>} : memref<256x128xf32, #tpu.memory_space<vmem>>, vector<256x128xf32>,
    %c0_i32_8 = arith.constant 0 : i32
    %9 = arith.cmpi eq, %arg1, %c0_i32_8 : i32
    %10 = arith.extui %9 : i1 to i32
    %c0_i32_9 = arith.constant 0 : i32
    %11 = arith.cmpi ne, %10, %c0_i32_9 : i32
    scf.if %11 {
      %c0_10 = arith.constant 0 : index
      %c0_11 = arith.constant 0 : index
      %12 = vector.load %arg7[%c0_10, %c0_11] : memref<256x128xf32, #tpu.memory_space<vmem>>, vector<256x128xf32>
      %c0_12 = arith.constant 0 : index
      %c0_13 = arith.constant 0 : index
      %13 = vector.load %arg4[%c0_12, %c0_13] : memref<256x128xf32, #tpu.memory_space<vmem>>, vector<256x128xf32>
      tpu.vector_store %arg4[%c0_12, %c0_13], %12 {strides = array<i32>} : memref<256x128xf32, #tpu.memory_space<vmem>>, vector<256x128xf32>,
      %cst_14 = arith.constant dense<0.000000e+00> : vector<128xf32>
      %14 = vector.multi_reduction <add>, %12, %cst_14 [0] : vector<256x128xf32> to vector<128xf32>
      %15 = vector.shape_cast %14 : vector<128xf32> to vector<1x128xf32>
      %c0_15 = arith.constant 0 : index
      %c0_16 = arith.constant 0 : index
      %c0_17 = arith.constant 0 : index
      %16 = vector.load %arg5[%c0_15, %c0_16, %c0_17] : memref<1x1x128xf32, #tpu.memory_space<vmem>>, vector<1x1x128xf32>
      %17 = vector.shape_cast %16 : vector<1x1x128xf32> to vector<1x128xf32>
      %18 = vector.shape_cast %15 : vector<1x128xf32> to vector<1x1x128xf32>
      tpu.vector_store %arg5[%c0_15, %c0_16, %c0_17], %18 {strides = array<i32>} : memref<1x1x128xf32, #tpu.memory_space<vmem>>, vector<1x1x128xf32>,
      %19 = arith.mulf %12, %12 : vector<256x128xf32>
      %cst_18 = arith.constant dense<0.000000e+00> : vector<128xf32>
      %20 = vector.multi_reduction <add>, %19, %cst_18 [0] : vector<256x128xf32> to vector<128xf32>
      %21 = vector.shape_cast %20 : vector<128xf32> to vector<1x128xf32>
      %c0_19 = arith.constant 0 : index
      %c0_20 = arith.constant 0 : index
      %c0_21 = arith.constant 0 : index
      %22 = vector.load %arg6[%c0_19, %c0_20, %c0_21] : memref<1x1x128xf32, #tpu.memory_space<vmem>>, vector<1x1x128xf32>
      %23 = vector.shape_cast %22 : vector<1x1x128xf32> to vector<1x128xf32>
      %24 = vector.shape_cast %21 : vector<1x128xf32> to vector<1x1x128xf32>
      tpu.vector_store %arg6[%c0_19, %c0_20, %c0_21], %24 {strides = array<i32>} : memref<1x1x128xf32, #tpu.memory_space<vmem>>, vector<1x1x128xf32>,
    } else {
    }
    return
  }
  func.func @transform_0(%arg0: i32, %arg1: i32) -> (i32, i32) {
    %c0_i32 = arith.constant 0 : i32
    return %arg0, %arg1 : i32, i32
  }
  func.func @transform_1(%arg0: i32, %arg1: i32) -> (i32, i32) {
    %c0_i32 = arith.constant 0 : i32
    %c0_i32_0 = arith.constant 0 : i32
    return %arg1, %c0_i32 : i32, i32
  }
  func.func @transform_2(%arg0: i32, %arg1: i32) -> (i32, i32) {
    %c0_i32 = arith.constant 0 : i32
    %c0_i32_0 = arith.constant 0 : i32
    return %arg0, %c0_i32 : i32, i32
  }
  func.func @transform_3(%arg0: i32, %arg1: i32) -> (i32, i32, i32) {
    %c0_i32 = arith.constant 0 : i32
    %c0_i32_0 = arith.constant 0 : i32
    %c0_i32_1 = arith.constant 0 : i32
    return %arg0, %c0_i32, %c0_i32_0 : i32, i32, i32
  }
  func.func @transform_4(%arg0: i32, %arg1: i32) -> (i32, i32, i32) {
    %c0_i32 = arith.constant 0 : i32
    %c0_i32_0 = arith.constant 0 : i32
    %c0_i32_1 = arith.constant 0 : i32
    return %arg0, %c0_i32, %c0_i32_0 : i32, i32, i32
  }
}

module attributes {stable_mosaic.version = 11 : i64} {
  func.func @_conv3x3_kernel(%arg0: i32, %arg1: i32, %arg2: memref<1x16x8x128xf32, #tpu.memory_space<vmem>>, %arg3: memref<1x16x8x128xf32, #tpu.memory_space<vmem>>, %arg4: memref<9x128x128xf32, #tpu.memory_space<vmem>>, %arg5: memref<1x128xf32, #tpu.memory_space<vmem>>, %arg6: memref<1x128xf32, #tpu.memory_space<vmem>>, %arg7: memref<64x128xf32, #tpu.memory_space<vmem>>, %arg8: memref<1x1x128xf32, #tpu.memory_space<vmem>>, %arg9: memref<1x1x128xf32, #tpu.memory_space<vmem>>, %arg10: memref<2x9x8x128xf32, #tpu.memory_space<vmem>>, %arg11: memref<2x9x9x128xf32, #tpu.memory_space<vmem>>, %arg12: memref<64x128xf32, #tpu.memory_space<vmem>>) attributes {dimension_semantics = [#tpu.dimension_semantics<parallel>, #tpu.dimension_semantics<arbitrary>], iteration_bounds = array<i64: 2, 1>, scalar_prefetch = 0 : i64, scratch_operands = 3 : i64, tpu.core_type = #tpu.core_type<tc>, window_params = [{transform_indices = @transform_0, window_bounds = array<i64: 1, 16, 8, 128>}, {transform_indices = @transform_1, window_bounds = array<i64: 1, 16, 8, 128>}, {pipeline_mode = #tpu.pipeline_mode<synchronous>, transform_indices = @transform_2, window_bounds = array<i64: 9, 128, 128>}, {pipeline_mode = #tpu.pipeline_mode<synchronous>, transform_indices = @transform_3, window_bounds = array<i64: 1, 128>}, {pipeline_mode = #tpu.pipeline_mode<synchronous>, transform_indices = @transform_4, window_bounds = array<i64: 1, 128>}, {transform_indices = @transform_5, window_bounds = array<i64: 64, 128>}, {transform_indices = @transform_6, window_bounds = array<i64: 1, 1, 128>}, {transform_indices = @transform_7, window_bounds = array<i64: 1, 1, 128>}]} {
    %c8_i32 = arith.constant 8 : i32
    %0 = arith.muli %arg1, %c8_i32 : i32
    %c0 = arith.constant 0 : index
    %c0_0 = arith.constant 0 : index
    %1 = vector.load %arg5[%c0, %c0_0] : memref<1x128xf32, #tpu.memory_space<vmem>>, vector<1x128xf32>
    %c0_1 = arith.constant 0 : index
    %c0_2 = arith.constant 0 : index
    %2 = vector.load %arg6[%c0_1, %c0_2] : memref<1x128xf32, #tpu.memory_space<vmem>>, vector<1x128xf32>
    %cst = arith.constant 0.000000e+00 : f32
    %3 = vector.broadcast %cst : f32 to vector<2x9x1x128xf32>
    %c0_3 = arith.constant 0 : index
    %c0_4 = arith.constant 0 : index
    %c0_5 = arith.constant 0 : index
    %c0_6 = arith.constant 0 : index
    %4 = vector.load %arg11[%c0_3, %c0_4, %c0_5, %c0_6] : memref<2x9x9x128xf32, #tpu.memory_space<vmem>>, vector<2x9x1x128xf32>
    tpu.vector_store %arg11[%c0_3, %c0_4, %c0_5, %c0_6], %3 {strides = array<i32>} : memref<2x9x9x128xf32, #tpu.memory_space<vmem>>, vector<2x9x1x128xf32>,
    %c2_i32 = arith.constant 2 : i32
    %5 = arith.muli %0, %c2_i32 : i32
    %c-1_i32 = arith.constant -1 : i32
    %6 = arith.addi %5, %c-1_i32 : i32
    %c0_i32 = arith.constant 0 : i32
    %7 = arith.cmpi sge, %6, %c0_i32 : i32
    %c16_i32 = arith.constant 16 : i32
    %8 = arith.cmpi slt, %6, %c16_i32 : i32
    %9 = arith.andi %7, %8 : i1
    %c0_i32_7 = arith.constant 0 : i32
    %c15_i32 = arith.constant 15 : i32
    %10 = arith.maxsi %c0_i32_7, %6 : i32
    %11 = arith.minsi %c15_i32, %10 : i32
    %c0_8 = arith.constant 0 : index
    %12 = arith.index_cast %11 : i32 to index
    %c0_9 = arith.constant 0 : index
    %c0_10 = arith.constant 0 : index
    %13 = vector.load %arg2[%c0_8, %12, %c0_9, %c0_10] : memref<1x16x8x128xf32, #tpu.memory_space<vmem>>, vector<1x1x8x128xf32>
    %14 = vector.shape_cast %13 : vector<1x1x8x128xf32> to vector<1x8x128xf32>
    %15 = vector.shape_cast %1 : vector<1x128xf32> to vector<1x1x128xf32>
    %16 = vector.broadcast %15 : vector<1x1x128xf32> to vector<1x8x128xf32>
    %17 = arith.mulf %14, %16 : vector<1x8x128xf32>
    %18 = vector.shape_cast %2 : vector<1x128xf32> to vector<1x1x128xf32>
    %19 = vector.broadcast %18 : vector<1x1x128xf32> to vector<1x8x128xf32>
    %20 = arith.addf %17, %19 : vector<1x8x128xf32>
    %cst_11 = arith.constant 0.000000e+00 : f32
    %21 = vector.broadcast %cst_11 : f32 to vector<1x8x128xf32>
    %22 = arith.maximumf %20, %21 : vector<1x8x128xf32>
    %cst_12 = arith.constant 0.000000e+00 : f32
    %23 = vector.broadcast %cst_12 : f32 to vector<1x8x128xf32>
    %24 = arith.select %9, %22, %23 : vector<1x8x128xf32>
    %c0_13 = arith.constant 0 : index
    %c0_14 = arith.constant 0 : index
    %c0_15 = arith.constant 0 : index
    %c0_16 = arith.constant 0 : index
    %25 = vector.load %arg10[%c0_13, %c0_14, %c0_15, %c0_16] : memref<2x9x8x128xf32, #tpu.memory_space<vmem>>, vector<1x1x8x128xf32>
    %26 = vector.shape_cast %25 : vector<1x1x8x128xf32> to vector<1x8x128xf32>
    %27 = vector.shape_cast %24 : vector<1x8x128xf32> to vector<1x1x8x128xf32>
    tpu.vector_store %arg10[%c0_13, %c0_14, %c0_15, %c0_16], %27 {strides = array<i32>} : memref<2x9x8x128xf32, #tpu.memory_space<vmem>>, vector<1x1x8x128xf32>,
    %c0_17 = arith.constant 0 : index
    %28 = arith.index_cast %11 : i32 to index
    %c0_18 = arith.constant 0 : index
    %c0_19 = arith.constant 0 : index
    %29 = vector.load %arg3[%c0_17, %28, %c0_18, %c0_19] : memref<1x16x8x128xf32, #tpu.memory_space<vmem>>, vector<1x1x8x128xf32>
    %30 = vector.shape_cast %29 : vector<1x1x8x128xf32> to vector<1x8x128xf32>
    %31 = vector.shape_cast %1 : vector<1x128xf32> to vector<1x1x128xf32>
    %32 = vector.broadcast %31 : vector<1x1x128xf32> to vector<1x8x128xf32>
    %33 = arith.mulf %30, %32 : vector<1x8x128xf32>
    %34 = vector.shape_cast %2 : vector<1x128xf32> to vector<1x1x128xf32>
    %35 = vector.broadcast %34 : vector<1x1x128xf32> to vector<1x8x128xf32>
    %36 = arith.addf %33, %35 : vector<1x8x128xf32>
    %cst_20 = arith.constant 0.000000e+00 : f32
    %37 = vector.broadcast %cst_20 : f32 to vector<1x8x128xf32>
    %38 = arith.maximumf %36, %37 : vector<1x8x128xf32>
    %cst_21 = arith.constant 0.000000e+00 : f32
    %39 = vector.broadcast %cst_21 : f32 to vector<1x8x128xf32>
    %40 = arith.select %9, %38, %39 : vector<1x8x128xf32>
    %c0_22 = arith.constant 0 : index
    %c0_23 = arith.constant 0 : index
    %c1 = arith.constant 1 : index
    %c0_24 = arith.constant 0 : index
    %41 = vector.load %arg11[%c0_22, %c0_23, %c1, %c0_24] : memref<2x9x9x128xf32, #tpu.memory_space<vmem>>, vector<1x1x8x128xf32>
    %42 = vector.shape_cast %41 : vector<1x1x8x128xf32> to vector<1x8x128xf32>
    %43 = vector.shape_cast %40 : vector<1x8x128xf32> to vector<1x1x8x128xf32>
    tpu.vector_store %arg11[%c0_22, %c0_23, %c1, %c0_24], %43 {strides = array<i32>} : memref<2x9x9x128xf32, #tpu.memory_space<vmem>>, vector<1x1x8x128xf32>,
    %c2_i32_25 = arith.constant 2 : i32
    %44 = arith.muli %0, %c2_i32_25 : i32
    %c0_i32_26 = arith.constant 0 : i32
    %45 = arith.addi %44, %c0_i32_26 : i32
    %c0_i32_27 = arith.constant 0 : i32
    %46 = arith.cmpi sge, %45, %c0_i32_27 : i32
    %c16_i32_28 = arith.constant 16 : i32
    %47 = arith.cmpi slt, %45, %c16_i32_28 : i32
    %48 = arith.andi %46, %47 : i1
    %c0_i32_29 = arith.constant 0 : i32
    %c15_i32_30 = arith.constant 15 : i32
    %49 = arith.maxsi %c0_i32_29, %45 : i32
    %50 = arith.minsi %c15_i32_30, %49 : i32
    %c0_31 = arith.constant 0 : index
    %51 = arith.index_cast %50 : i32 to index
    %c0_32 = arith.constant 0 : index
    %c0_33 = arith.constant 0 : index
    %52 = vector.load %arg2[%c0_31, %51, %c0_32, %c0_33] : memref<1x16x8x128xf32, #tpu.memory_space<vmem>>, vector<1x1x8x128xf32>
    %53 = vector.shape_cast %52 : vector<1x1x8x128xf32> to vector<1x8x128xf32>
    %54 = vector.shape_cast %1 : vector<1x128xf32> to vector<1x1x128xf32>
    %55 = vector.broadcast %54 : vector<1x1x128xf32> to vector<1x8x128xf32>
    %56 = arith.mulf %53, %55 : vector<1x8x128xf32>
    %57 = vector.shape_cast %2 : vector<1x128xf32> to vector<1x1x128xf32>
    %58 = vector.broadcast %57 : vector<1x1x128xf32> to vector<1x8x128xf32>
    %59 = arith.addf %56, %58 : vector<1x8x128xf32>
    %cst_34 = arith.constant 0.000000e+00 : f32
    %60 = vector.broadcast %cst_34 : f32 to vector<1x8x128xf32>
    %61 = arith.maximumf %59, %60 : vector<1x8x128xf32>
    %cst_35 = arith.constant 0.000000e+00 : f32
    %62 = vector.broadcast %cst_35 : f32 to vector<1x8x128xf32>
    %63 = arith.select %48, %61, %62 : vector<1x8x128xf32>
    %c1_36 = arith.constant 1 : index
    %c0_37 = arith.constant 0 : index
    %c0_38 = arith.constant 0 : index
    %c0_39 = arith.constant 0 : index
    %64 = vector.load %arg10[%c1_36, %c0_37, %c0_38, %c0_39] : memref<2x9x8x128xf32, #tpu.memory_space<vmem>>, vector<1x1x8x128xf32>
    %65 = vector.shape_cast %64 : vector<1x1x8x128xf32> to vector<1x8x128xf32>
    %66 = vector.shape_cast %63 : vector<1x8x128xf32> to vector<1x1x8x128xf32>
    tpu.vector_store %arg10[%c1_36, %c0_37, %c0_38, %c0_39], %66 {strides = array<i32>} : memref<2x9x8x128xf32, #tpu.memory_space<vmem>>, vector<1x1x8x128xf32>,
    %c0_40 = arith.constant 0 : index
    %67 = arith.index_cast %50 : i32 to index
    %c0_41 = arith.constant 0 : index
    %c0_42 = arith.constant 0 : index
    %68 = vector.load %arg3[%c0_40, %67, %c0_41, %c0_42] : memref<1x16x8x128xf32, #tpu.memory_space<vmem>>, vector<1x1x8x128xf32>
    %69 = vector.shape_cast %68 : vector<1x1x8x128xf32> to vector<1x8x128xf32>
    %70 = vector.shape_cast %1 : vector<1x128xf32> to vector<1x1x128xf32>
    %71 = vector.broadcast %70 : vector<1x1x128xf32> to vector<1x8x128xf32>
    %72 = arith.mulf %69, %71 : vector<1x8x128xf32>
    %73 = vector.shape_cast %2 : vector<1x128xf32> to vector<1x1x128xf32>
    %74 = vector.broadcast %73 : vector<1x1x128xf32> to vector<1x8x128xf32>
    %75 = arith.addf %72, %74 : vector<1x8x128xf32>
    %cst_43 = arith.constant 0.000000e+00 : f32
    %76 = vector.broadcast %cst_43 : f32 to vector<1x8x128xf32>
    %77 = arith.maximumf %75, %76 : vector<1x8x128xf32>
    %cst_44 = arith.constant 0.000000e+00 : f32
    %78 = vector.broadcast %cst_44 : f32 to vector<1x8x128xf32>
    %79 = arith.select %48, %77, %78 : vector<1x8x128xf32>
    %c1_45 = arith.constant 1 : index
    %c0_46 = arith.constant 0 : index
    %c1_47 = arith.constant 1 : index
    %c0_48 = arith.constant 0 : index
    %80 = vector.load %arg11[%c1_45, %c0_46, %c1_47, %c0_48] : memref<2x9x9x128xf32, #tpu.memory_space<vmem>>, vector<1x1x8x128xf32>
    %81 = vector.shape_cast %80 : vector<1x1x8x128xf32> to vector<1x8x128xf32>
    %82 = vector.shape_cast %79 : vector<1x8x128xf32> to vector<1x1x8x128xf32>
    tpu.vector_store %arg11[%c1_45, %c0_46, %c1_47, %c0_48], %82 {strides = array<i32>} : memref<2x9x9x128xf32, #tpu.memory_space<vmem>>, vector<1x1x8x128xf32>,
    %c2_i32_49 = arith.constant 2 : i32
    %83 = arith.muli %0, %c2_i32_49 : i32
    %c1_i32 = arith.constant 1 : i32
    %84 = arith.addi %83, %c1_i32 : i32
    %c0_i32_50 = arith.constant 0 : i32
    %85 = arith.cmpi sge, %84, %c0_i32_50 : i32
    %c16_i32_51 = arith.constant 16 : i32
    %86 = arith.cmpi slt, %84, %c16_i32_51 : i32
    %87 = arith.andi %85, %86 : i1
    %c0_i32_52 = arith.constant 0 : i32
    %c15_i32_53 = arith.constant 15 : i32
    %88 = arith.maxsi %c0_i32_52, %84 : i32
    %89 = arith.minsi %c15_i32_53, %88 : i32
    %c0_54 = arith.constant 0 : index
    %90 = arith.index_cast %89 : i32 to index
    %c0_55 = arith.constant 0 : index
    %c0_56 = arith.constant 0 : index
    %91 = vector.load %arg2[%c0_54, %90, %c0_55, %c0_56] : memref<1x16x8x128xf32, #tpu.memory_space<vmem>>, vector<1x1x8x128xf32>
    %92 = vector.shape_cast %91 : vector<1x1x8x128xf32> to vector<1x8x128xf32>
    %93 = vector.shape_cast %1 : vector<1x128xf32> to vector<1x1x128xf32>
    %94 = vector.broadcast %93 : vector<1x1x128xf32> to vector<1x8x128xf32>
    %95 = arith.mulf %92, %94 : vector<1x8x128xf32>
    %96 = vector.shape_cast %2 : vector<1x128xf32> to vector<1x1x128xf32>
    %97 = vector.broadcast %96 : vector<1x1x128xf32> to vector<1x8x128xf32>
    %98 = arith.addf %95, %97 : vector<1x8x128xf32>
    %cst_57 = arith.constant 0.000000e+00 : f32
    %99 = vector.broadcast %cst_57 : f32 to vector<1x8x128xf32>
    %100 = arith.maximumf %98, %99 : vector<1x8x128xf32>
    %cst_58 = arith.constant 0.000000e+00 : f32
    %101 = vector.broadcast %cst_58 : f32 to vector<1x8x128xf32>
    %102 = arith.select %87, %100, %101 : vector<1x8x128xf32>
    %c0_59 = arith.constant 0 : index
    %c1_60 = arith.constant 1 : index
    %c0_61 = arith.constant 0 : index
    %c0_62 = arith.constant 0 : index
    %103 = vector.load %arg10[%c0_59, %c1_60, %c0_61, %c0_62] : memref<2x9x8x128xf32, #tpu.memory_space<vmem>>, vector<1x1x8x128xf32>
    %104 = vector.shape_cast %103 : vector<1x1x8x128xf32> to vector<1x8x128xf32>
    %105 = vector.shape_cast %102 : vector<1x8x128xf32> to vector<1x1x8x128xf32>
    tpu.vector_store %arg10[%c0_59, %c1_60, %c0_61, %c0_62], %105 {strides = array<i32>} : memref<2x9x8x128xf32, #tpu.memory_space<vmem>>, vector<1x1x8x128xf32>,
    %c0_63 = arith.constant 0 : index
    %106 = arith.index_cast %89 : i32 to index
    %c0_64 = arith.constant 0 : index
    %c0_65 = arith.constant 0 : index
    %107 = vector.load %arg3[%c0_63, %106, %c0_64, %c0_65] : memref<1x16x8x128xf32, #tpu.memory_space<vmem>>, vector<1x1x8x128xf32>
    %108 = vector.shape_cast %107 : vector<1x1x8x128xf32> to vector<1x8x128xf32>
    %109 = vector.shape_cast %1 : vector<1x128xf32> to vector<1x1x128xf32>
    %110 = vector.broadcast %109 : vector<1x1x128xf32> to vector<1x8x128xf32>
    %111 = arith.mulf %108, %110 : vector<1x8x128xf32>
    %112 = vector.shape_cast %2 : vector<1x128xf32> to vector<1x1x128xf32>
    %113 = vector.broadcast %112 : vector<1x1x128xf32> to vector<1x8x128xf32>
    %114 = arith.addf %111, %113 : vector<1x8x128xf32>
    %cst_66 = arith.constant 0.000000e+00 : f32
    %115 = vector.broadcast %cst_66 : f32 to vector<1x8x128xf32>
    %116 = arith.maximumf %114, %115 : vector<1x8x128xf32>
    %cst_67 = arith.constant 0.000000e+00 : f32
    %117 = vector.broadcast %cst_67 : f32 to vector<1x8x128xf32>
    %118 = arith.select %87, %116, %117 : vector<1x8x128xf32>
    %c0_68 = arith.constant 0 : index
    %c1_69 = arith.constant 1 : index
    %c1_70 = arith.constant 1 : index
    %c0_71 = arith.constant 0 : index
    %119 = vector.load %arg11[%c0_68, %c1_69, %c1_70, %c0_71] : memref<2x9x9x128xf32, #tpu.memory_space<vmem>>, vector<1x1x8x128xf32>
    %120 = vector.shape_cast %119 : vector<1x1x8x128xf32> to vector<1x8x128xf32>
    %121 = vector.shape_cast %118 : vector<1x8x128xf32> to vector<1x1x8x128xf32>
    tpu.vector_store %arg11[%c0_68, %c1_69, %c1_70, %c0_71], %121 {strides = array<i32>} : memref<2x9x9x128xf32, #tpu.memory_space<vmem>>, vector<1x1x8x128xf32>,
    %c2_i32_72 = arith.constant 2 : i32
    %122 = arith.muli %0, %c2_i32_72 : i32
    %c2_i32_73 = arith.constant 2 : i32
    %123 = arith.addi %122, %c2_i32_73 : i32
    %c0_i32_74 = arith.constant 0 : i32
    %124 = arith.cmpi sge, %123, %c0_i32_74 : i32
    %c16_i32_75 = arith.constant 16 : i32
    %125 = arith.cmpi slt, %123, %c16_i32_75 : i32
    %126 = arith.andi %124, %125 : i1
    %c0_i32_76 = arith.constant 0 : i32
    %c15_i32_77 = arith.constant 15 : i32
    %127 = arith.maxsi %c0_i32_76, %123 : i32
    %128 = arith.minsi %c15_i32_77, %127 : i32
    %c0_78 = arith.constant 0 : index
    %129 = arith.index_cast %128 : i32 to index
    %c0_79 = arith.constant 0 : index
    %c0_80 = arith.constant 0 : index
    %130 = vector.load %arg2[%c0_78, %129, %c0_79, %c0_80] : memref<1x16x8x128xf32, #tpu.memory_space<vmem>>, vector<1x1x8x128xf32>
    %131 = vector.shape_cast %130 : vector<1x1x8x128xf32> to vector<1x8x128xf32>
    %132 = vector.shape_cast %1 : vector<1x128xf32> to vector<1x1x128xf32>
    %133 = vector.broadcast %132 : vector<1x1x128xf32> to vector<1x8x128xf32>
    %134 = arith.mulf %131, %133 : vector<1x8x128xf32>
    %135 = vector.shape_cast %2 : vector<1x128xf32> to vector<1x1x128xf32>
    %136 = vector.broadcast %135 : vector<1x1x128xf32> to vector<1x8x128xf32>
    %137 = arith.addf %134, %136 : vector<1x8x128xf32>
    %cst_81 = arith.constant 0.000000e+00 : f32
    %138 = vector.broadcast %cst_81 : f32 to vector<1x8x128xf32>
    %139 = arith.maximumf %137, %138 : vector<1x8x128xf32>
    %cst_82 = arith.constant 0.000000e+00 : f32
    %140 = vector.broadcast %cst_82 : f32 to vector<1x8x128xf32>
    %141 = arith.select %126, %139, %140 : vector<1x8x128xf32>
    %c1_83 = arith.constant 1 : index
    %c1_84 = arith.constant 1 : index
    %c0_85 = arith.constant 0 : index
    %c0_86 = arith.constant 0 : index
    %142 = vector.load %arg10[%c1_83, %c1_84, %c0_85, %c0_86] : memref<2x9x8x128xf32, #tpu.memory_space<vmem>>, vector<1x1x8x128xf32>
    %143 = vector.shape_cast %142 : vector<1x1x8x128xf32> to vector<1x8x128xf32>
    %144 = vector.shape_cast %141 : vector<1x8x128xf32> to vector<1x1x8x128xf32>
    tpu.vector_store %arg10[%c1_83, %c1_84, %c0_85, %c0_86], %144 {strides = array<i32>} : memref<2x9x8x128xf32, #tpu.memory_space<vmem>>, vector<1x1x8x128xf32>,
    %c0_87 = arith.constant 0 : index
    %145 = arith.index_cast %128 : i32 to index
    %c0_88 = arith.constant 0 : index
    %c0_89 = arith.constant 0 : index
    %146 = vector.load %arg3[%c0_87, %145, %c0_88, %c0_89] : memref<1x16x8x128xf32, #tpu.memory_space<vmem>>, vector<1x1x8x128xf32>
    %147 = vector.shape_cast %146 : vector<1x1x8x128xf32> to vector<1x8x128xf32>
    %148 = vector.shape_cast %1 : vector<1x128xf32> to vector<1x1x128xf32>
    %149 = vector.broadcast %148 : vector<1x1x128xf32> to vector<1x8x128xf32>
    %150 = arith.mulf %147, %149 : vector<1x8x128xf32>
    %151 = vector.shape_cast %2 : vector<1x128xf32> to vector<1x1x128xf32>
    %152 = vector.broadcast %151 : vector<1x1x128xf32> to vector<1x8x128xf32>
    %153 = arith.addf %150, %152 : vector<1x8x128xf32>
    %cst_90 = arith.constant 0.000000e+00 : f32
    %154 = vector.broadcast %cst_90 : f32 to vector<1x8x128xf32>
    %155 = arith.maximumf %153, %154 : vector<1x8x128xf32>
    %cst_91 = arith.constant 0.000000e+00 : f32
    %156 = vector.broadcast %cst_91 : f32 to vector<1x8x128xf32>
    %157 = arith.select %126, %155, %156 : vector<1x8x128xf32>
    %c1_92 = arith.constant 1 : index
    %c1_93 = arith.constant 1 : index
    %c1_94 = arith.constant 1 : index
    %c0_95 = arith.constant 0 : index
    %158 = vector.load %arg11[%c1_92, %c1_93, %c1_94, %c0_95] : memref<2x9x9x128xf32, #tpu.memory_space<vmem>>, vector<1x1x8x128xf32>
    %159 = vector.shape_cast %158 : vector<1x1x8x128xf32> to vector<1x8x128xf32>
    %160 = vector.shape_cast %157 : vector<1x8x128xf32> to vector<1x1x8x128xf32>
    tpu.vector_store %arg11[%c1_92, %c1_93, %c1_94, %c0_95], %160 {strides = array<i32>} : memref<2x9x9x128xf32, #tpu.memory_space<vmem>>, vector<1x1x8x128xf32>,
    %c2_i32_96 = arith.constant 2 : i32
    %161 = arith.muli %0, %c2_i32_96 : i32
    %c3_i32 = arith.constant 3 : i32
    %162 = arith.addi %161, %c3_i32 : i32
    %c0_i32_97 = arith.constant 0 : i32
    %163 = arith.cmpi sge, %162, %c0_i32_97 : i32
    %c16_i32_98 = arith.constant 16 : i32
    %164 = arith.cmpi slt, %162, %c16_i32_98 : i32
    %165 = arith.andi %163, %164 : i1
    %c0_i32_99 = arith.constant 0 : i32
    %c15_i32_100 = arith.constant 15 : i32
    %166 = arith.maxsi %c0_i32_99, %162 : i32
    %167 = arith.minsi %c15_i32_100, %166 : i32
    %c0_101 = arith.constant 0 : index
    %168 = arith.index_cast %167 : i32 to index
    %c0_102 = arith.constant 0 : index
    %c0_103 = arith.constant 0 : index
    %169 = vector.load %arg2[%c0_101, %168, %c0_102, %c0_103] : memref<1x16x8x128xf32, #tpu.memory_space<vmem>>, vector<1x1x8x128xf32>
    %170 = vector.shape_cast %169 : vector<1x1x8x128xf32> to vector<1x8x128xf32>
    %171 = vector.shape_cast %1 : vector<1x128xf32> to vector<1x1x128xf32>
    %172 = vector.broadcast %171 : vector<1x1x128xf32> to vector<1x8x128xf32>
    %173 = arith.mulf %170, %172 : vector<1x8x128xf32>
    %174 = vector.shape_cast %2 : vector<1x128xf32> to vector<1x1x128xf32>
    %175 = vector.broadcast %174 : vector<1x1x128xf32> to vector<1x8x128xf32>
    %176 = arith.addf %173, %175 : vector<1x8x128xf32>
    %cst_104 = arith.constant 0.000000e+00 : f32
    %177 = vector.broadcast %cst_104 : f32 to vector<1x8x128xf32>
    %178 = arith.maximumf %176, %177 : vector<1x8x128xf32>
    %cst_105 = arith.constant 0.000000e+00 : f32
    %179 = vector.broadcast %cst_105 : f32 to vector<1x8x128xf32>
    %180 = arith.select %165, %178, %179 : vector<1x8x128xf32>
    %c0_106 = arith.constant 0 : index
    %c2 = arith.constant 2 : index
    %c0_107 = arith.constant 0 : index
    %c0_108 = arith.constant 0 : index
    %181 = vector.load %arg10[%c0_106, %c2, %c0_107, %c0_108] : memref<2x9x8x128xf32, #tpu.memory_space<vmem>>, vector<1x1x8x128xf32>
    %182 = vector.shape_cast %181 : vector<1x1x8x128xf32> to vector<1x8x128xf32>
    %183 = vector.shape_cast %180 : vector<1x8x128xf32> to vector<1x1x8x128xf32>
    tpu.vector_store %arg10[%c0_106, %c2, %c0_107, %c0_108], %183 {strides = array<i32>} : memref<2x9x8x128xf32, #tpu.memory_space<vmem>>, vector<1x1x8x128xf32>,
    %c0_109 = arith.constant 0 : index
    %184 = arith.index_cast %167 : i32 to index
    %c0_110 = arith.constant 0 : index
    %c0_111 = arith.constant 0 : index
    %185 = vector.load %arg3[%c0_109, %184, %c0_110, %c0_111] : memref<1x16x8x128xf32, #tpu.memory_space<vmem>>, vector<1x1x8x128xf32>
    %186 = vector.shape_cast %185 : vector<1x1x8x128xf32> to vector<1x8x128xf32>
    %187 = vector.shape_cast %1 : vector<1x128xf32> to vector<1x1x128xf32>
    %188 = vector.broadcast %187 : vector<1x1x128xf32> to vector<1x8x128xf32>
    %189 = arith.mulf %186, %188 : vector<1x8x128xf32>
    %190 = vector.shape_cast %2 : vector<1x128xf32> to vector<1x1x128xf32>
    %191 = vector.broadcast %190 : vector<1x1x128xf32> to vector<1x8x128xf32>
    %192 = arith.addf %189, %191 : vector<1x8x128xf32>
    %cst_112 = arith.constant 0.000000e+00 : f32
    %193 = vector.broadcast %cst_112 : f32 to vector<1x8x128xf32>
    %194 = arith.maximumf %192, %193 : vector<1x8x128xf32>
    %cst_113 = arith.constant 0.000000e+00 : f32
    %195 = vector.broadcast %cst_113 : f32 to vector<1x8x128xf32>
    %196 = arith.select %165, %194, %195 : vector<1x8x128xf32>
    %c0_114 = arith.constant 0 : index
    %c2_115 = arith.constant 2 : index
    %c1_116 = arith.constant 1 : index
    %c0_117 = arith.constant 0 : index
    %197 = vector.load %arg11[%c0_114, %c2_115, %c1_116, %c0_117] : memref<2x9x9x128xf32, #tpu.memory_space<vmem>>, vector<1x1x8x128xf32>
    %198 = vector.shape_cast %197 : vector<1x1x8x128xf32> to vector<1x8x128xf32>
    %199 = vector.shape_cast %196 : vector<1x8x128xf32> to vector<1x1x8x128xf32>
    tpu.vector_store %arg11[%c0_114, %c2_115, %c1_116, %c0_117], %199 {strides = array<i32>} : memref<2x9x9x128xf32, #tpu.memory_space<vmem>>, vector<1x1x8x128xf32>,
    %c2_i32_118 = arith.constant 2 : i32
    %200 = arith.muli %0, %c2_i32_118 : i32
    %c4_i32 = arith.constant 4 : i32
    %201 = arith.addi %200, %c4_i32 : i32
    %c0_i32_119 = arith.constant 0 : i32
    %202 = arith.cmpi sge, %201, %c0_i32_119 : i32
    %c16_i32_120 = arith.constant 16 : i32
    %203 = arith.cmpi slt, %201, %c16_i32_120 : i32
    %204 = arith.andi %202, %203 : i1
    %c0_i32_121 = arith.constant 0 : i32
    %c15_i32_122 = arith.constant 15 : i32
    %205 = arith.maxsi %c0_i32_121, %201 : i32
    %206 = arith.minsi %c15_i32_122, %205 : i32
    %c0_123 = arith.constant 0 : index
    %207 = arith.index_cast %206 : i32 to index
    %c0_124 = arith.constant 0 : index
    %c0_125 = arith.constant 0 : index
    %208 = vector.load %arg2[%c0_123, %207, %c0_124, %c0_125] : memref<1x16x8x128xf32, #tpu.memory_space<vmem>>, vector<1x1x8x128xf32>
    %209 = vector.shape_cast %208 : vector<1x1x8x128xf32> to vector<1x8x128xf32>
    %210 = vector.shape_cast %1 : vector<1x128xf32> to vector<1x1x128xf32>
    %211 = vector.broadcast %210 : vector<1x1x128xf32> to vector<1x8x128xf32>
    %212 = arith.mulf %209, %211 : vector<1x8x128xf32>
    %213 = vector.shape_cast %2 : vector<1x128xf32> to vector<1x1x128xf32>
    %214 = vector.broadcast %213 : vector<1x1x128xf32> to vector<1x8x128xf32>
    %215 = arith.addf %212, %214 : vector<1x8x128xf32>
    %cst_126 = arith.constant 0.000000e+00 : f32
    %216 = vector.broadcast %cst_126 : f32 to vector<1x8x128xf32>
    %217 = arith.maximumf %215, %216 : vector<1x8x128xf32>
    %cst_127 = arith.constant 0.000000e+00 : f32
    %218 = vector.broadcast %cst_127 : f32 to vector<1x8x128xf32>
    %219 = arith.select %204, %217, %218 : vector<1x8x128xf32>
    %c1_128 = arith.constant 1 : index
    %c2_129 = arith.constant 2 : index
    %c0_130 = arith.constant 0 : index
    %c0_131 = arith.constant 0 : index
    %220 = vector.load %arg10[%c1_128, %c2_129, %c0_130, %c0_131] : memref<2x9x8x128xf32, #tpu.memory_space<vmem>>, vector<1x1x8x128xf32>
    %221 = vector.shape_cast %220 : vector<1x1x8x128xf32> to vector<1x8x128xf32>
    %222 = vector.shape_cast %219 : vector<1x8x128xf32> to vector<1x1x8x128xf32>
    tpu.vector_store %arg10[%c1_128, %c2_129, %c0_130, %c0_131], %222 {strides = array<i32>} : memref<2x9x8x128xf32, #tpu.memory_space<vmem>>, vector<1x1x8x128xf32>,
    %c0_132 = arith.constant 0 : index
    %223 = arith.index_cast %206 : i32 to index
    %c0_133 = arith.constant 0 : index
    %c0_134 = arith.constant 0 : index
    %224 = vector.load %arg3[%c0_132, %223, %c0_133, %c0_134] : memref<1x16x8x128xf32, #tpu.memory_space<vmem>>, vector<1x1x8x128xf32>
    %225 = vector.shape_cast %224 : vector<1x1x8x128xf32> to vector<1x8x128xf32>
    %226 = vector.shape_cast %1 : vector<1x128xf32> to vector<1x1x128xf32>
    %227 = vector.broadcast %226 : vector<1x1x128xf32> to vector<1x8x128xf32>
    %228 = arith.mulf %225, %227 : vector<1x8x128xf32>
    %229 = vector.shape_cast %2 : vector<1x128xf32> to vector<1x1x128xf32>
    %230 = vector.broadcast %229 : vector<1x1x128xf32> to vector<1x8x128xf32>
    %231 = arith.addf %228, %230 : vector<1x8x128xf32>
    %cst_135 = arith.constant 0.000000e+00 : f32
    %232 = vector.broadcast %cst_135 : f32 to vector<1x8x128xf32>
    %233 = arith.maximumf %231, %232 : vector<1x8x128xf32>
    %cst_136 = arith.constant 0.000000e+00 : f32
    %234 = vector.broadcast %cst_136 : f32 to vector<1x8x128xf32>
    %235 = arith.select %204, %233, %234 : vector<1x8x128xf32>
    %c1_137 = arith.constant 1 : index
    %c2_138 = arith.constant 2 : index
    %c1_139 = arith.constant 1 : index
    %c0_140 = arith.constant 0 : index
    %236 = vector.load %arg11[%c1_137, %c2_138, %c1_139, %c0_140] : memref<2x9x9x128xf32, #tpu.memory_space<vmem>>, vector<1x1x8x128xf32>
    %237 = vector.shape_cast %236 : vector<1x1x8x128xf32> to vector<1x8x128xf32>
    %238 = vector.shape_cast %235 : vector<1x8x128xf32> to vector<1x1x8x128xf32>
    tpu.vector_store %arg11[%c1_137, %c2_138, %c1_139, %c0_140], %238 {strides = array<i32>} : memref<2x9x9x128xf32, #tpu.memory_space<vmem>>, vector<1x1x8x128xf32>,
    %c2_i32_141 = arith.constant 2 : i32
    %239 = arith.muli %0, %c2_i32_141 : i32
    %c5_i32 = arith.constant 5 : i32
    %240 = arith.addi %239, %c5_i32 : i32
    %c0_i32_142 = arith.constant 0 : i32
    %241 = arith.cmpi sge, %240, %c0_i32_142 : i32
    %c16_i32_143 = arith.constant 16 : i32
    %242 = arith.cmpi slt, %240, %c16_i32_143 : i32
    %243 = arith.andi %241, %242 : i1
    %c0_i32_144 = arith.constant 0 : i32
    %c15_i32_145 = arith.constant 15 : i32
    %244 = arith.maxsi %c0_i32_144, %240 : i32
    %245 = arith.minsi %c15_i32_145, %244 : i32
    %c0_146 = arith.constant 0 : index
    %246 = arith.index_cast %245 : i32 to index
    %c0_147 = arith.constant 0 : index
    %c0_148 = arith.constant 0 : index
    %247 = vector.load %arg2[%c0_146, %246, %c0_147, %c0_148] : memref<1x16x8x128xf32, #tpu.memory_space<vmem>>, vector<1x1x8x128xf32>
    %248 = vector.shape_cast %247 : vector<1x1x8x128xf32> to vector<1x8x128xf32>
    %249 = vector.shape_cast %1 : vector<1x128xf32> to vector<1x1x128xf32>
    %250 = vector.broadcast %249 : vector<1x1x128xf32> to vector<1x8x128xf32>
    %251 = arith.mulf %248, %250 : vector<1x8x128xf32>
    %252 = vector.shape_cast %2 : vector<1x128xf32> to vector<1x1x128xf32>
    %253 = vector.broadcast %252 : vector<1x1x128xf32> to vector<1x8x128xf32>
    %254 = arith.addf %251, %253 : vector<1x8x128xf32>
    %cst_149 = arith.constant 0.000000e+00 : f32
    %255 = vector.broadcast %cst_149 : f32 to vector<1x8x128xf32>
    %256 = arith.maximumf %254, %255 : vector<1x8x128xf32>
    %cst_150 = arith.constant 0.000000e+00 : f32
    %257 = vector.broadcast %cst_150 : f32 to vector<1x8x128xf32>
    %258 = arith.select %243, %256, %257 : vector<1x8x128xf32>
    %c0_151 = arith.constant 0 : index
    %c3 = arith.constant 3 : index
    %c0_152 = arith.constant 0 : index
    %c0_153 = arith.constant 0 : index
    %259 = vector.load %arg10[%c0_151, %c3, %c0_152, %c0_153] : memref<2x9x8x128xf32, #tpu.memory_space<vmem>>, vector<1x1x8x128xf32>
    %260 = vector.shape_cast %259 : vector<1x1x8x128xf32> to vector<1x8x128xf32>
    %261 = vector.shape_cast %258 : vector<1x8x128xf32> to vector<1x1x8x128xf32>
    tpu.vector_store %arg10[%c0_151, %c3, %c0_152, %c0_153], %261 {strides = array<i32>} : memref<2x9x8x128xf32, #tpu.memory_space<vmem>>, vector<1x1x8x128xf32>,
    %c0_154 = arith.constant 0 : index
    %262 = arith.index_cast %245 : i32 to index
    %c0_155 = arith.constant 0 : index
    %c0_156 = arith.constant 0 : index
    %263 = vector.load %arg3[%c0_154, %262, %c0_155, %c0_156] : memref<1x16x8x128xf32, #tpu.memory_space<vmem>>, vector<1x1x8x128xf32>
    %264 = vector.shape_cast %263 : vector<1x1x8x128xf32> to vector<1x8x128xf32>
    %265 = vector.shape_cast %1 : vector<1x128xf32> to vector<1x1x128xf32>
    %266 = vector.broadcast %265 : vector<1x1x128xf32> to vector<1x8x128xf32>
    %267 = arith.mulf %264, %266 : vector<1x8x128xf32>
    %268 = vector.shape_cast %2 : vector<1x128xf32> to vector<1x1x128xf32>
    %269 = vector.broadcast %268 : vector<1x1x128xf32> to vector<1x8x128xf32>
    %270 = arith.addf %267, %269 : vector<1x8x128xf32>
    %cst_157 = arith.constant 0.000000e+00 : f32
    %271 = vector.broadcast %cst_157 : f32 to vector<1x8x128xf32>
    %272 = arith.maximumf %270, %271 : vector<1x8x128xf32>
    %cst_158 = arith.constant 0.000000e+00 : f32
    %273 = vector.broadcast %cst_158 : f32 to vector<1x8x128xf32>
    %274 = arith.select %243, %272, %273 : vector<1x8x128xf32>
    %c0_159 = arith.constant 0 : index
    %c3_160 = arith.constant 3 : index
    %c1_161 = arith.constant 1 : index
    %c0_162 = arith.constant 0 : index
    %275 = vector.load %arg11[%c0_159, %c3_160, %c1_161, %c0_162] : memref<2x9x9x128xf32, #tpu.memory_space<vmem>>, vector<1x1x8x128xf32>
    %276 = vector.shape_cast %275 : vector<1x1x8x128xf32> to vector<1x8x128xf32>
    %277 = vector.shape_cast %274 : vector<1x8x128xf32> to vector<1x1x8x128xf32>
    tpu.vector_store %arg11[%c0_159, %c3_160, %c1_161, %c0_162], %277 {strides = array<i32>} : memref<2x9x9x128xf32, #tpu.memory_space<vmem>>, vector<1x1x8x128xf32>,
    %c2_i32_163 = arith.constant 2 : i32
    %278 = arith.muli %0, %c2_i32_163 : i32
    %c6_i32 = arith.constant 6 : i32
    %279 = arith.addi %278, %c6_i32 : i32
    %c0_i32_164 = arith.constant 0 : i32
    %280 = arith.cmpi sge, %279, %c0_i32_164 : i32
    %c16_i32_165 = arith.constant 16 : i32
    %281 = arith.cmpi slt, %279, %c16_i32_165 : i32
    %282 = arith.andi %280, %281 : i1
    %c0_i32_166 = arith.constant 0 : i32
    %c15_i32_167 = arith.constant 15 : i32
    %283 = arith.maxsi %c0_i32_166, %279 : i32
    %284 = arith.minsi %c15_i32_167, %283 : i32
    %c0_168 = arith.constant 0 : index
    %285 = arith.index_cast %284 : i32 to index
    %c0_169 = arith.constant 0 : index
    %c0_170 = arith.constant 0 : index
    %286 = vector.load %arg2[%c0_168, %285, %c0_169, %c0_170] : memref<1x16x8x128xf32, #tpu.memory_space<vmem>>, vector<1x1x8x128xf32>
    %287 = vector.shape_cast %286 : vector<1x1x8x128xf32> to vector<1x8x128xf32>
    %288 = vector.shape_cast %1 : vector<1x128xf32> to vector<1x1x128xf32>
    %289 = vector.broadcast %288 : vector<1x1x128xf32> to vector<1x8x128xf32>
    %290 = arith.mulf %287, %289 : vector<1x8x128xf32>
    %291 = vector.shape_cast %2 : vector<1x128xf32> to vector<1x1x128xf32>
    %292 = vector.broadcast %291 : vector<1x1x128xf32> to vector<1x8x128xf32>
    %293 = arith.addf %290, %292 : vector<1x8x128xf32>
    %cst_171 = arith.constant 0.000000e+00 : f32
    %294 = vector.broadcast %cst_171 : f32 to vector<1x8x128xf32>
    %295 = arith.maximumf %293, %294 : vector<1x8x128xf32>
    %cst_172 = arith.constant 0.000000e+00 : f32
    %296 = vector.broadcast %cst_172 : f32 to vector<1x8x128xf32>
    %297 = arith.select %282, %295, %296 : vector<1x8x128xf32>
    %c1_173 = arith.constant 1 : index
    %c3_174 = arith.constant 3 : index
    %c0_175 = arith.constant 0 : index
    %c0_176 = arith.constant 0 : index
    %298 = vector.load %arg10[%c1_173, %c3_174, %c0_175, %c0_176] : memref<2x9x8x128xf32, #tpu.memory_space<vmem>>, vector<1x1x8x128xf32>
    %299 = vector.shape_cast %298 : vector<1x1x8x128xf32> to vector<1x8x128xf32>
    %300 = vector.shape_cast %297 : vector<1x8x128xf32> to vector<1x1x8x128xf32>
    tpu.vector_store %arg10[%c1_173, %c3_174, %c0_175, %c0_176], %300 {strides = array<i32>} : memref<2x9x8x128xf32, #tpu.memory_space<vmem>>, vector<1x1x8x128xf32>,
    %c0_177 = arith.constant 0 : index
    %301 = arith.index_cast %284 : i32 to index
    %c0_178 = arith.constant 0 : index
    %c0_179 = arith.constant 0 : index
    %302 = vector.load %arg3[%c0_177, %301, %c0_178, %c0_179] : memref<1x16x8x128xf32, #tpu.memory_space<vmem>>, vector<1x1x8x128xf32>
    %303 = vector.shape_cast %302 : vector<1x1x8x128xf32> to vector<1x8x128xf32>
    %304 = vector.shape_cast %1 : vector<1x128xf32> to vector<1x1x128xf32>
    %305 = vector.broadcast %304 : vector<1x1x128xf32> to vector<1x8x128xf32>
    %306 = arith.mulf %303, %305 : vector<1x8x128xf32>
    %307 = vector.shape_cast %2 : vector<1x128xf32> to vector<1x1x128xf32>
    %308 = vector.broadcast %307 : vector<1x1x128xf32> to vector<1x8x128xf32>
    %309 = arith.addf %306, %308 : vector<1x8x128xf32>
    %cst_180 = arith.constant 0.000000e+00 : f32
    %310 = vector.broadcast %cst_180 : f32 to vector<1x8x128xf32>
    %311 = arith.maximumf %309, %310 : vector<1x8x128xf32>
    %cst_181 = arith.constant 0.000000e+00 : f32
    %312 = vector.broadcast %cst_181 : f32 to vector<1x8x128xf32>
    %313 = arith.select %282, %311, %312 : vector<1x8x128xf32>
    %c1_182 = arith.constant 1 : index
    %c3_183 = arith.constant 3 : index
    %c1_184 = arith.constant 1 : index
    %c0_185 = arith.constant 0 : index
    %314 = vector.load %arg11[%c1_182, %c3_183, %c1_184, %c0_185] : memref<2x9x9x128xf32, #tpu.memory_space<vmem>>, vector<1x1x8x128xf32>
    %315 = vector.shape_cast %314 : vector<1x1x8x128xf32> to vector<1x8x128xf32>
    %316 = vector.shape_cast %313 : vector<1x8x128xf32> to vector<1x1x8x128xf32>
    tpu.vector_store %arg11[%c1_182, %c3_183, %c1_184, %c0_185], %316 {strides = array<i32>} : memref<2x9x9x128xf32, #tpu.memory_space<vmem>>, vector<1x1x8x128xf32>,
    %c2_i32_186 = arith.constant 2 : i32
    %317 = arith.muli %0, %c2_i32_186 : i32
    %c7_i32 = arith.constant 7 : i32
    %318 = arith.addi %317, %c7_i32 : i32
    %c0_i32_187 = arith.constant 0 : i32
    %319 = arith.cmpi sge, %318, %c0_i32_187 : i32
    %c16_i32_188 = arith.constant 16 : i32
    %320 = arith.cmpi slt, %318, %c16_i32_188 : i32
    %321 = arith.andi %319, %320 : i1
    %c0_i32_189 = arith.constant 0 : i32
    %c15_i32_190 = arith.constant 15 : i32
    %322 = arith.maxsi %c0_i32_189, %318 : i32
    %323 = arith.minsi %c15_i32_190, %322 : i32
    %c0_191 = arith.constant 0 : index
    %324 = arith.index_cast %323 : i32 to index
    %c0_192 = arith.constant 0 : index
    %c0_193 = arith.constant 0 : index
    %325 = vector.load %arg2[%c0_191, %324, %c0_192, %c0_193] : memref<1x16x8x128xf32, #tpu.memory_space<vmem>>, vector<1x1x8x128xf32>
    %326 = vector.shape_cast %325 : vector<1x1x8x128xf32> to vector<1x8x128xf32>
    %327 = vector.shape_cast %1 : vector<1x128xf32> to vector<1x1x128xf32>
    %328 = vector.broadcast %327 : vector<1x1x128xf32> to vector<1x8x128xf32>
    %329 = arith.mulf %326, %328 : vector<1x8x128xf32>
    %330 = vector.shape_cast %2 : vector<1x128xf32> to vector<1x1x128xf32>
    %331 = vector.broadcast %330 : vector<1x1x128xf32> to vector<1x8x128xf32>
    %332 = arith.addf %329, %331 : vector<1x8x128xf32>
    %cst_194 = arith.constant 0.000000e+00 : f32
    %333 = vector.broadcast %cst_194 : f32 to vector<1x8x128xf32>
    %334 = arith.maximumf %332, %333 : vector<1x8x128xf32>
    %cst_195 = arith.constant 0.000000e+00 : f32
    %335 = vector.broadcast %cst_195 : f32 to vector<1x8x128xf32>
    %336 = arith.select %321, %334, %335 : vector<1x8x128xf32>
    %c0_196 = arith.constant 0 : index
    %c4 = arith.constant 4 : index
    %c0_197 = arith.constant 0 : index
    %c0_198 = arith.constant 0 : index
    %337 = vector.load %arg10[%c0_196, %c4, %c0_197, %c0_198] : memref<2x9x8x128xf32, #tpu.memory_space<vmem>>, vector<1x1x8x128xf32>
    %338 = vector.shape_cast %337 : vector<1x1x8x128xf32> to vector<1x8x128xf32>
    %339 = vector.shape_cast %336 : vector<1x8x128xf32> to vector<1x1x8x128xf32>
    tpu.vector_store %arg10[%c0_196, %c4, %c0_197, %c0_198], %339 {strides = array<i32>} : memref<2x9x8x128xf32, #tpu.memory_space<vmem>>, vector<1x1x8x128xf32>,
    %c0_199 = arith.constant 0 : index
    %340 = arith.index_cast %323 : i32 to index
    %c0_200 = arith.constant 0 : index
    %c0_201 = arith.constant 0 : index
    %341 = vector.load %arg3[%c0_199, %340, %c0_200, %c0_201] : memref<1x16x8x128xf32, #tpu.memory_space<vmem>>, vector<1x1x8x128xf32>
    %342 = vector.shape_cast %341 : vector<1x1x8x128xf32> to vector<1x8x128xf32>
    %343 = vector.shape_cast %1 : vector<1x128xf32> to vector<1x1x128xf32>
    %344 = vector.broadcast %343 : vector<1x1x128xf32> to vector<1x8x128xf32>
    %345 = arith.mulf %342, %344 : vector<1x8x128xf32>
    %346 = vector.shape_cast %2 : vector<1x128xf32> to vector<1x1x128xf32>
    %347 = vector.broadcast %346 : vector<1x1x128xf32> to vector<1x8x128xf32>
    %348 = arith.addf %345, %347 : vector<1x8x128xf32>
    %cst_202 = arith.constant 0.000000e+00 : f32
    %349 = vector.broadcast %cst_202 : f32 to vector<1x8x128xf32>
    %350 = arith.maximumf %348, %349 : vector<1x8x128xf32>
    %cst_203 = arith.constant 0.000000e+00 : f32
    %351 = vector.broadcast %cst_203 : f32 to vector<1x8x128xf32>
    %352 = arith.select %321, %350, %351 : vector<1x8x128xf32>
    %c0_204 = arith.constant 0 : index
    %c4_205 = arith.constant 4 : index
    %c1_206 = arith.constant 1 : index
    %c0_207 = arith.constant 0 : index
    %353 = vector.load %arg11[%c0_204, %c4_205, %c1_206, %c0_207] : memref<2x9x9x128xf32, #tpu.memory_space<vmem>>, vector<1x1x8x128xf32>
    %354 = vector.shape_cast %353 : vector<1x1x8x128xf32> to vector<1x8x128xf32>
    %355 = vector.shape_cast %352 : vector<1x8x128xf32> to vector<1x1x8x128xf32>
    tpu.vector_store %arg11[%c0_204, %c4_205, %c1_206, %c0_207], %355 {strides = array<i32>} : memref<2x9x9x128xf32, #tpu.memory_space<vmem>>, vector<1x1x8x128xf32>,
    %c2_i32_208 = arith.constant 2 : i32
    %356 = arith.muli %0, %c2_i32_208 : i32
    %c8_i32_209 = arith.constant 8 : i32
    %357 = arith.addi %356, %c8_i32_209 : i32
    %c0_i32_210 = arith.constant 0 : i32
    %358 = arith.cmpi sge, %357, %c0_i32_210 : i32
    %c16_i32_211 = arith.constant 16 : i32
    %359 = arith.cmpi slt, %357, %c16_i32_211 : i32
    %360 = arith.andi %358, %359 : i1
    %c0_i32_212 = arith.constant 0 : i32
    %c15_i32_213 = arith.constant 15 : i32
    %361 = arith.maxsi %c0_i32_212, %357 : i32
    %362 = arith.minsi %c15_i32_213, %361 : i32
    %c0_214 = arith.constant 0 : index
    %363 = arith.index_cast %362 : i32 to index
    %c0_215 = arith.constant 0 : index
    %c0_216 = arith.constant 0 : index
    %364 = vector.load %arg2[%c0_214, %363, %c0_215, %c0_216] : memref<1x16x8x128xf32, #tpu.memory_space<vmem>>, vector<1x1x8x128xf32>
    %365 = vector.shape_cast %364 : vector<1x1x8x128xf32> to vector<1x8x128xf32>
    %366 = vector.shape_cast %1 : vector<1x128xf32> to vector<1x1x128xf32>
    %367 = vector.broadcast %366 : vector<1x1x128xf32> to vector<1x8x128xf32>
    %368 = arith.mulf %365, %367 : vector<1x8x128xf32>
    %369 = vector.shape_cast %2 : vector<1x128xf32> to vector<1x1x128xf32>
    %370 = vector.broadcast %369 : vector<1x1x128xf32> to vector<1x8x128xf32>
    %371 = arith.addf %368, %370 : vector<1x8x128xf32>
    %cst_217 = arith.constant 0.000000e+00 : f32
    %372 = vector.broadcast %cst_217 : f32 to vector<1x8x128xf32>
    %373 = arith.maximumf %371, %372 : vector<1x8x128xf32>
    %cst_218 = arith.constant 0.000000e+00 : f32
    %374 = vector.broadcast %cst_218 : f32 to vector<1x8x128xf32>
    %375 = arith.select %360, %373, %374 : vector<1x8x128xf32>
    %c1_219 = arith.constant 1 : index
    %c4_220 = arith.constant 4 : index
    %c0_221 = arith.constant 0 : index
    %c0_222 = arith.constant 0 : index
    %376 = vector.load %arg10[%c1_219, %c4_220, %c0_221, %c0_222] : memref<2x9x8x128xf32, #tpu.memory_space<vmem>>, vector<1x1x8x128xf32>
    %377 = vector.shape_cast %376 : vector<1x1x8x128xf32> to vector<1x8x128xf32>
    %378 = vector.shape_cast %375 : vector<1x8x128xf32> to vector<1x1x8x128xf32>
    tpu.vector_store %arg10[%c1_219, %c4_220, %c0_221, %c0_222], %378 {strides = array<i32>} : memref<2x9x8x128xf32, #tpu.memory_space<vmem>>, vector<1x1x8x128xf32>,
    %c0_223 = arith.constant 0 : index
    %379 = arith.index_cast %362 : i32 to index
    %c0_224 = arith.constant 0 : index
    %c0_225 = arith.constant 0 : index
    %380 = vector.load %arg3[%c0_223, %379, %c0_224, %c0_225] : memref<1x16x8x128xf32, #tpu.memory_space<vmem>>, vector<1x1x8x128xf32>
    %381 = vector.shape_cast %380 : vector<1x1x8x128xf32> to vector<1x8x128xf32>
    %382 = vector.shape_cast %1 : vector<1x128xf32> to vector<1x1x128xf32>
    %383 = vector.broadcast %382 : vector<1x1x128xf32> to vector<1x8x128xf32>
    %384 = arith.mulf %381, %383 : vector<1x8x128xf32>
    %385 = vector.shape_cast %2 : vector<1x128xf32> to vector<1x1x128xf32>
    %386 = vector.broadcast %385 : vector<1x1x128xf32> to vector<1x8x128xf32>
    %387 = arith.addf %384, %386 : vector<1x8x128xf32>
    %cst_226 = arith.constant 0.000000e+00 : f32
    %388 = vector.broadcast %cst_226 : f32 to vector<1x8x128xf32>
    %389 = arith.maximumf %387, %388 : vector<1x8x128xf32>
    %cst_227 = arith.constant 0.000000e+00 : f32
    %390 = vector.broadcast %cst_227 : f32 to vector<1x8x128xf32>
    %391 = arith.select %360, %389, %390 : vector<1x8x128xf32>
    %c1_228 = arith.constant 1 : index
    %c4_229 = arith.constant 4 : index
    %c1_230 = arith.constant 1 : index
    %c0_231 = arith.constant 0 : index
    %392 = vector.load %arg11[%c1_228, %c4_229, %c1_230, %c0_231] : memref<2x9x9x128xf32, #tpu.memory_space<vmem>>, vector<1x1x8x128xf32>
    %393 = vector.shape_cast %392 : vector<1x1x8x128xf32> to vector<1x8x128xf32>
    %394 = vector.shape_cast %391 : vector<1x8x128xf32> to vector<1x1x8x128xf32>
    tpu.vector_store %arg11[%c1_228, %c4_229, %c1_230, %c0_231], %394 {strides = array<i32>} : memref<2x9x9x128xf32, #tpu.memory_space<vmem>>, vector<1x1x8x128xf32>,
    %c2_i32_232 = arith.constant 2 : i32
    %395 = arith.muli %0, %c2_i32_232 : i32
    %c9_i32 = arith.constant 9 : i32
    %396 = arith.addi %395, %c9_i32 : i32
    %c0_i32_233 = arith.constant 0 : i32
    %397 = arith.cmpi sge, %396, %c0_i32_233 : i32
    %c16_i32_234 = arith.constant 16 : i32
    %398 = arith.cmpi slt, %396, %c16_i32_234 : i32
    %399 = arith.andi %397, %398 : i1
    %c0_i32_235 = arith.constant 0 : i32
    %c15_i32_236 = arith.constant 15 : i32
    %400 = arith.maxsi %c0_i32_235, %396 : i32
    %401 = arith.minsi %c15_i32_236, %400 : i32
    %c0_237 = arith.constant 0 : index
    %402 = arith.index_cast %401 : i32 to index
    %c0_238 = arith.constant 0 : index
    %c0_239 = arith.constant 0 : index
    %403 = vector.load %arg2[%c0_237, %402, %c0_238, %c0_239] : memref<1x16x8x128xf32, #tpu.memory_space<vmem>>, vector<1x1x8x128xf32>
    %404 = vector.shape_cast %403 : vector<1x1x8x128xf32> to vector<1x8x128xf32>
    %405 = vector.shape_cast %1 : vector<1x128xf32> to vector<1x1x128xf32>
    %406 = vector.broadcast %405 : vector<1x1x128xf32> to vector<1x8x128xf32>
    %407 = arith.mulf %404, %406 : vector<1x8x128xf32>
    %408 = vector.shape_cast %2 : vector<1x128xf32> to vector<1x1x128xf32>
    %409 = vector.broadcast %408 : vector<1x1x128xf32> to vector<1x8x128xf32>
    %410 = arith.addf %407, %409 : vector<1x8x128xf32>
    %cst_240 = arith.constant 0.000000e+00 : f32
    %411 = vector.broadcast %cst_240 : f32 to vector<1x8x128xf32>
    %412 = arith.maximumf %410, %411 : vector<1x8x128xf32>
    %cst_241 = arith.constant 0.000000e+00 : f32
    %413 = vector.broadcast %cst_241 : f32 to vector<1x8x128xf32>
    %414 = arith.select %399, %412, %413 : vector<1x8x128xf32>
    %c0_242 = arith.constant 0 : index
    %c5 = arith.constant 5 : index
    %c0_243 = arith.constant 0 : index
    %c0_244 = arith.constant 0 : index
    %415 = vector.load %arg10[%c0_242, %c5, %c0_243, %c0_244] : memref<2x9x8x128xf32, #tpu.memory_space<vmem>>, vector<1x1x8x128xf32>
    %416 = vector.shape_cast %415 : vector<1x1x8x128xf32> to vector<1x8x128xf32>
    %417 = vector.shape_cast %414 : vector<1x8x128xf32> to vector<1x1x8x128xf32>
    tpu.vector_store %arg10[%c0_242, %c5, %c0_243, %c0_244], %417 {strides = array<i32>} : memref<2x9x8x128xf32, #tpu.memory_space<vmem>>, vector<1x1x8x128xf32>,
    %c0_245 = arith.constant 0 : index
    %418 = arith.index_cast %401 : i32 to index
    %c0_246 = arith.constant 0 : index
    %c0_247 = arith.constant 0 : index
    %419 = vector.load %arg3[%c0_245, %418, %c0_246, %c0_247] : memref<1x16x8x128xf32, #tpu.memory_space<vmem>>, vector<1x1x8x128xf32>
    %420 = vector.shape_cast %419 : vector<1x1x8x128xf32> to vector<1x8x128xf32>
    %421 = vector.shape_cast %1 : vector<1x128xf32> to vector<1x1x128xf32>
    %422 = vector.broadcast %421 : vector<1x1x128xf32> to vector<1x8x128xf32>
    %423 = arith.mulf %420, %422 : vector<1x8x128xf32>
    %424 = vector.shape_cast %2 : vector<1x128xf32> to vector<1x1x128xf32>
    %425 = vector.broadcast %424 : vector<1x1x128xf32> to vector<1x8x128xf32>
    %426 = arith.addf %423, %425 : vector<1x8x128xf32>
    %cst_248 = arith.constant 0.000000e+00 : f32
    %427 = vector.broadcast %cst_248 : f32 to vector<1x8x128xf32>
    %428 = arith.maximumf %426, %427 : vector<1x8x128xf32>
    %cst_249 = arith.constant 0.000000e+00 : f32
    %429 = vector.broadcast %cst_249 : f32 to vector<1x8x128xf32>
    %430 = arith.select %399, %428, %429 : vector<1x8x128xf32>
    %c0_250 = arith.constant 0 : index
    %c5_251 = arith.constant 5 : index
    %c1_252 = arith.constant 1 : index
    %c0_253 = arith.constant 0 : index
    %431 = vector.load %arg11[%c0_250, %c5_251, %c1_252, %c0_253] : memref<2x9x9x128xf32, #tpu.memory_space<vmem>>, vector<1x1x8x128xf32>
    %432 = vector.shape_cast %431 : vector<1x1x8x128xf32> to vector<1x8x128xf32>
    %433 = vector.shape_cast %430 : vector<1x8x128xf32> to vector<1x1x8x128xf32>
    tpu.vector_store %arg11[%c0_250, %c5_251, %c1_252, %c0_253], %433 {strides = array<i32>} : memref<2x9x9x128xf32, #tpu.memory_space<vmem>>, vector<1x1x8x128xf32>,
    %c2_i32_254 = arith.constant 2 : i32
    %434 = arith.muli %0, %c2_i32_254 : i32
    %c10_i32 = arith.constant 10 : i32
    %435 = arith.addi %434, %c10_i32 : i32
    %c0_i32_255 = arith.constant 0 : i32
    %436 = arith.cmpi sge, %435, %c0_i32_255 : i32
    %c16_i32_256 = arith.constant 16 : i32
    %437 = arith.cmpi slt, %435, %c16_i32_256 : i32
    %438 = arith.andi %436, %437 : i1
    %c0_i32_257 = arith.constant 0 : i32
    %c15_i32_258 = arith.constant 15 : i32
    %439 = arith.maxsi %c0_i32_257, %435 : i32
    %440 = arith.minsi %c15_i32_258, %439 : i32
    %c0_259 = arith.constant 0 : index
    %441 = arith.index_cast %440 : i32 to index
    %c0_260 = arith.constant 0 : index
    %c0_261 = arith.constant 0 : index
    %442 = vector.load %arg2[%c0_259, %441, %c0_260, %c0_261] : memref<1x16x8x128xf32, #tpu.memory_space<vmem>>, vector<1x1x8x128xf32>
    %443 = vector.shape_cast %442 : vector<1x1x8x128xf32> to vector<1x8x128xf32>
    %444 = vector.shape_cast %1 : vector<1x128xf32> to vector<1x1x128xf32>
    %445 = vector.broadcast %444 : vector<1x1x128xf32> to vector<1x8x128xf32>
    %446 = arith.mulf %443, %445 : vector<1x8x128xf32>
    %447 = vector.shape_cast %2 : vector<1x128xf32> to vector<1x1x128xf32>
    %448 = vector.broadcast %447 : vector<1x1x128xf32> to vector<1x8x128xf32>
    %449 = arith.addf %446, %448 : vector<1x8x128xf32>
    %cst_262 = arith.constant 0.000000e+00 : f32
    %450 = vector.broadcast %cst_262 : f32 to vector<1x8x128xf32>
    %451 = arith.maximumf %449, %450 : vector<1x8x128xf32>
    %cst_263 = arith.constant 0.000000e+00 : f32
    %452 = vector.broadcast %cst_263 : f32 to vector<1x8x128xf32>
    %453 = arith.select %438, %451, %452 : vector<1x8x128xf32>
    %c1_264 = arith.constant 1 : index
    %c5_265 = arith.constant 5 : index
    %c0_266 = arith.constant 0 : index
    %c0_267 = arith.constant 0 : index
    %454 = vector.load %arg10[%c1_264, %c5_265, %c0_266, %c0_267] : memref<2x9x8x128xf32, #tpu.memory_space<vmem>>, vector<1x1x8x128xf32>
    %455 = vector.shape_cast %454 : vector<1x1x8x128xf32> to vector<1x8x128xf32>
    %456 = vector.shape_cast %453 : vector<1x8x128xf32> to vector<1x1x8x128xf32>
    tpu.vector_store %arg10[%c1_264, %c5_265, %c0_266, %c0_267], %456 {strides = array<i32>} : memref<2x9x8x128xf32, #tpu.memory_space<vmem>>, vector<1x1x8x128xf32>,
    %c0_268 = arith.constant 0 : index
    %457 = arith.index_cast %440 : i32 to index
    %c0_269 = arith.constant 0 : index
    %c0_270 = arith.constant 0 : index
    %458 = vector.load %arg3[%c0_268, %457, %c0_269, %c0_270] : memref<1x16x8x128xf32, #tpu.memory_space<vmem>>, vector<1x1x8x128xf32>
    %459 = vector.shape_cast %458 : vector<1x1x8x128xf32> to vector<1x8x128xf32>
    %460 = vector.shape_cast %1 : vector<1x128xf32> to vector<1x1x128xf32>
    %461 = vector.broadcast %460 : vector<1x1x128xf32> to vector<1x8x128xf32>
    %462 = arith.mulf %459, %461 : vector<1x8x128xf32>
    %463 = vector.shape_cast %2 : vector<1x128xf32> to vector<1x1x128xf32>
    %464 = vector.broadcast %463 : vector<1x1x128xf32> to vector<1x8x128xf32>
    %465 = arith.addf %462, %464 : vector<1x8x128xf32>
    %cst_271 = arith.constant 0.000000e+00 : f32
    %466 = vector.broadcast %cst_271 : f32 to vector<1x8x128xf32>
    %467 = arith.maximumf %465, %466 : vector<1x8x128xf32>
    %cst_272 = arith.constant 0.000000e+00 : f32
    %468 = vector.broadcast %cst_272 : f32 to vector<1x8x128xf32>
    %469 = arith.select %438, %467, %468 : vector<1x8x128xf32>
    %c1_273 = arith.constant 1 : index
    %c5_274 = arith.constant 5 : index
    %c1_275 = arith.constant 1 : index
    %c0_276 = arith.constant 0 : index
    %470 = vector.load %arg11[%c1_273, %c5_274, %c1_275, %c0_276] : memref<2x9x9x128xf32, #tpu.memory_space<vmem>>, vector<1x1x8x128xf32>
    %471 = vector.shape_cast %470 : vector<1x1x8x128xf32> to vector<1x8x128xf32>
    %472 = vector.shape_cast %469 : vector<1x8x128xf32> to vector<1x1x8x128xf32>
    tpu.vector_store %arg11[%c1_273, %c5_274, %c1_275, %c0_276], %472 {strides = array<i32>} : memref<2x9x9x128xf32, #tpu.memory_space<vmem>>, vector<1x1x8x128xf32>,
    %c2_i32_277 = arith.constant 2 : i32
    %473 = arith.muli %0, %c2_i32_277 : i32
    %c11_i32 = arith.constant 11 : i32
    %474 = arith.addi %473, %c11_i32 : i32
    %c0_i32_278 = arith.constant 0 : i32
    %475 = arith.cmpi sge, %474, %c0_i32_278 : i32
    %c16_i32_279 = arith.constant 16 : i32
    %476 = arith.cmpi slt, %474, %c16_i32_279 : i32
    %477 = arith.andi %475, %476 : i1
    %c0_i32_280 = arith.constant 0 : i32
    %c15_i32_281 = arith.constant 15 : i32
    %478 = arith.maxsi %c0_i32_280, %474 : i32
    %479 = arith.minsi %c15_i32_281, %478 : i32
    %c0_282 = arith.constant 0 : index
    %480 = arith.index_cast %479 : i32 to index
    %c0_283 = arith.constant 0 : index
    %c0_284 = arith.constant 0 : index
    %481 = vector.load %arg2[%c0_282, %480, %c0_283, %c0_284] : memref<1x16x8x128xf32, #tpu.memory_space<vmem>>, vector<1x1x8x128xf32>
    %482 = vector.shape_cast %481 : vector<1x1x8x128xf32> to vector<1x8x128xf32>
    %483 = vector.shape_cast %1 : vector<1x128xf32> to vector<1x1x128xf32>
    %484 = vector.broadcast %483 : vector<1x1x128xf32> to vector<1x8x128xf32>
    %485 = arith.mulf %482, %484 : vector<1x8x128xf32>
    %486 = vector.shape_cast %2 : vector<1x128xf32> to vector<1x1x128xf32>
    %487 = vector.broadcast %486 : vector<1x1x128xf32> to vector<1x8x128xf32>
    %488 = arith.addf %485, %487 : vector<1x8x128xf32>
    %cst_285 = arith.constant 0.000000e+00 : f32
    %489 = vector.broadcast %cst_285 : f32 to vector<1x8x128xf32>
    %490 = arith.maximumf %488, %489 : vector<1x8x128xf32>
    %cst_286 = arith.constant 0.000000e+00 : f32
    %491 = vector.broadcast %cst_286 : f32 to vector<1x8x128xf32>
    %492 = arith.select %477, %490, %491 : vector<1x8x128xf32>
    %c0_287 = arith.constant 0 : index
    %c6 = arith.constant 6 : index
    %c0_288 = arith.constant 0 : index
    %c0_289 = arith.constant 0 : index
    %493 = vector.load %arg10[%c0_287, %c6, %c0_288, %c0_289] : memref<2x9x8x128xf32, #tpu.memory_space<vmem>>, vector<1x1x8x128xf32>
    %494 = vector.shape_cast %493 : vector<1x1x8x128xf32> to vector<1x8x128xf32>
    %495 = vector.shape_cast %492 : vector<1x8x128xf32> to vector<1x1x8x128xf32>
    tpu.vector_store %arg10[%c0_287, %c6, %c0_288, %c0_289], %495 {strides = array<i32>} : memref<2x9x8x128xf32, #tpu.memory_space<vmem>>, vector<1x1x8x128xf32>,
    %c0_290 = arith.constant 0 : index
    %496 = arith.index_cast %479 : i32 to index
    %c0_291 = arith.constant 0 : index
    %c0_292 = arith.constant 0 : index
    %497 = vector.load %arg3[%c0_290, %496, %c0_291, %c0_292] : memref<1x16x8x128xf32, #tpu.memory_space<vmem>>, vector<1x1x8x128xf32>
    %498 = vector.shape_cast %497 : vector<1x1x8x128xf32> to vector<1x8x128xf32>
    %499 = vector.shape_cast %1 : vector<1x128xf32> to vector<1x1x128xf32>
    %500 = vector.broadcast %499 : vector<1x1x128xf32> to vector<1x8x128xf32>
    %501 = arith.mulf %498, %500 : vector<1x8x128xf32>
    %502 = vector.shape_cast %2 : vector<1x128xf32> to vector<1x1x128xf32>
    %503 = vector.broadcast %502 : vector<1x1x128xf32> to vector<1x8x128xf32>
    %504 = arith.addf %501, %503 : vector<1x8x128xf32>
    %cst_293 = arith.constant 0.000000e+00 : f32
    %505 = vector.broadcast %cst_293 : f32 to vector<1x8x128xf32>
    %506 = arith.maximumf %504, %505 : vector<1x8x128xf32>
    %cst_294 = arith.constant 0.000000e+00 : f32
    %507 = vector.broadcast %cst_294 : f32 to vector<1x8x128xf32>
    %508 = arith.select %477, %506, %507 : vector<1x8x128xf32>
    %c0_295 = arith.constant 0 : index
    %c6_296 = arith.constant 6 : index
    %c1_297 = arith.constant 1 : index
    %c0_298 = arith.constant 0 : index
    %509 = vector.load %arg11[%c0_295, %c6_296, %c1_297, %c0_298] : memref<2x9x9x128xf32, #tpu.memory_space<vmem>>, vector<1x1x8x128xf32>
    %510 = vector.shape_cast %509 : vector<1x1x8x128xf32> to vector<1x8x128xf32>
    %511 = vector.shape_cast %508 : vector<1x8x128xf32> to vector<1x1x8x128xf32>
    tpu.vector_store %arg11[%c0_295, %c6_296, %c1_297, %c0_298], %511 {strides = array<i32>} : memref<2x9x9x128xf32, #tpu.memory_space<vmem>>, vector<1x1x8x128xf32>,
    %c2_i32_299 = arith.constant 2 : i32
    %512 = arith.muli %0, %c2_i32_299 : i32
    %c12_i32 = arith.constant 12 : i32
    %513 = arith.addi %512, %c12_i32 : i32
    %c0_i32_300 = arith.constant 0 : i32
    %514 = arith.cmpi sge, %513, %c0_i32_300 : i32
    %c16_i32_301 = arith.constant 16 : i32
    %515 = arith.cmpi slt, %513, %c16_i32_301 : i32
    %516 = arith.andi %514, %515 : i1
    %c0_i32_302 = arith.constant 0 : i32
    %c15_i32_303 = arith.constant 15 : i32
    %517 = arith.maxsi %c0_i32_302, %513 : i32
    %518 = arith.minsi %c15_i32_303, %517 : i32
    %c0_304 = arith.constant 0 : index
    %519 = arith.index_cast %518 : i32 to index
    %c0_305 = arith.constant 0 : index
    %c0_306 = arith.constant 0 : index
    %520 = vector.load %arg2[%c0_304, %519, %c0_305, %c0_306] : memref<1x16x8x128xf32, #tpu.memory_space<vmem>>, vector<1x1x8x128xf32>
    %521 = vector.shape_cast %520 : vector<1x1x8x128xf32> to vector<1x8x128xf32>
    %522 = vector.shape_cast %1 : vector<1x128xf32> to vector<1x1x128xf32>
    %523 = vector.broadcast %522 : vector<1x1x128xf32> to vector<1x8x128xf32>
    %524 = arith.mulf %521, %523 : vector<1x8x128xf32>
    %525 = vector.shape_cast %2 : vector<1x128xf32> to vector<1x1x128xf32>
    %526 = vector.broadcast %525 : vector<1x1x128xf32> to vector<1x8x128xf32>
    %527 = arith.addf %524, %526 : vector<1x8x128xf32>
    %cst_307 = arith.constant 0.000000e+00 : f32
    %528 = vector.broadcast %cst_307 : f32 to vector<1x8x128xf32>
    %529 = arith.maximumf %527, %528 : vector<1x8x128xf32>
    %cst_308 = arith.constant 0.000000e+00 : f32
    %530 = vector.broadcast %cst_308 : f32 to vector<1x8x128xf32>
    %531 = arith.select %516, %529, %530 : vector<1x8x128xf32>
    %c1_309 = arith.constant 1 : index
    %c6_310 = arith.constant 6 : index
    %c0_311 = arith.constant 0 : index
    %c0_312 = arith.constant 0 : index
    %532 = vector.load %arg10[%c1_309, %c6_310, %c0_311, %c0_312] : memref<2x9x8x128xf32, #tpu.memory_space<vmem>>, vector<1x1x8x128xf32>
    %533 = vector.shape_cast %532 : vector<1x1x8x128xf32> to vector<1x8x128xf32>
    %534 = vector.shape_cast %531 : vector<1x8x128xf32> to vector<1x1x8x128xf32>
    tpu.vector_store %arg10[%c1_309, %c6_310, %c0_311, %c0_312], %534 {strides = array<i32>} : memref<2x9x8x128xf32, #tpu.memory_space<vmem>>, vector<1x1x8x128xf32>,
    %c0_313 = arith.constant 0 : index
    %535 = arith.index_cast %518 : i32 to index
    %c0_314 = arith.constant 0 : index
    %c0_315 = arith.constant 0 : index
    %536 = vector.load %arg3[%c0_313, %535, %c0_314, %c0_315] : memref<1x16x8x128xf32, #tpu.memory_space<vmem>>, vector<1x1x8x128xf32>
    %537 = vector.shape_cast %536 : vector<1x1x8x128xf32> to vector<1x8x128xf32>
    %538 = vector.shape_cast %1 : vector<1x128xf32> to vector<1x1x128xf32>
    %539 = vector.broadcast %538 : vector<1x1x128xf32> to vector<1x8x128xf32>
    %540 = arith.mulf %537, %539 : vector<1x8x128xf32>
    %541 = vector.shape_cast %2 : vector<1x128xf32> to vector<1x1x128xf32>
    %542 = vector.broadcast %541 : vector<1x1x128xf32> to vector<1x8x128xf32>
    %543 = arith.addf %540, %542 : vector<1x8x128xf32>
    %cst_316 = arith.constant 0.000000e+00 : f32
    %544 = vector.broadcast %cst_316 : f32 to vector<1x8x128xf32>
    %545 = arith.maximumf %543, %544 : vector<1x8x128xf32>
    %cst_317 = arith.constant 0.000000e+00 : f32
    %546 = vector.broadcast %cst_317 : f32 to vector<1x8x128xf32>
    %547 = arith.select %516, %545, %546 : vector<1x8x128xf32>
    %c1_318 = arith.constant 1 : index
    %c6_319 = arith.constant 6 : index
    %c1_320 = arith.constant 1 : index
    %c0_321 = arith.constant 0 : index
    %548 = vector.load %arg11[%c1_318, %c6_319, %c1_320, %c0_321] : memref<2x9x9x128xf32, #tpu.memory_space<vmem>>, vector<1x1x8x128xf32>
    %549 = vector.shape_cast %548 : vector<1x1x8x128xf32> to vector<1x8x128xf32>
    %550 = vector.shape_cast %547 : vector<1x8x128xf32> to vector<1x1x8x128xf32>
    tpu.vector_store %arg11[%c1_318, %c6_319, %c1_320, %c0_321], %550 {strides = array<i32>} : memref<2x9x9x128xf32, #tpu.memory_space<vmem>>, vector<1x1x8x128xf32>,
    %c2_i32_322 = arith.constant 2 : i32
    %551 = arith.muli %0, %c2_i32_322 : i32
    %c13_i32 = arith.constant 13 : i32
    %552 = arith.addi %551, %c13_i32 : i32
    %c0_i32_323 = arith.constant 0 : i32
    %553 = arith.cmpi sge, %552, %c0_i32_323 : i32
    %c16_i32_324 = arith.constant 16 : i32
    %554 = arith.cmpi slt, %552, %c16_i32_324 : i32
    %555 = arith.andi %553, %554 : i1
    %c0_i32_325 = arith.constant 0 : i32
    %c15_i32_326 = arith.constant 15 : i32
    %556 = arith.maxsi %c0_i32_325, %552 : i32
    %557 = arith.minsi %c15_i32_326, %556 : i32
    %c0_327 = arith.constant 0 : index
    %558 = arith.index_cast %557 : i32 to index
    %c0_328 = arith.constant 0 : index
    %c0_329 = arith.constant 0 : index
    %559 = vector.load %arg2[%c0_327, %558, %c0_328, %c0_329] : memref<1x16x8x128xf32, #tpu.memory_space<vmem>>, vector<1x1x8x128xf32>
    %560 = vector.shape_cast %559 : vector<1x1x8x128xf32> to vector<1x8x128xf32>
    %561 = vector.shape_cast %1 : vector<1x128xf32> to vector<1x1x128xf32>
    %562 = vector.broadcast %561 : vector<1x1x128xf32> to vector<1x8x128xf32>
    %563 = arith.mulf %560, %562 : vector<1x8x128xf32>
    %564 = vector.shape_cast %2 : vector<1x128xf32> to vector<1x1x128xf32>
    %565 = vector.broadcast %564 : vector<1x1x128xf32> to vector<1x8x128xf32>
    %566 = arith.addf %563, %565 : vector<1x8x128xf32>
    %cst_330 = arith.constant 0.000000e+00 : f32
    %567 = vector.broadcast %cst_330 : f32 to vector<1x8x128xf32>
    %568 = arith.maximumf %566, %567 : vector<1x8x128xf32>
    %cst_331 = arith.constant 0.000000e+00 : f32
    %569 = vector.broadcast %cst_331 : f32 to vector<1x8x128xf32>
    %570 = arith.select %555, %568, %569 : vector<1x8x128xf32>
    %c0_332 = arith.constant 0 : index
    %c7 = arith.constant 7 : index
    %c0_333 = arith.constant 0 : index
    %c0_334 = arith.constant 0 : index
    %571 = vector.load %arg10[%c0_332, %c7, %c0_333, %c0_334] : memref<2x9x8x128xf32, #tpu.memory_space<vmem>>, vector<1x1x8x128xf32>
    %572 = vector.shape_cast %571 : vector<1x1x8x128xf32> to vector<1x8x128xf32>
    %573 = vector.shape_cast %570 : vector<1x8x128xf32> to vector<1x1x8x128xf32>
    tpu.vector_store %arg10[%c0_332, %c7, %c0_333, %c0_334], %573 {strides = array<i32>} : memref<2x9x8x128xf32, #tpu.memory_space<vmem>>, vector<1x1x8x128xf32>,
    %c0_335 = arith.constant 0 : index
    %574 = arith.index_cast %557 : i32 to index
    %c0_336 = arith.constant 0 : index
    %c0_337 = arith.constant 0 : index
    %575 = vector.load %arg3[%c0_335, %574, %c0_336, %c0_337] : memref<1x16x8x128xf32, #tpu.memory_space<vmem>>, vector<1x1x8x128xf32>
    %576 = vector.shape_cast %575 : vector<1x1x8x128xf32> to vector<1x8x128xf32>
    %577 = vector.shape_cast %1 : vector<1x128xf32> to vector<1x1x128xf32>
    %578 = vector.broadcast %577 : vector<1x1x128xf32> to vector<1x8x128xf32>
    %579 = arith.mulf %576, %578 : vector<1x8x128xf32>
    %580 = vector.shape_cast %2 : vector<1x128xf32> to vector<1x1x128xf32>
    %581 = vector.broadcast %580 : vector<1x1x128xf32> to vector<1x8x128xf32>
    %582 = arith.addf %579, %581 : vector<1x8x128xf32>
    %cst_338 = arith.constant 0.000000e+00 : f32
    %583 = vector.broadcast %cst_338 : f32 to vector<1x8x128xf32>
    %584 = arith.maximumf %582, %583 : vector<1x8x128xf32>
    %cst_339 = arith.constant 0.000000e+00 : f32
    %585 = vector.broadcast %cst_339 : f32 to vector<1x8x128xf32>
    %586 = arith.select %555, %584, %585 : vector<1x8x128xf32>
    %c0_340 = arith.constant 0 : index
    %c7_341 = arith.constant 7 : index
    %c1_342 = arith.constant 1 : index
    %c0_343 = arith.constant 0 : index
    %587 = vector.load %arg11[%c0_340, %c7_341, %c1_342, %c0_343] : memref<2x9x9x128xf32, #tpu.memory_space<vmem>>, vector<1x1x8x128xf32>
    %588 = vector.shape_cast %587 : vector<1x1x8x128xf32> to vector<1x8x128xf32>
    %589 = vector.shape_cast %586 : vector<1x8x128xf32> to vector<1x1x8x128xf32>
    tpu.vector_store %arg11[%c0_340, %c7_341, %c1_342, %c0_343], %589 {strides = array<i32>} : memref<2x9x9x128xf32, #tpu.memory_space<vmem>>, vector<1x1x8x128xf32>,
    %c2_i32_344 = arith.constant 2 : i32
    %590 = arith.muli %0, %c2_i32_344 : i32
    %c14_i32 = arith.constant 14 : i32
    %591 = arith.addi %590, %c14_i32 : i32
    %c0_i32_345 = arith.constant 0 : i32
    %592 = arith.cmpi sge, %591, %c0_i32_345 : i32
    %c16_i32_346 = arith.constant 16 : i32
    %593 = arith.cmpi slt, %591, %c16_i32_346 : i32
    %594 = arith.andi %592, %593 : i1
    %c0_i32_347 = arith.constant 0 : i32
    %c15_i32_348 = arith.constant 15 : i32
    %595 = arith.maxsi %c0_i32_347, %591 : i32
    %596 = arith.minsi %c15_i32_348, %595 : i32
    %c0_349 = arith.constant 0 : index
    %597 = arith.index_cast %596 : i32 to index
    %c0_350 = arith.constant 0 : index
    %c0_351 = arith.constant 0 : index
    %598 = vector.load %arg2[%c0_349, %597, %c0_350, %c0_351] : memref<1x16x8x128xf32, #tpu.memory_space<vmem>>, vector<1x1x8x128xf32>
    %599 = vector.shape_cast %598 : vector<1x1x8x128xf32> to vector<1x8x128xf32>
    %600 = vector.shape_cast %1 : vector<1x128xf32> to vector<1x1x128xf32>
    %601 = vector.broadcast %600 : vector<1x1x128xf32> to vector<1x8x128xf32>
    %602 = arith.mulf %599, %601 : vector<1x8x128xf32>
    %603 = vector.shape_cast %2 : vector<1x128xf32> to vector<1x1x128xf32>
    %604 = vector.broadcast %603 : vector<1x1x128xf32> to vector<1x8x128xf32>
    %605 = arith.addf %602, %604 : vector<1x8x128xf32>
    %cst_352 = arith.constant 0.000000e+00 : f32
    %606 = vector.broadcast %cst_352 : f32 to vector<1x8x128xf32>
    %607 = arith.maximumf %605, %606 : vector<1x8x128xf32>
    %cst_353 = arith.constant 0.000000e+00 : f32
    %608 = vector.broadcast %cst_353 : f32 to vector<1x8x128xf32>
    %609 = arith.select %594, %607, %608 : vector<1x8x128xf32>
    %c1_354 = arith.constant 1 : index
    %c7_355 = arith.constant 7 : index
    %c0_356 = arith.constant 0 : index
    %c0_357 = arith.constant 0 : index
    %610 = vector.load %arg10[%c1_354, %c7_355, %c0_356, %c0_357] : memref<2x9x8x128xf32, #tpu.memory_space<vmem>>, vector<1x1x8x128xf32>
    %611 = vector.shape_cast %610 : vector<1x1x8x128xf32> to vector<1x8x128xf32>
    %612 = vector.shape_cast %609 : vector<1x8x128xf32> to vector<1x1x8x128xf32>
    tpu.vector_store %arg10[%c1_354, %c7_355, %c0_356, %c0_357], %612 {strides = array<i32>} : memref<2x9x8x128xf32, #tpu.memory_space<vmem>>, vector<1x1x8x128xf32>,
    %c0_358 = arith.constant 0 : index
    %613 = arith.index_cast %596 : i32 to index
    %c0_359 = arith.constant 0 : index
    %c0_360 = arith.constant 0 : index
    %614 = vector.load %arg3[%c0_358, %613, %c0_359, %c0_360] : memref<1x16x8x128xf32, #tpu.memory_space<vmem>>, vector<1x1x8x128xf32>
    %615 = vector.shape_cast %614 : vector<1x1x8x128xf32> to vector<1x8x128xf32>
    %616 = vector.shape_cast %1 : vector<1x128xf32> to vector<1x1x128xf32>
    %617 = vector.broadcast %616 : vector<1x1x128xf32> to vector<1x8x128xf32>
    %618 = arith.mulf %615, %617 : vector<1x8x128xf32>
    %619 = vector.shape_cast %2 : vector<1x128xf32> to vector<1x1x128xf32>
    %620 = vector.broadcast %619 : vector<1x1x128xf32> to vector<1x8x128xf32>
    %621 = arith.addf %618, %620 : vector<1x8x128xf32>
    %cst_361 = arith.constant 0.000000e+00 : f32
    %622 = vector.broadcast %cst_361 : f32 to vector<1x8x128xf32>
    %623 = arith.maximumf %621, %622 : vector<1x8x128xf32>
    %cst_362 = arith.constant 0.000000e+00 : f32
    %624 = vector.broadcast %cst_362 : f32 to vector<1x8x128xf32>
    %625 = arith.select %594, %623, %624 : vector<1x8x128xf32>
    %c1_363 = arith.constant 1 : index
    %c7_364 = arith.constant 7 : index
    %c1_365 = arith.constant 1 : index
    %c0_366 = arith.constant 0 : index
    %626 = vector.load %arg11[%c1_363, %c7_364, %c1_365, %c0_366] : memref<2x9x9x128xf32, #tpu.memory_space<vmem>>, vector<1x1x8x128xf32>
    %627 = vector.shape_cast %626 : vector<1x1x8x128xf32> to vector<1x8x128xf32>
    %628 = vector.shape_cast %625 : vector<1x8x128xf32> to vector<1x1x8x128xf32>
    tpu.vector_store %arg11[%c1_363, %c7_364, %c1_365, %c0_366], %628 {strides = array<i32>} : memref<2x9x9x128xf32, #tpu.memory_space<vmem>>, vector<1x1x8x128xf32>,
    %c2_i32_367 = arith.constant 2 : i32
    %629 = arith.muli %0, %c2_i32_367 : i32
    %c15_i32_368 = arith.constant 15 : i32
    %630 = arith.addi %629, %c15_i32_368 : i32
    %c0_i32_369 = arith.constant 0 : i32
    %631 = arith.cmpi sge, %630, %c0_i32_369 : i32
    %c16_i32_370 = arith.constant 16 : i32
    %632 = arith.cmpi slt, %630, %c16_i32_370 : i32
    %633 = arith.andi %631, %632 : i1
    %c0_i32_371 = arith.constant 0 : i32
    %c15_i32_372 = arith.constant 15 : i32
    %634 = arith.maxsi %c0_i32_371, %630 : i32
    %635 = arith.minsi %c15_i32_372, %634 : i32
    %c0_373 = arith.constant 0 : index
    %636 = arith.index_cast %635 : i32 to index
    %c0_374 = arith.constant 0 : index
    %c0_375 = arith.constant 0 : index
    %637 = vector.load %arg2[%c0_373, %636, %c0_374, %c0_375] : memref<1x16x8x128xf32, #tpu.memory_space<vmem>>, vector<1x1x8x128xf32>
    %638 = vector.shape_cast %637 : vector<1x1x8x128xf32> to vector<1x8x128xf32>
    %639 = vector.shape_cast %1 : vector<1x128xf32> to vector<1x1x128xf32>
    %640 = vector.broadcast %639 : vector<1x1x128xf32> to vector<1x8x128xf32>
    %641 = arith.mulf %638, %640 : vector<1x8x128xf32>
    %642 = vector.shape_cast %2 : vector<1x128xf32> to vector<1x1x128xf32>
    %643 = vector.broadcast %642 : vector<1x1x128xf32> to vector<1x8x128xf32>
    %644 = arith.addf %641, %643 : vector<1x8x128xf32>
    %cst_376 = arith.constant 0.000000e+00 : f32
    %645 = vector.broadcast %cst_376 : f32 to vector<1x8x128xf32>
    %646 = arith.maximumf %644, %645 : vector<1x8x128xf32>
    %cst_377 = arith.constant 0.000000e+00 : f32
    %647 = vector.broadcast %cst_377 : f32 to vector<1x8x128xf32>
    %648 = arith.select %633, %646, %647 : vector<1x8x128xf32>
    %c0_378 = arith.constant 0 : index
    %c8 = arith.constant 8 : index
    %c0_379 = arith.constant 0 : index
    %c0_380 = arith.constant 0 : index
    %649 = vector.load %arg10[%c0_378, %c8, %c0_379, %c0_380] : memref<2x9x8x128xf32, #tpu.memory_space<vmem>>, vector<1x1x8x128xf32>
    %650 = vector.shape_cast %649 : vector<1x1x8x128xf32> to vector<1x8x128xf32>
    %651 = vector.shape_cast %648 : vector<1x8x128xf32> to vector<1x1x8x128xf32>
    tpu.vector_store %arg10[%c0_378, %c8, %c0_379, %c0_380], %651 {strides = array<i32>} : memref<2x9x8x128xf32, #tpu.memory_space<vmem>>, vector<1x1x8x128xf32>,
    %c0_381 = arith.constant 0 : index
    %652 = arith.index_cast %635 : i32 to index
    %c0_382 = arith.constant 0 : index
    %c0_383 = arith.constant 0 : index
    %653 = vector.load %arg3[%c0_381, %652, %c0_382, %c0_383] : memref<1x16x8x128xf32, #tpu.memory_space<vmem>>, vector<1x1x8x128xf32>
    %654 = vector.shape_cast %653 : vector<1x1x8x128xf32> to vector<1x8x128xf32>
    %655 = vector.shape_cast %1 : vector<1x128xf32> to vector<1x1x128xf32>
    %656 = vector.broadcast %655 : vector<1x1x128xf32> to vector<1x8x128xf32>
    %657 = arith.mulf %654, %656 : vector<1x8x128xf32>
    %658 = vector.shape_cast %2 : vector<1x128xf32> to vector<1x1x128xf32>
    %659 = vector.broadcast %658 : vector<1x1x128xf32> to vector<1x8x128xf32>
    %660 = arith.addf %657, %659 : vector<1x8x128xf32>
    %cst_384 = arith.constant 0.000000e+00 : f32
    %661 = vector.broadcast %cst_384 : f32 to vector<1x8x128xf32>
    %662 = arith.maximumf %660, %661 : vector<1x8x128xf32>
    %cst_385 = arith.constant 0.000000e+00 : f32
    %663 = vector.broadcast %cst_385 : f32 to vector<1x8x128xf32>
    %664 = arith.select %633, %662, %663 : vector<1x8x128xf32>
    %c0_386 = arith.constant 0 : index
    %c8_387 = arith.constant 8 : index
    %c1_388 = arith.constant 1 : index
    %c0_389 = arith.constant 0 : index
    %665 = vector.load %arg11[%c0_386, %c8_387, %c1_388, %c0_389] : memref<2x9x9x128xf32, #tpu.memory_space<vmem>>, vector<1x1x8x128xf32>
    %666 = vector.shape_cast %665 : vector<1x1x8x128xf32> to vector<1x8x128xf32>
    %667 = vector.shape_cast %664 : vector<1x8x128xf32> to vector<1x1x8x128xf32>
    tpu.vector_store %arg11[%c0_386, %c8_387, %c1_388, %c0_389], %667 {strides = array<i32>} : memref<2x9x9x128xf32, #tpu.memory_space<vmem>>, vector<1x1x8x128xf32>,
    %c0_390 = arith.constant 0 : index
    %c0_391 = arith.constant 0 : index
    %c0_392 = arith.constant 0 : index
    %c0_393 = arith.constant 0 : index
    %668 = vector.load %arg11[%c0_390, %c0_391, %c0_392, %c0_393] : memref<2x9x9x128xf32, #tpu.memory_space<vmem>>, vector<1x8x8x128xf32>
    %669 = vector.shape_cast %668 : vector<1x8x8x128xf32> to vector<8x8x128xf32>
    %670 = vector.shape_cast %669 : vector<8x8x128xf32> to vector<64x128xf32>
    %c0_394 = arith.constant 0 : index
    %c0_395 = arith.constant 0 : index
    %c0_396 = arith.constant 0 : index
    %671 = vector.load %arg4[%c0_394, %c0_395, %c0_396] : memref<9x128x128xf32, #tpu.memory_space<vmem>>, vector<1x128x128xf32>
    %672 = vector.shape_cast %671 : vector<1x128x128xf32> to vector<128x128xf32>
    %cst_397 = arith.constant dense<0.000000e+00> : vector<64x128xf32>
    %673 = tpu.matmul %670, %672, %cst_397 {dimension_numbers = #tpu.dot_dimension_numbers<[1], [0], [0], [1], [0, 0, 1, 1], [], []>} : vector<64x128xf32>, vector<128x128xf32>, vector<64x128xf32> -> vector<64x128xf32>
    %c0_398 = arith.constant 0 : index
    %c0_399 = arith.constant 0 : index
    %674 = vector.load %arg12[%c0_398, %c0_399] : memref<64x128xf32, #tpu.memory_space<vmem>>, vector<64x128xf32>
    tpu.vector_store %arg12[%c0_398, %c0_399], %673 {strides = array<i32>} : memref<64x128xf32, #tpu.memory_space<vmem>>, vector<64x128xf32>,
    %c0_400 = arith.constant 0 : index
    %c0_401 = arith.constant 0 : index
    %c0_402 = arith.constant 0 : index
    %c0_403 = arith.constant 0 : index
    %675 = vector.load %arg10[%c0_400, %c0_401, %c0_402, %c0_403] : memref<2x9x8x128xf32, #tpu.memory_space<vmem>>, vector<1x8x8x128xf32>
    %676 = vector.shape_cast %675 : vector<1x8x8x128xf32> to vector<8x8x128xf32>
    %677 = vector.shape_cast %676 : vector<8x8x128xf32> to vector<64x128xf32>
    %c1_404 = arith.constant 1 : index
    %c0_405 = arith.constant 0 : index
    %c0_406 = arith.constant 0 : index
    %678 = vector.load %arg4[%c1_404, %c0_405, %c0_406] : memref<9x128x128xf32, #tpu.memory_space<vmem>>, vector<1x128x128xf32>
    %679 = vector.shape_cast %678 : vector<1x128x128xf32> to vector<128x128xf32>
    %cst_407 = arith.constant dense<0.000000e+00> : vector<64x128xf32>
    %680 = tpu.matmul %677, %679, %cst_407 {dimension_numbers = #tpu.dot_dimension_numbers<[1], [0], [0], [1], [0, 0, 1, 1], [], []>} : vector<64x128xf32>, vector<128x128xf32>, vector<64x128xf32> -> vector<64x128xf32>
    %c0_408 = arith.constant 0 : index
    %c0_409 = arith.constant 0 : index
    %681 = vector.load %arg12[%c0_408, %c0_409] : memref<64x128xf32, #tpu.memory_space<vmem>>, vector<64x128xf32>
    %682 = arith.addf %681, %680 : vector<64x128xf32>
    %c0_410 = arith.constant 0 : index
    %c0_411 = arith.constant 0 : index
    %683 = vector.load %arg12[%c0_410, %c0_411] : memref<64x128xf32, #tpu.memory_space<vmem>>, vector<64x128xf32>
    tpu.vector_store %arg12[%c0_410, %c0_411], %682 {strides = array<i32>} : memref<64x128xf32, #tpu.memory_space<vmem>>, vector<64x128xf32>,
    %c0_412 = arith.constant 0 : index
    %c0_413 = arith.constant 0 : index
    %c1_414 = arith.constant 1 : index
    %c0_415 = arith.constant 0 : index
    %684 = vector.load %arg11[%c0_412, %c0_413, %c1_414, %c0_415] : memref<2x9x9x128xf32, #tpu.memory_space<vmem>>, vector<1x8x8x128xf32>
    %685 = vector.shape_cast %684 : vector<1x8x8x128xf32> to vector<8x8x128xf32>
    %686 = vector.shape_cast %685 : vector<8x8x128xf32> to vector<64x128xf32>
    %c2_416 = arith.constant 2 : index
    %c0_417 = arith.constant 0 : index
    %c0_418 = arith.constant 0 : index
    %687 = vector.load %arg4[%c2_416, %c0_417, %c0_418] : memref<9x128x128xf32, #tpu.memory_space<vmem>>, vector<1x128x128xf32>
    %688 = vector.shape_cast %687 : vector<1x128x128xf32> to vector<128x128xf32>
    %cst_419 = arith.constant dense<0.000000e+00> : vector<64x128xf32>
    %689 = tpu.matmul %686, %688, %cst_419 {dimension_numbers = #tpu.dot_dimension_numbers<[1], [0], [0], [1], [0, 0, 1, 1], [], []>} : vector<64x128xf32>, vector<128x128xf32>, vector<64x128xf32> -> vector<64x128xf32>
    %c0_420 = arith.constant 0 : index
    %c0_421 = arith.constant 0 : index
    %690 = vector.load %arg12[%c0_420, %c0_421] : memref<64x128xf32, #tpu.memory_space<vmem>>, vector<64x128xf32>
    %691 = arith.addf %690, %689 : vector<64x128xf32>
    %c0_422 = arith.constant 0 : index
    %c0_423 = arith.constant 0 : index
    %692 = vector.load %arg12[%c0_422, %c0_423] : memref<64x128xf32, #tpu.memory_space<vmem>>, vector<64x128xf32>
    tpu.vector_store %arg12[%c0_422, %c0_423], %691 {strides = array<i32>} : memref<64x128xf32, #tpu.memory_space<vmem>>, vector<64x128xf32>,
    %c1_424 = arith.constant 1 : index
    %c0_425 = arith.constant 0 : index
    %c0_426 = arith.constant 0 : index
    %c0_427 = arith.constant 0 : index
    %693 = vector.load %arg11[%c1_424, %c0_425, %c0_426, %c0_427] : memref<2x9x9x128xf32, #tpu.memory_space<vmem>>, vector<1x8x8x128xf32>
    %694 = vector.shape_cast %693 : vector<1x8x8x128xf32> to vector<8x8x128xf32>
    %695 = vector.shape_cast %694 : vector<8x8x128xf32> to vector<64x128xf32>
    %c3_428 = arith.constant 3 : index
    %c0_429 = arith.constant 0 : index
    %c0_430 = arith.constant 0 : index
    %696 = vector.load %arg4[%c3_428, %c0_429, %c0_430] : memref<9x128x128xf32, #tpu.memory_space<vmem>>, vector<1x128x128xf32>
    %697 = vector.shape_cast %696 : vector<1x128x128xf32> to vector<128x128xf32>
    %cst_431 = arith.constant dense<0.000000e+00> : vector<64x128xf32>
    %698 = tpu.matmul %695, %697, %cst_431 {dimension_numbers = #tpu.dot_dimension_numbers<[1], [0], [0], [1], [0, 0, 1, 1], [], []>} : vector<64x128xf32>, vector<128x128xf32>, vector<64x128xf32> -> vector<64x128xf32>
    %c0_432 = arith.constant 0 : index
    %c0_433 = arith.constant 0 : index
    %699 = vector.load %arg12[%c0_432, %c0_433] : memref<64x128xf32, #tpu.memory_space<vmem>>, vector<64x128xf32>
    %700 = arith.addf %699, %698 : vector<64x128xf32>
    %c0_434 = arith.constant 0 : index
    %c0_435 = arith.constant 0 : index
    %701 = vector.load %arg12[%c0_434, %c0_435] : memref<64x128xf32, #tpu.memory_space<vmem>>, vector<64x128xf32>
    tpu.vector_store %arg12[%c0_434, %c0_435], %700 {strides = array<i32>} : memref<64x128xf32, #tpu.memory_space<vmem>>, vector<64x128xf32>,
    %c1_436 = arith.constant 1 : index
    %c0_437 = arith.constant 0 : index
    %c0_438 = arith.constant 0 : index
    %c0_439 = arith.constant 0 : index
    %702 = vector.load %arg10[%c1_436, %c0_437, %c0_438, %c0_439] : memref<2x9x8x128xf32, #tpu.memory_space<vmem>>, vector<1x8x8x128xf32>
    %703 = vector.shape_cast %702 : vector<1x8x8x128xf32> to vector<8x8x128xf32>
    %704 = vector.shape_cast %703 : vector<8x8x128xf32> to vector<64x128xf32>
    %c4_440 = arith.constant 4 : index
    %c0_441 = arith.constant 0 : index
    %c0_442 = arith.constant 0 : index
    %705 = vector.load %arg4[%c4_440, %c0_441, %c0_442] : memref<9x128x128xf32, #tpu.memory_space<vmem>>, vector<1x128x128xf32>
    %706 = vector.shape_cast %705 : vector<1x128x128xf32> to vector<128x128xf32>
    %cst_443 = arith.constant dense<0.000000e+00> : vector<64x128xf32>
    %707 = tpu.matmul %704, %706, %cst_443 {dimension_numbers = #tpu.dot_dimension_numbers<[1], [0], [0], [1], [0, 0, 1, 1], [], []>} : vector<64x128xf32>, vector<128x128xf32>, vector<64x128xf32> -> vector<64x128xf32>
    %c0_444 = arith.constant 0 : index
    %c0_445 = arith.constant 0 : index
    %708 = vector.load %arg12[%c0_444, %c0_445] : memref<64x128xf32, #tpu.memory_space<vmem>>, vector<64x128xf32>
    %709 = arith.addf %708, %707 : vector<64x128xf32>
    %c0_446 = arith.constant 0 : index
    %c0_447 = arith.constant 0 : index
    %710 = vector.load %arg12[%c0_446, %c0_447] : memref<64x128xf32, #tpu.memory_space<vmem>>, vector<64x128xf32>
    tpu.vector_store %arg12[%c0_446, %c0_447], %709 {strides = array<i32>} : memref<64x128xf32, #tpu.memory_space<vmem>>, vector<64x128xf32>,
    %c1_448 = arith.constant 1 : index
    %c0_449 = arith.constant 0 : index
    %c1_450 = arith.constant 1 : index
    %c0_451 = arith.constant 0 : index
    %711 = vector.load %arg11[%c1_448, %c0_449, %c1_450, %c0_451] : memref<2x9x9x128xf32, #tpu.memory_space<vmem>>, vector<1x8x8x128xf32>
    %712 = vector.shape_cast %711 : vector<1x8x8x128xf32> to vector<8x8x128xf32>
    %713 = vector.shape_cast %712 : vector<8x8x128xf32> to vector<64x128xf32>
    %c5_452 = arith.constant 5 : index
    %c0_453 = arith.constant 0 : index
    %c0_454 = arith.constant 0 : index
    %714 = vector.load %arg4[%c5_452, %c0_453, %c0_454] : memref<9x128x128xf32, #tpu.memory_space<vmem>>, vector<1x128x128xf32>
    %715 = vector.shape_cast %714 : vector<1x128x128xf32> to vector<128x128xf32>
    %cst_455 = arith.constant dense<0.000000e+00> : vector<64x128xf32>
    %716 = tpu.matmul %713, %715, %cst_455 {dimension_numbers = #tpu.dot_dimension_numbers<[1], [0], [0], [1], [0, 0, 1, 1], [], []>} : vector<64x128xf32>, vector<128x128xf32>, vector<64x128xf32> -> vector<64x128xf32>
    %c0_456 = arith.constant 0 : index
    %c0_457 = arith.constant 0 : index
    %717 = vector.load %arg12[%c0_456, %c0_457] : memref<64x128xf32, #tpu.memory_space<vmem>>, vector<64x128xf32>
    %718 = arith.addf %717, %716 : vector<64x128xf32>
    %c0_458 = arith.constant 0 : index
    %c0_459 = arith.constant 0 : index
    %719 = vector.load %arg12[%c0_458, %c0_459] : memref<64x128xf32, #tpu.memory_space<vmem>>, vector<64x128xf32>
    tpu.vector_store %arg12[%c0_458, %c0_459], %718 {strides = array<i32>} : memref<64x128xf32, #tpu.memory_space<vmem>>, vector<64x128xf32>,
    %c0_460 = arith.constant 0 : index
    %c1_461 = arith.constant 1 : index
    %c0_462 = arith.constant 0 : index
    %c0_463 = arith.constant 0 : index
    %720 = vector.load %arg11[%c0_460, %c1_461, %c0_462, %c0_463] : memref<2x9x9x128xf32, #tpu.memory_space<vmem>>, vector<1x8x8x128xf32>
    %721 = vector.shape_cast %720 : vector<1x8x8x128xf32> to vector<8x8x128xf32>
    %722 = vector.shape_cast %721 : vector<8x8x128xf32> to vector<64x128xf32>
    %c6_464 = arith.constant 6 : index
    %c0_465 = arith.constant 0 : index
    %c0_466 = arith.constant 0 : index
    %723 = vector.load %arg4[%c6_464, %c0_465, %c0_466] : memref<9x128x128xf32, #tpu.memory_space<vmem>>, vector<1x128x128xf32>
    %724 = vector.shape_cast %723 : vector<1x128x128xf32> to vector<128x128xf32>
    %cst_467 = arith.constant dense<0.000000e+00> : vector<64x128xf32>
    %725 = tpu.matmul %722, %724, %cst_467 {dimension_numbers = #tpu.dot_dimension_numbers<[1], [0], [0], [1], [0, 0, 1, 1], [], []>} : vector<64x128xf32>, vector<128x128xf32>, vector<64x128xf32> -> vector<64x128xf32>
    %c0_468 = arith.constant 0 : index
    %c0_469 = arith.constant 0 : index
    %726 = vector.load %arg12[%c0_468, %c0_469] : memref<64x128xf32, #tpu.memory_space<vmem>>, vector<64x128xf32>
    %727 = arith.addf %726, %725 : vector<64x128xf32>
    %c0_470 = arith.constant 0 : index
    %c0_471 = arith.constant 0 : index
    %728 = vector.load %arg12[%c0_470, %c0_471] : memref<64x128xf32, #tpu.memory_space<vmem>>, vector<64x128xf32>
    tpu.vector_store %arg12[%c0_470, %c0_471], %727 {strides = array<i32>} : memref<64x128xf32, #tpu.memory_space<vmem>>, vector<64x128xf32>,
    %c0_472 = arith.constant 0 : index
    %c1_473 = arith.constant 1 : index
    %c0_474 = arith.constant 0 : index
    %c0_475 = arith.constant 0 : index
    %729 = vector.load %arg10[%c0_472, %c1_473, %c0_474, %c0_475] : memref<2x9x8x128xf32, #tpu.memory_space<vmem>>, vector<1x8x8x128xf32>
    %730 = vector.shape_cast %729 : vector<1x8x8x128xf32> to vector<8x8x128xf32>
    %731 = vector.shape_cast %730 : vector<8x8x128xf32> to vector<64x128xf32>
    %c7_476 = arith.constant 7 : index
    %c0_477 = arith.constant 0 : index
    %c0_478 = arith.constant 0 : index
    %732 = vector.load %arg4[%c7_476, %c0_477, %c0_478] : memref<9x128x128xf32, #tpu.memory_space<vmem>>, vector<1x128x128xf32>
    %733 = vector.shape_cast %732 : vector<1x128x128xf32> to vector<128x128xf32>
    %cst_479 = arith.constant dense<0.000000e+00> : vector<64x128xf32>
    %734 = tpu.matmul %731, %733, %cst_479 {dimension_numbers = #tpu.dot_dimension_numbers<[1], [0], [0], [1], [0, 0, 1, 1], [], []>} : vector<64x128xf32>, vector<128x128xf32>, vector<64x128xf32> -> vector<64x128xf32>
    %c0_480 = arith.constant 0 : index
    %c0_481 = arith.constant 0 : index
    %735 = vector.load %arg12[%c0_480, %c0_481] : memref<64x128xf32, #tpu.memory_space<vmem>>, vector<64x128xf32>
    %736 = arith.addf %735, %734 : vector<64x128xf32>
    %c0_482 = arith.constant 0 : index
    %c0_483 = arith.constant 0 : index
    %737 = vector.load %arg12[%c0_482, %c0_483] : memref<64x128xf32, #tpu.memory_space<vmem>>, vector<64x128xf32>
    tpu.vector_store %arg12[%c0_482, %c0_483], %736 {strides = array<i32>} : memref<64x128xf32, #tpu.memory_space<vmem>>, vector<64x128xf32>,
    %c0_484 = arith.constant 0 : index
    %c1_485 = arith.constant 1 : index
    %c1_486 = arith.constant 1 : index
    %c0_487 = arith.constant 0 : index
    %738 = vector.load %arg11[%c0_484, %c1_485, %c1_486, %c0_487] : memref<2x9x9x128xf32, #tpu.memory_space<vmem>>, vector<1x8x8x128xf32>
    %739 = vector.shape_cast %738 : vector<1x8x8x128xf32> to vector<8x8x128xf32>
    %740 = vector.shape_cast %739 : vector<8x8x128xf32> to vector<64x128xf32>
    %c8_488 = arith.constant 8 : index
    %c0_489 = arith.constant 0 : index
    %c0_490 = arith.constant 0 : index
    %741 = vector.load %arg4[%c8_488, %c0_489, %c0_490] : memref<9x128x128xf32, #tpu.memory_space<vmem>>, vector<1x128x128xf32>
    %742 = vector.shape_cast %741 : vector<1x128x128xf32> to vector<128x128xf32>
    %cst_491 = arith.constant dense<0.000000e+00> : vector<64x128xf32>
    %743 = tpu.matmul %740, %742, %cst_491 {dimension_numbers = #tpu.dot_dimension_numbers<[1], [0], [0], [1], [0, 0, 1, 1], [], []>} : vector<64x128xf32>, vector<128x128xf32>, vector<64x128xf32> -> vector<64x128xf32>
    %c0_492 = arith.constant 0 : index
    %c0_493 = arith.constant 0 : index
    %744 = vector.load %arg12[%c0_492, %c0_493] : memref<64x128xf32, #tpu.memory_space<vmem>>, vector<64x128xf32>
    %745 = arith.addf %744, %743 : vector<64x128xf32>
    %c0_494 = arith.constant 0 : index
    %c0_495 = arith.constant 0 : index
    %746 = vector.load %arg12[%c0_494, %c0_495] : memref<64x128xf32, #tpu.memory_space<vmem>>, vector<64x128xf32>
    tpu.vector_store %arg12[%c0_494, %c0_495], %745 {strides = array<i32>} : memref<64x128xf32, #tpu.memory_space<vmem>>, vector<64x128xf32>,
    %c0_496 = arith.constant 0 : index
    %c0_497 = arith.constant 0 : index
    %747 = vector.load %arg12[%c0_496, %c0_497] : memref<64x128xf32, #tpu.memory_space<vmem>>, vector<64x128xf32>
    %c0_498 = arith.constant 0 : index
    %c0_499 = arith.constant 0 : index
    %748 = vector.load %arg7[%c0_498, %c0_499] : memref<64x128xf32, #tpu.memory_space<vmem>>, vector<64x128xf32>
    tpu.vector_store %arg7[%c0_498, %c0_499], %747 {strides = array<i32>} : memref<64x128xf32, #tpu.memory_space<vmem>>, vector<64x128xf32>,
    %cst_500 = arith.constant dense<0.000000e+00> : vector<128xf32>
    %749 = vector.multi_reduction <add>, %747, %cst_500 [0] : vector<64x128xf32> to vector<128xf32>
    %750 = vector.shape_cast %749 : vector<128xf32> to vector<1x128xf32>
    %c0_501 = arith.constant 0 : index
    %c0_502 = arith.constant 0 : index
    %c0_503 = arith.constant 0 : index
    %751 = vector.load %arg8[%c0_501, %c0_502, %c0_503] : memref<1x1x128xf32, #tpu.memory_space<vmem>>, vector<1x1x128xf32>
    %752 = vector.shape_cast %751 : vector<1x1x128xf32> to vector<1x128xf32>
    %753 = vector.shape_cast %750 : vector<1x128xf32> to vector<1x1x128xf32>
    tpu.vector_store %arg8[%c0_501, %c0_502, %c0_503], %753 {strides = array<i32>} : memref<1x1x128xf32, #tpu.memory_space<vmem>>, vector<1x1x128xf32>,
    %754 = arith.mulf %747, %747 : vector<64x128xf32>
    %cst_504 = arith.constant dense<0.000000e+00> : vector<128xf32>
    %755 = vector.multi_reduction <add>, %754, %cst_504 [0] : vector<64x128xf32> to vector<128xf32>
    %756 = vector.shape_cast %755 : vector<128xf32> to vector<1x128xf32>
    %c0_505 = arith.constant 0 : index
    %c0_506 = arith.constant 0 : index
    %c0_507 = arith.constant 0 : index
    %757 = vector.load %arg9[%c0_505, %c0_506, %c0_507] : memref<1x1x128xf32, #tpu.memory_space<vmem>>, vector<1x1x128xf32>
    %758 = vector.shape_cast %757 : vector<1x1x128xf32> to vector<1x128xf32>
    %759 = vector.shape_cast %756 : vector<1x128xf32> to vector<1x1x128xf32>
    tpu.vector_store %arg9[%c0_505, %c0_506, %c0_507], %759 {strides = array<i32>} : memref<1x1x128xf32, #tpu.memory_space<vmem>>, vector<1x1x128xf32>,
    return
  }
  func.func @transform_0(%arg0: i32, %arg1: i32) -> (i32, i32, i32, i32) {
    %c0_i32 = arith.constant 0 : i32
    %c0_i32_0 = arith.constant 0 : i32
    %c0_i32_1 = arith.constant 0 : i32
    %c0_i32_2 = arith.constant 0 : i32
    return %arg0, %c0_i32, %c0_i32_0, %c0_i32_1 : i32, i32, i32, i32
  }
  func.func @transform_1(%arg0: i32, %arg1: i32) -> (i32, i32, i32, i32) {
    %c0_i32 = arith.constant 0 : i32
    %c0_i32_0 = arith.constant 0 : i32
    %c1_i32 = arith.constant 1 : i32
    %c0_i32_1 = arith.constant 0 : i32
    return %arg0, %c0_i32, %c0_i32_0, %c1_i32 : i32, i32, i32, i32
  }
  func.func @transform_2(%arg0: i32, %arg1: i32) -> (i32, i32, i32) {
    %c0_i32 = arith.constant 0 : i32
    %c0_i32_0 = arith.constant 0 : i32
    %c0_i32_1 = arith.constant 0 : i32
    %c0_i32_2 = arith.constant 0 : i32
    return %c0_i32, %c0_i32_0, %c0_i32_1 : i32, i32, i32
  }
  func.func @transform_3(%arg0: i32, %arg1: i32) -> (i32, i32) {
    %c0_i32 = arith.constant 0 : i32
    %c0_i32_0 = arith.constant 0 : i32
    %c0_i32_1 = arith.constant 0 : i32
    return %c0_i32, %c0_i32_0 : i32, i32
  }
  func.func @transform_4(%arg0: i32, %arg1: i32) -> (i32, i32) {
    %c0_i32 = arith.constant 0 : i32
    %c0_i32_0 = arith.constant 0 : i32
    %c0_i32_1 = arith.constant 0 : i32
    return %c0_i32, %c0_i32_0 : i32, i32
  }
  func.func @transform_5(%arg0: i32, %arg1: i32) -> (i32, i32) {
    %c1_i32 = arith.constant 1 : i32
    %0 = arith.muli %arg0, %c1_i32 : i32
    %1 = arith.addi %0, %arg1 : i32
    %c0_i32 = arith.constant 0 : i32
    %c0_i32_0 = arith.constant 0 : i32
    return %1, %c0_i32 : i32, i32
  }
  func.func @transform_6(%arg0: i32, %arg1: i32) -> (i32, i32, i32) {
    %c1_i32 = arith.constant 1 : i32
    %0 = arith.muli %arg0, %c1_i32 : i32
    %1 = arith.addi %0, %arg1 : i32
    %c0_i32 = arith.constant 0 : i32
    %c0_i32_0 = arith.constant 0 : i32
    %c0_i32_1 = arith.constant 0 : i32
    return %1, %c0_i32, %c0_i32_0 : i32, i32, i32
  }
  func.func @transform_7(%arg0: i32, %arg1: i32) -> (i32, i32, i32) {
    %c1_i32 = arith.constant 1 : i32
    %0 = arith.muli %arg0, %c1_i32 : i32
    %1 = arith.addi %0, %arg1 : i32
    %c0_i32 = arith.constant 0 : i32
    %c0_i32_0 = arith.constant 0 : i32
    %c0_i32_1 = arith.constant 0 : i32
    return %1, %c0_i32, %c0_i32_0 : i32, i32, i32
  }
}

module attributes {stable_mosaic.version = 11 : i64} {
  func.func @_mm_kernel(%arg0: i32, %arg1: i32, %arg2: memref<64x128xf32, #tpu.memory_space<vmem>>, %arg3: memref<128x128xf32, #tpu.memory_space<vmem>>, %arg4: memref<1x128xf32, #tpu.memory_space<vmem>>, %arg5: memref<1x128xf32, #tpu.memory_space<vmem>>, %arg6: memref<64x128xf32, #tpu.memory_space<vmem>>, %arg7: memref<1x1x128xf32, #tpu.memory_space<vmem>>, %arg8: memref<1x1x128xf32, #tpu.memory_space<vmem>>, %arg9: memref<64x128xf32, #tpu.memory_space<vmem>>) attributes {dimension_semantics = [#tpu.dimension_semantics<parallel>, #tpu.dimension_semantics<arbitrary>], iteration_bounds = array<i64: 2, 1>, scalar_prefetch = 0 : i64, scratch_operands = 1 : i64, tpu.core_type = #tpu.core_type<tc>, window_params = [{transform_indices = @transform_0, window_bounds = array<i64: 64, 128>}, {transform_indices = @transform_1, window_bounds = array<i64: 128, 128>}, {transform_indices = @transform_2, window_bounds = array<i64: 1, 128>}, {transform_indices = @transform_3, window_bounds = array<i64: 1, 128>}, {transform_indices = @transform_4, window_bounds = array<i64: 64, 128>}, {transform_indices = @transform_5, window_bounds = array<i64: 1, 1, 128>}, {transform_indices = @transform_6, window_bounds = array<i64: 1, 1, 128>}]} {
    %c0 = arith.constant 0 : index
    %c0_0 = arith.constant 0 : index
    %0 = vector.load %arg2[%c0, %c0_0] : memref<64x128xf32, #tpu.memory_space<vmem>>, vector<64x128xf32>
    %c0_1 = arith.constant 0 : index
    %c0_2 = arith.constant 0 : index
    %1 = vector.load %arg4[%c0_1, %c0_2] : memref<1x128xf32, #tpu.memory_space<vmem>>, vector<1x128xf32>
    %2 = vector.broadcast %1 : vector<1x128xf32> to vector<64x128xf32>
    %3 = arith.mulf %0, %2 : vector<64x128xf32>
    %c0_3 = arith.constant 0 : index
    %c0_4 = arith.constant 0 : index
    %4 = vector.load %arg5[%c0_3, %c0_4] : memref<1x128xf32, #tpu.memory_space<vmem>>, vector<1x128xf32>
    %5 = vector.broadcast %4 : vector<1x128xf32> to vector<64x128xf32>
    %6 = arith.addf %3, %5 : vector<64x128xf32>
    %cst = arith.constant 0.000000e+00 : f32
    %7 = vector.broadcast %cst : f32 to vector<64x128xf32>
    %8 = arith.maximumf %6, %7 : vector<64x128xf32>
    %c0_5 = arith.constant 0 : index
    %c0_6 = arith.constant 0 : index
    %9 = vector.load %arg3[%c0_5, %c0_6] : memref<128x128xf32, #tpu.memory_space<vmem>>, vector<128x128xf32>
    %cst_7 = arith.constant dense<0.000000e+00> : vector<64x128xf32>
    %10 = tpu.matmul %8, %9, %cst_7 {dimension_numbers = #tpu.dot_dimension_numbers<[1], [0], [0], [1], [0, 0, 1, 1], [], []>} : vector<64x128xf32>, vector<128x128xf32>, vector<64x128xf32> -> vector<64x128xf32>
    %c0_i32 = arith.constant 0 : i32
    %11 = arith.cmpi eq, %arg1, %c0_i32 : i32
    %12 = arith.extui %11 : i1 to i32
    %c0_i32_8 = arith.constant 0 : i32
    %13 = arith.cmpi ne, %12, %c0_i32_8 : i32
    scf.if %13 {
      %cst_15 = arith.constant 0.000000e+00 : f32
      %20 = vector.broadcast %cst_15 : f32 to vector<64x128xf32>
      %c0_16 = arith.constant 0 : index
      %c0_17 = arith.constant 0 : index
      %21 = vector.load %arg9[%c0_16, %c0_17] : memref<64x128xf32, #tpu.memory_space<vmem>>, vector<64x128xf32>
      tpu.vector_store %arg9[%c0_16, %c0_17], %20 {strides = array<i32>} : memref<64x128xf32, #tpu.memory_space<vmem>>, vector<64x128xf32>,
    } else {
    }
    %c0_9 = arith.constant 0 : index
    %c0_10 = arith.constant 0 : index
    %14 = vector.load %arg9[%c0_9, %c0_10] : memref<64x128xf32, #tpu.memory_space<vmem>>, vector<64x128xf32>
    %15 = arith.addf %14, %10 : vector<64x128xf32>
    %c0_11 = arith.constant 0 : index
    %c0_12 = arith.constant 0 : index
    %16 = vector.load %arg9[%c0_11, %c0_12] : memref<64x128xf32, #tpu.memory_space<vmem>>, vector<64x128xf32>
    tpu.vector_store %arg9[%c0_11, %c0_12], %15 {strides = array<i32>} : memref<64x128xf32, #tpu.memory_space<vmem>>, vector<64x128xf32>,
    %c0_i32_13 = arith.constant 0 : i32
    %17 = arith.cmpi eq, %arg1, %c0_i32_13 : i32
    %18 = arith.extui %17 : i1 to i32
    %c0_i32_14 = arith.constant 0 : i32
    %19 = arith.cmpi ne, %18, %c0_i32_14 : i32
    scf.if %19 {
      %c0_15 = arith.constant 0 : index
      %c0_16 = arith.constant 0 : index
      %20 = vector.load %arg9[%c0_15, %c0_16] : memref<64x128xf32, #tpu.memory_space<vmem>>, vector<64x128xf32>
      %c0_17 = arith.constant 0 : index
      %c0_18 = arith.constant 0 : index
      %21 = vector.load %arg6[%c0_17, %c0_18] : memref<64x128xf32, #tpu.memory_space<vmem>>, vector<64x128xf32>
      tpu.vector_store %arg6[%c0_17, %c0_18], %20 {strides = array<i32>} : memref<64x128xf32, #tpu.memory_space<vmem>>, vector<64x128xf32>,
      %cst_19 = arith.constant dense<0.000000e+00> : vector<128xf32>
      %22 = vector.multi_reduction <add>, %20, %cst_19 [0] : vector<64x128xf32> to vector<128xf32>
      %23 = vector.shape_cast %22 : vector<128xf32> to vector<1x128xf32>
      %c0_20 = arith.constant 0 : index
      %c0_21 = arith.constant 0 : index
      %c0_22 = arith.constant 0 : index
      %24 = vector.load %arg7[%c0_20, %c0_21, %c0_22] : memref<1x1x128xf32, #tpu.memory_space<vmem>>, vector<1x1x128xf32>
      %25 = vector.shape_cast %24 : vector<1x1x128xf32> to vector<1x128xf32>
      %26 = vector.shape_cast %23 : vector<1x128xf32> to vector<1x1x128xf32>
      tpu.vector_store %arg7[%c0_20, %c0_21, %c0_22], %26 {strides = array<i32>} : memref<1x1x128xf32, #tpu.memory_space<vmem>>, vector<1x1x128xf32>,
      %27 = arith.mulf %20, %20 : vector<64x128xf32>
      %cst_23 = arith.constant dense<0.000000e+00> : vector<128xf32>
      %28 = vector.multi_reduction <add>, %27, %cst_23 [0] : vector<64x128xf32> to vector<128xf32>
      %29 = vector.shape_cast %28 : vector<128xf32> to vector<1x128xf32>
      %c0_24 = arith.constant 0 : index
      %c0_25 = arith.constant 0 : index
      %c0_26 = arith.constant 0 : index
      %30 = vector.load %arg8[%c0_24, %c0_25, %c0_26] : memref<1x1x128xf32, #tpu.memory_space<vmem>>, vector<1x1x128xf32>
      %31 = vector.shape_cast %30 : vector<1x1x128xf32> to vector<1x128xf32>
      %32 = vector.shape_cast %29 : vector<1x128xf32> to vector<1x1x128xf32>
      tpu.vector_store %arg8[%c0_24, %c0_25, %c0_26], %32 {strides = array<i32>} : memref<1x1x128xf32, #tpu.memory_space<vmem>>, vector<1x1x128xf32>,
    } else {
    }
    return
  }
  func.func @transform_0(%arg0: i32, %arg1: i32) -> (i32, i32) {
    %c0_i32 = arith.constant 0 : i32
    return %arg0, %arg1 : i32, i32
  }
  func.func @transform_1(%arg0: i32, %arg1: i32) -> (i32, i32) {
    %c0_i32 = arith.constant 0 : i32
    %c0_i32_0 = arith.constant 0 : i32
    return %arg1, %c0_i32 : i32, i32
  }
  func.func @transform_2(%arg0: i32, %arg1: i32) -> (i32, i32) {
    %c0_i32 = arith.constant 0 : i32
    %c0_i32_0 = arith.constant 0 : i32
    return %c0_i32, %arg1 : i32, i32
  }
  func.func @transform_3(%arg0: i32, %arg1: i32) -> (i32, i32) {
    %c0_i32 = arith.constant 0 : i32
    %c0_i32_0 = arith.constant 0 : i32
    return %c0_i32, %arg1 : i32, i32
  }
  func.func @transform_4(%arg0: i32, %arg1: i32) -> (i32, i32) {
    %c0_i32 = arith.constant 0 : i32
    %c0_i32_0 = arith.constant 0 : i32
    return %arg0, %c0_i32 : i32, i32
  }
  func.func @transform_5(%arg0: i32, %arg1: i32) -> (i32, i32, i32) {
    %c0_i32 = arith.constant 0 : i32
    %c0_i32_0 = arith.constant 0 : i32
    %c0_i32_1 = arith.constant 0 : i32
    return %arg0, %c0_i32, %c0_i32_0 : i32, i32, i32
  }
  func.func @transform_6(%arg0: i32, %arg1: i32) -> (i32, i32, i32) {
    %c0_i32 = arith.constant 0 : i32
    %c0_i32_0 = arith.constant 0 : i32
    %c0_i32_1 = arith.constant 0 : i32
    return %arg0, %c0_i32, %c0_i32_0 : i32, i32, i32
  }
}

module attributes {stable_mosaic.version = 11 : i64} {
  func.func @_mm_kernel(%arg0: i32, %arg1: i32, %arg2: memref<8x1x8x128xf32, #tpu.memory_space<vmem>>, %arg3: memref<128x128xf32, #tpu.memory_space<vmem>>, %arg4: memref<64x128xf32, #tpu.memory_space<vmem>>, %arg5: memref<1x1x128xf32, #tpu.memory_space<vmem>>, %arg6: memref<1x1x128xf32, #tpu.memory_space<vmem>>, %arg7: memref<64x128xf32, #tpu.memory_space<vmem>>) attributes {dimension_semantics = [#tpu.dimension_semantics<parallel>, #tpu.dimension_semantics<arbitrary>], iteration_bounds = array<i64: 2, 1>, scalar_prefetch = 0 : i64, scratch_operands = 1 : i64, tpu.core_type = #tpu.core_type<tc>, window_params = [{transform_indices = @transform_0, window_bounds = array<i64: 8, 1, 8, 128>}, {pipeline_mode = #tpu.pipeline_mode<synchronous>, transform_indices = @transform_1, window_bounds = array<i64: 128, 128>}, {transform_indices = @transform_2, window_bounds = array<i64: 64, 128>}, {transform_indices = @transform_3, window_bounds = array<i64: 1, 1, 128>}, {transform_indices = @transform_4, window_bounds = array<i64: 1, 1, 128>}]} {
    %c0 = arith.constant 0 : index
    %c0_0 = arith.constant 0 : index
    %c0_1 = arith.constant 0 : index
    %c0_2 = arith.constant 0 : index
    %0 = vector.load %arg2[%c0, %c0_0, %c0_1, %c0_2] : memref<8x1x8x128xf32, #tpu.memory_space<vmem>>, vector<8x1x8x128xf32>
    %1 = vector.shape_cast %0 : vector<8x1x8x128xf32> to vector<64x128xf32>
    %c0_3 = arith.constant 0 : index
    %c0_4 = arith.constant 0 : index
    %2 = vector.load %arg3[%c0_3, %c0_4] : memref<128x128xf32, #tpu.memory_space<vmem>>, vector<128x128xf32>
    %cst = arith.constant dense<0.000000e+00> : vector<64x128xf32>
    %3 = tpu.matmul %1, %2, %cst {dimension_numbers = #tpu.dot_dimension_numbers<[1], [0], [0], [1], [0, 0, 1, 1], [], []>} : vector<64x128xf32>, vector<128x128xf32>, vector<64x128xf32> -> vector<64x128xf32>
    %c0_5 = arith.constant 0 : index
    %c0_6 = arith.constant 0 : index
    %4 = vector.load %arg7[%c0_5, %c0_6] : memref<64x128xf32, #tpu.memory_space<vmem>>, vector<64x128xf32>
    tpu.vector_store %arg7[%c0_5, %c0_6], %3 {strides = array<i32>} : memref<64x128xf32, #tpu.memory_space<vmem>>, vector<64x128xf32>,
    %c0_7 = arith.constant 0 : index
    %c0_8 = arith.constant 0 : index
    %5 = vector.load %arg7[%c0_7, %c0_8] : memref<64x128xf32, #tpu.memory_space<vmem>>, vector<64x128xf32>
    %c0_9 = arith.constant 0 : index
    %c0_10 = arith.constant 0 : index
    %6 = vector.load %arg4[%c0_9, %c0_10] : memref<64x128xf32, #tpu.memory_space<vmem>>, vector<64x128xf32>
    tpu.vector_store %arg4[%c0_9, %c0_10], %5 {strides = array<i32>} : memref<64x128xf32, #tpu.memory_space<vmem>>, vector<64x128xf32>,
    %cst_11 = arith.constant dense<0.000000e+00> : vector<128xf32>
    %7 = vector.multi_reduction <add>, %5, %cst_11 [0] : vector<64x128xf32> to vector<128xf32>
    %8 = vector.shape_cast %7 : vector<128xf32> to vector<1x128xf32>
    %c0_12 = arith.constant 0 : index
    %c0_13 = arith.constant 0 : index
    %c0_14 = arith.constant 0 : index
    %9 = vector.load %arg5[%c0_12, %c0_13, %c0_14] : memref<1x1x128xf32, #tpu.memory_space<vmem>>, vector<1x1x128xf32>
    %10 = vector.shape_cast %9 : vector<1x1x128xf32> to vector<1x128xf32>
    %11 = vector.shape_cast %8 : vector<1x128xf32> to vector<1x1x128xf32>
    tpu.vector_store %arg5[%c0_12, %c0_13, %c0_14], %11 {strides = array<i32>} : memref<1x1x128xf32, #tpu.memory_space<vmem>>, vector<1x1x128xf32>,
    %12 = arith.mulf %5, %5 : vector<64x128xf32>
    %cst_15 = arith.constant dense<0.000000e+00> : vector<128xf32>
    %13 = vector.multi_reduction <add>, %12, %cst_15 [0] : vector<64x128xf32> to vector<128xf32>
    %14 = vector.shape_cast %13 : vector<128xf32> to vector<1x128xf32>
    %c0_16 = arith.constant 0 : index
    %c0_17 = arith.constant 0 : index
    %c0_18 = arith.constant 0 : index
    %15 = vector.load %arg6[%c0_16, %c0_17, %c0_18] : memref<1x1x128xf32, #tpu.memory_space<vmem>>, vector<1x1x128xf32>
    %16 = vector.shape_cast %15 : vector<1x1x128xf32> to vector<1x128xf32>
    %17 = vector.shape_cast %14 : vector<1x128xf32> to vector<1x1x128xf32>
    tpu.vector_store %arg6[%c0_16, %c0_17, %c0_18], %17 {strides = array<i32>} : memref<1x1x128xf32, #tpu.memory_space<vmem>>, vector<1x1x128xf32>,
    return
  }
  func.func @transform_0(%arg0: i32, %arg1: i32) -> (i32, i32, i32, i32) {
    %c1_i32 = arith.constant 1 : i32
    %0 = arith.muli %arg0, %c1_i32 : i32
    %1 = arith.addi %0, %arg1 : i32
    %c0_i32 = arith.constant 0 : i32
    %c0_i32_0 = arith.constant 0 : i32
    %c0_i32_1 = arith.constant 0 : i32
    %c0_i32_2 = arith.constant 0 : i32
    return %1, %c0_i32, %c0_i32_0, %c0_i32_1 : i32, i32, i32, i32
  }
  func.func @transform_1(%arg0: i32, %arg1: i32) -> (i32, i32) {
    %c0_i32 = arith.constant 0 : i32
    %c0_i32_0 = arith.constant 0 : i32
    %c0_i32_1 = arith.constant 0 : i32
    return %c0_i32, %c0_i32_0 : i32, i32
  }
  func.func @transform_2(%arg0: i32, %arg1: i32) -> (i32, i32) {
    %c1_i32 = arith.constant 1 : i32
    %0 = arith.muli %arg0, %c1_i32 : i32
    %1 = arith.addi %0, %arg1 : i32
    %c0_i32 = arith.constant 0 : i32
    %c0_i32_0 = arith.constant 0 : i32
    return %1, %c0_i32 : i32, i32
  }
  func.func @transform_3(%arg0: i32, %arg1: i32) -> (i32, i32, i32) {
    %c1_i32 = arith.constant 1 : i32
    %0 = arith.muli %arg0, %c1_i32 : i32
    %1 = arith.addi %0, %arg1 : i32
    %c0_i32 = arith.constant 0 : i32
    %c0_i32_0 = arith.constant 0 : i32
    %c0_i32_1 = arith.constant 0 : i32
    return %1, %c0_i32, %c0_i32_0 : i32, i32, i32
  }
  func.func @transform_4(%arg0: i32, %arg1: i32) -> (i32, i32, i32) {
    %c1_i32 = arith.constant 1 : i32
    %0 = arith.muli %arg0, %c1_i32 : i32
    %1 = arith.addi %0, %arg1 : i32
    %c0_i32 = arith.constant 0 : i32
    %c0_i32_0 = arith.constant 0 : i32
    %c0_i32_1 = arith.constant 0 : i32
    return %1, %c0_i32, %c0_i32_0 : i32, i32, i32
  }
}

module attributes {stable_mosaic.version = 11 : i64} {
  func.func @_bn_add_relu_kernel(%arg0: i32, %arg1: memref<64x128xf32, #tpu.memory_space<vmem>>, %arg2: memref<1x128xf32, #tpu.memory_space<vmem>>, %arg3: memref<1x128xf32, #tpu.memory_space<vmem>>, %arg4: memref<64x128xf32, #tpu.memory_space<vmem>>, %arg5: memref<1x128xf32, #tpu.memory_space<vmem>>, %arg6: memref<1x128xf32, #tpu.memory_space<vmem>>, %arg7: memref<64x128xf32, #tpu.memory_space<vmem>>) attributes {dimension_semantics = [#tpu.dimension_semantics<parallel>], iteration_bounds = array<i64: 2>, scalar_prefetch = 0 : i64, scratch_operands = 0 : i64, tpu.core_type = #tpu.core_type<tc>, window_params = [{transform_indices = @transform_0, window_bounds = array<i64: 64, 128>}, {pipeline_mode = #tpu.pipeline_mode<synchronous>, transform_indices = @transform_1, window_bounds = array<i64: 1, 128>}, {pipeline_mode = #tpu.pipeline_mode<synchronous>, transform_indices = @transform_2, window_bounds = array<i64: 1, 128>}, {transform_indices = @transform_3, window_bounds = array<i64: 64, 128>}, {pipeline_mode = #tpu.pipeline_mode<synchronous>, transform_indices = @transform_4, window_bounds = array<i64: 1, 128>}, {pipeline_mode = #tpu.pipeline_mode<synchronous>, transform_indices = @transform_5, window_bounds = array<i64: 1, 128>}, {transform_indices = @transform_6, window_bounds = array<i64: 64, 128>}]} {
    %c0 = arith.constant 0 : index
    %c0_0 = arith.constant 0 : index
    %0 = vector.load %arg1[%c0, %c0_0] : memref<64x128xf32, #tpu.memory_space<vmem>>, vector<64x128xf32>
    %c0_1 = arith.constant 0 : index
    %c0_2 = arith.constant 0 : index
    %1 = vector.load %arg2[%c0_1, %c0_2] : memref<1x128xf32, #tpu.memory_space<vmem>>, vector<1x128xf32>
    %2 = vector.broadcast %1 : vector<1x128xf32> to vector<64x128xf32>
    %3 = arith.mulf %0, %2 : vector<64x128xf32>
    %c0_3 = arith.constant 0 : index
    %c0_4 = arith.constant 0 : index
    %4 = vector.load %arg3[%c0_3, %c0_4] : memref<1x128xf32, #tpu.memory_space<vmem>>, vector<1x128xf32>
    %5 = vector.broadcast %4 : vector<1x128xf32> to vector<64x128xf32>
    %6 = arith.addf %3, %5 : vector<64x128xf32>
    %c0_5 = arith.constant 0 : index
    %c0_6 = arith.constant 0 : index
    %7 = vector.load %arg4[%c0_5, %c0_6] : memref<64x128xf32, #tpu.memory_space<vmem>>, vector<64x128xf32>
    %c0_7 = arith.constant 0 : index
    %c0_8 = arith.constant 0 : index
    %8 = vector.load %arg5[%c0_7, %c0_8] : memref<1x128xf32, #tpu.memory_space<vmem>>, vector<1x128xf32>
    %9 = vector.broadcast %8 : vector<1x128xf32> to vector<64x128xf32>
    %10 = arith.mulf %7, %9 : vector<64x128xf32>
    %c0_9 = arith.constant 0 : index
    %c0_10 = arith.constant 0 : index
    %11 = vector.load %arg6[%c0_9, %c0_10] : memref<1x128xf32, #tpu.memory_space<vmem>>, vector<1x128xf32>
    %12 = vector.broadcast %11 : vector<1x128xf32> to vector<64x128xf32>
    %13 = arith.addf %10, %12 : vector<64x128xf32>
    %14 = arith.addf %6, %13 : vector<64x128xf32>
    %cst = arith.constant 0.000000e+00 : f32
    %15 = vector.broadcast %cst : f32 to vector<64x128xf32>
    %16 = arith.maximumf %14, %15 : vector<64x128xf32>
    %c0_11 = arith.constant 0 : index
    %c0_12 = arith.constant 0 : index
    %17 = vector.load %arg7[%c0_11, %c0_12] : memref<64x128xf32, #tpu.memory_space<vmem>>, vector<64x128xf32>
    tpu.vector_store %arg7[%c0_11, %c0_12], %16 {strides = array<i32>} : memref<64x128xf32, #tpu.memory_space<vmem>>, vector<64x128xf32>,
    return
  }
  func.func @transform_0(%arg0: i32) -> (i32, i32) {
    %c0_i32 = arith.constant 0 : i32
    %c0_i32_0 = arith.constant 0 : i32
    return %arg0, %c0_i32 : i32, i32
  }
  func.func @transform_1(%arg0: i32) -> (i32, i32) {
    %c0_i32 = arith.constant 0 : i32
    %c0_i32_0 = arith.constant 0 : i32
    %c0_i32_1 = arith.constant 0 : i32
    return %c0_i32, %c0_i32_0 : i32, i32
  }
  func.func @transform_2(%arg0: i32) -> (i32, i32) {
    %c0_i32 = arith.constant 0 : i32
    %c0_i32_0 = arith.constant 0 : i32
    %c0_i32_1 = arith.constant 0 : i32
    return %c0_i32, %c0_i32_0 : i32, i32
  }
  func.func @transform_3(%arg0: i32) -> (i32, i32) {
    %c0_i32 = arith.constant 0 : i32
    %c0_i32_0 = arith.constant 0 : i32
    return %arg0, %c0_i32 : i32, i32
  }
  func.func @transform_4(%arg0: i32) -> (i32, i32) {
    %c0_i32 = arith.constant 0 : i32
    %c0_i32_0 = arith.constant 0 : i32
    %c0_i32_1 = arith.constant 0 : i32
    return %c0_i32, %c0_i32_0 : i32, i32
  }
  func.func @transform_5(%arg0: i32) -> (i32, i32) {
    %c0_i32 = arith.constant 0 : i32
    %c0_i32_0 = arith.constant 0 : i32
    %c0_i32_1 = arith.constant 0 : i32
    return %c0_i32, %c0_i32_0 : i32, i32
  }
  func.func @transform_6(%arg0: i32) -> (i32, i32) {
    %c0_i32 = arith.constant 0 : i32
    %c0_i32_0 = arith.constant 0 : i32
    return %arg0, %c0_i32 : i32, i32
  }
}

</mosaic_0001>

<bundles_post_ra>
// kernel: bottleneck_forward.5
= control target key start
LH: loop header
LB: loop body
LE: loop exit
PB: predicated region body
PF: predicated region fallthrough
CT: control target
= control target key end

     0   :  { %10 = vsyncpa [#allocation4], 0  ;;  %s1761_s0 = inlined_call_operand.hbm [shape: f32[512,64], index: 0, kind: input, shape index: {}]   ;;  %s1762_s1 = inlined_call_operand.vmem [shape: f32[64,128], index: 1, kind: input, shape index: {}]   ;;  %s1763_s2 = inlined_call_operand.vmem [shape: f32[512,128], index: 2, kind: output, shape index: {0}]   ;;  %s1764_s3 = inlined_call_operand.vmem [shape: f32[2,1,128], index: 3, kind: output, shape index: {1}]   ;;  %s1765_s4 = inlined_call_operand.vmem [shape: f32[2,1,128], index: 4, kind: output, shape index: {2}]  }
   0x1   :  { %12 = vsyncpa [#allocation4 + $0x1], 0  ;;  %s1428_s15 = smov 0   ;;  %s1430_s16 = smov 0  }
   0x2   :  { %s1432_s17 = smov 0   ;;  %s1434_s18 = smov 0  }
   0x3   :  { %s1436_s19 = smov 0   ;;  %s1438_s20 = smov 0  }
   0x4 LB: > { %s1086_s21 = sadd.s32 4294967295, %s1398_s20   ;;  %s30_s22 = sadd.s32 1, %s1394_s19  ;;  %s1398_s20 = sphi %s1438_s20, %s18_s20   ;;  %s1394_s19 = sphi %s1436_s19, %s1773_s19   ;;  %s1390_s18 = sphi %s1434_s18, %s1772_s18   ;;  %s1386_s17 = sphi %s1432_s17, %s1771_s17   ;;  %s1382_s16 = sphi %s1430_s16, %s1770_s16   ;;  %s1378_s15 = sphi %s1428_s15, %s1769_s15  }
   0x5   : > { %p32_p0 = scmp.ge.s32.totalorder %s30_s22, 2  ;;  %s39_s23 = sadd.s32 1, %s1386_s17 }
   0x6   : > { %p46_p1 = scmp.ne.s32.totalorder %s1386_s17, %s1382_s16  ;;  %p47_p2 = scmp.eq.s32.totalorder %s1398_s20, 0 }
   0x7   : > { %s1775_s22 = smov (%p32_p0, %s30_s22), 0  ;;  %p52_p4 = scmp.ne.s32.totalorder %s1382_s16, %s1378_s15 }
   0x8   : > { %p1464_p3 = por %p47_p2, %p46_p1  ;;  %s34_s25 = ssub.s32 %s1394_s19, %s1775_s22 }
   0x9   : > { %p53_p5 = scmp.eq.s32.totalorder %s1086_s21, 0  ;;  %p37_p6 = scmp.eq.s32.totalorder %s34_s25, 0 }
   0xa   : > { %p1267_p8 = scmp.lt.s32.totalorder %s1398_s20, 2  ;;  %s189_s28 = sand.u32 1, %s1386_s17  }
   0xb   : > { %p1471_p7 = por %p53_p5, %p52_p4  ;;  %s1132_s29 = sshll.u32 %s1394_s19, 12 }
   0xc   : > { %s1477_s27 = scalar_select %p37_p6, %s1386_s17, %s39_s23  }
   0xd   : > { %s1091_s30 = sshll.u32 %s189_s28, 8  ;;  %s1484_s7 = scalar_lea.hbm %s1761_s0, %s1132_s29 }
   0xe   : > { %s193_s8 = scalar_lea.vmem [#allocation3], %s1091_s30  ;;  %p1488_p9 = pnand %p1267_p8, %p1464_p3 }
   0xf   : > { %s201_s9 = sshll.u32 %s193_s8, 4  ;;  %s1494_s11 = scalar_lea.sflag [#allocation4], %s189_s28  ;;  %s1492_s9 = int_to_ptr.vmem [resolvable:$true] %s201_s9 }
  0x10   : > { %s1318_s12 = scalar_lea.hbm %s1484_s7, 4096  ;;  %p1320_p11 = pneg %p1488_p9 }
  0x11   : > { %p1319_p10 = scmp.ne.s32.totalorder %s1484_s7, %s1318_s12  ;;  %s1323_s15 = scalar_lea.hbm %s1761_s0, 8192 }
  0x12   : > { %p1324_p0 = scmp.lt.u32.totalorder %s1484_s7, %s1761_s0  ;;  %p1325_p1 = scmp.lt.u32.totalorder %s1323_s15, %s1318_s12 }
  0x13   : > { %p1321_p12 = pnand %p1320_p11, %p1319_p10  ;;  %p1327_p3 = scmp.lt.u32.totalorder %s1318_s12, %s1484_s7 }
  0x14   : > { %p1326_p2 = por %p1325_p1, %p1324_p0 }
  0x15   : > { %p1322_p13 = pneg %p1321_p12 }
  0x16   : > { %p1328_p4 = por %p1327_p3, %p1326_p2 }
  0x18   : > { %p1329_p5 = pnand %p1328_p4, %p1322_p13 }
  0x1a   : > { %1332 = shalt.err (!%p1329_p5)
}
  0x1b   : > { %s1333_s24 = scalar_lea.vmem %s1492_s9, 4096  ;;  %s1400_s25 = smov [#allocation3]  }
  0x1c   : > { %p1334_p6 = scmp.ne.s32.totalorder %s1492_s9, %s1333_s24  ;;  %s1338_s28 = sshll.u32 %s1400_s25, 4  ;;  %s1339_s28 = int_to_ptr.vmem [resolvable:$false] %s1338_s28 }
  0x1d   : > { %s1340_s29 = scalar_lea.vmem %s1339_s28, 8192  ;;  %p1341_p12 = scmp.lt.s32.totalorder %s1492_s9, %s1339_s28 }
  0x1e   : > { %p1336_p8 = pnand %p1334_p6, %p1320_p11  ;;  %p1342_p0 = scmp.lt.s32.totalorder %s1340_s29, %s1333_s24 }
  0x20   : > { %p1337_p10 = pneg %p1336_p8  ;;  %p1343_p1 = por %p1342_p0, %p1341_p12 }
  0x22   : > { %p1344_p2 = pnand %p1343_p1, %p1337_p10 }
  0x24   : > { %1347 = shalt.err (!%p1344_p2)
}
  0x25   : > { %s1401_s30 = smov 128   ;;  %s1402_s5 = smov 8  }
  0x26   : > { %1266 = dma.hbm_to_vmem [thread:$0]  (!%p1488_p9), %s1484_s7, 4096, %s1492_s9, %s1494_s11, %s1401_s30, %s1401_s30, %s1402_s5  }
  0x27   : > { %p1094_p11 = scmp.ge.s32.totalorder %s1398_s20, 1  ;;  %p209_p13 = scmp.lt.s32.totalorder %s1398_s20, 3 }
  0x29   : > { %p210_p3 = pnand %p1094_p11, %p209_p13 }
  0x2a   : > { %s215_s6 = sand.u32 (!%p210_p3), 1, %s1382_s16  }
  0x2b   : > { %213 = sbr.rel (%p210_p3) target bundleno = 362 (0x16a), region = 28  ;;  %s1095_s8 = sshll.u32 (!%p210_p3), %s215_s6, 8 }
  0x2c   : > { %s216_s12 = scalar_lea.sflag (!%p210_p3), [#allocation4], %s215_s6  ;;  %s1525_s13 = scalar_lea.vmem (!%p210_p3), [#allocation3], %s1095_s8 }
  0x32   : > { %1373 = dma.done.wait (%p1471_p7), %s216_s12, 4096  }
  0x33   : > { %1375 = vsyncadd (%p1471_p7), %s216_s12, 4294963200  ;;  %v306_v0 = vld [vmem:[%s1762_s1] sm:$0xff]  ;;  %v307_v1 = vld [vmem:[%s1762_s1 + $0x8] sm:$0xff]  ;;  %vm314_vm0 = vcmask 523264   ;;  %s1096_s8 = sshll.u32 %s1390_s18, 5  ;;  %p268_p9 = scmp.lt.s32.totalorder %s1390_s18, 1 }
  0x34   : > { %v308_v2 = vld [vmem:[%s1762_s1 + $0x10] sm:$0xff]  ;;  %v1237_v3 = vpack.c.bf16 %v307_v1, %v306_v0  ;;  %v309_v4 = vld [vmem:[%s1762_s1 + $0x18] sm:$0xff]  ;;  %v310_v6 = vld [vmem:[%s1762_s1 + $0x20] sm:$0xff]  ;;  %p263_p7 = scmp.lt.s32.totalorder %s1096_s8, 63 }
  0x35   : > { %v1241_v5 = vpack.c.bf16 %v309_v4, %v308_v2  ;;  %v311_v7 = vld [vmem:[%s1762_s1 + $0x28] sm:$0xff]  ;;  %v274_v8 = vld [vmem:[%s1525_s13] sm:$0xff]  ;;  %v312_v10 = vld [vmem:[%s1762_s1 + $0x30] sm:$0xff]  ;;  %s1779_s18 = smov (!%p268_p9, %s1390_s18), 1 }
  0x36   : > { %1238 = vmatprep.subr.bf16.mxu0 %v1237_v3  ;;  %1189 = vmatprep.mubr.msk.f32.mxu0 %vm314_vm0, %v274_v8  ;;  %v1245_v9 = vpack.c.bf16 %v311_v7, %v310_v6  ;;  %v313_v11 = vld [vmem:[%s1762_s1 + $0x38] sm:$0xff]  ;;  %v290_v12 = vld [vmem:[%s1525_s13 + $0x80] sm:$0xff]  ;;  %v275_v14 = vld [vmem:[%s1525_s13 + $0x8] sm:$0xff]  ;;  %s1777_s8 = smov (!%p263_p7, %s1096_s8), 63  ;;  %s270_s10 = scalar_lea.vmem %s1764_s3, %s1779_s18 }
  0x37   : > { %1240 = vmatpush3.bf16.msra.mxu0 %v1237_v3  ;;  %1253 = vmatprep.subr.bf16.mxu1 %v1237_v3  ;;  %v1249_v13 = vpack.c.bf16 %v313_v11, %v312_v10  ;;  %v276_v15 = vld [vmem:[%s1525_s13 + $0x10] sm:$0xff]  ;;  %v291_v16 = vld [vmem:[%s1525_s13 + $0x88] sm:$0xff]  ;;  %v277_v18 = vld [vmem:[%s1525_s13 + $0x18] sm:$0xff]  ;;  %s1097_s12 = sshll.u32 %s1777_s8, 3  ;;  %s273_s23 = scalar_lea.vmem %s1765_s4, %s1779_s18 }
  0x38   : > { %1242 = vmatprep.subr.bf16.mxu0 %v1241_v5  ;;  %1257 = vmatpush3.bf16.msra.mxu1 %v1237_v3  ;;  %v292_v17 = vld [vmem:[%s1525_s13 + $0x90] sm:$0xff]  ;;  %v278_v19 = vld [vmem:[%s1525_s13 + $0x20] sm:$0xff]  ;;  %v293_v20 = vld [vmem:[%s1525_s13 + $0x98] sm:$0xff]  ;;  %s1623_s7 = scalar_lea.vmem %s1763_s2, %s1097_s12 }
  0x39   : > { %1254 = vmatprep.subr.bf16.mxu1 %v1241_v5  ;;  %1213 = vmatprep.mubr.msk.f32.mxu1 %vm314_vm0, %v290_v12  ;;  %v294_v21 = vld [vmem:[%s1525_s13 + $0xa0] sm:$0xff]  ;;  %v279_v22 = vld [vmem:[%s1525_s13 + $0x28] sm:$0xff]  ;;  %v280_v23 = vld [vmem:[%s1525_s13 + $0x30] sm:$0xff] }
  0x3a   : > { %v295_v24 = vld [vmem:[%s1525_s13 + $0xa8] sm:$0xff]  ;;  %v296_v25 = vld [vmem:[%s1525_s13 + $0xb0] sm:$0xff]  ;;  %v281_v26 = vld [vmem:[%s1525_s13 + $0x38] sm:$0xff] }
  0x3b   : > { %1244 = vmatpush3.bf16.msra.mxu0 %v1241_v5  ;;  %v282_v27 = vld [vmem:[%s1525_s13 + $0x40] sm:$0xff]  ;;  %v297_v28 = vld [vmem:[%s1525_s13 + $0xb8] sm:$0xff]  ;;  %v283_v30 = vld [vmem:[%s1525_s13 + $0x48] sm:$0xff] }
  0x3c   : > { %1246 = vmatprep.subr.bf16.mxu0 %v1245_v9  ;;  %1258 = vmatpush3.bf16.msra.mxu1 %v1241_v5  ;;  %v298_v29 = vld [vmem:[%s1525_s13 + $0xc0] sm:$0xff]  ;;  %v284_v31 = vld [vmem:[%s1525_s13 + $0x50] sm:$0xff]  ;;  %v299_v32 = vld [vmem:[%s1525_s13 + $0xc8] sm:$0xff] }
  0x3d   : > { %1255 = vmatprep.subr.bf16.mxu1 %v1245_v9  ;;  %v300_v33 = vld [vmem:[%s1525_s13 + $0xd0] sm:$0xff]  ;;  %v285_v34 = vld [vmem:[%s1525_s13 + $0x58] sm:$0xff]  ;;  %v286_v35 = vld [vmem:[%s1525_s13 + $0x60] sm:$0xff] }
  0x3e   : > { %v301_v36 = vld [vmem:[%s1525_s13 + $0xd8] sm:$0xff]  ;;  %v302_v37 = vld [vmem:[%s1525_s13 + $0xe0] sm:$0xff]  ;;  %v287_v38 = vld [vmem:[%s1525_s13 + $0x68] sm:$0xff] }
  0x3f   : > { %1248 = vmatpush3.bf16.msra.mxu0 %v1245_v9  ;;  %v288_v39 = vld [vmem:[%s1525_s13 + $0x70] sm:$0xff]  ;;  %v303_v40 = vld [vmem:[%s1525_s13 + $0xe8] sm:$0xff]  ;;  %v289_v42 = vld [vmem:[%s1525_s13 + $0x78] sm:$0xff] }
  0x40   : > { %1250 = vmatprep.subr.bf16.mxu0 %v1249_v13  ;;  %1259 = vmatpush3.bf16.msra.mxu1 %v1245_v9  ;;  %v304_v41 = vld [vmem:[%s1525_s13 + $0xf0] sm:$0xff]  ;;  %v305_v43 = vld [vmem:[%s1525_s13 + $0xf8] sm:$0xff] }
  0x41   : > { %1256 = vmatprep.subr.bf16.mxu1 %v1249_v13 }
  0x43   : > { %1252 = vmatpush3.bf16.msra.mxu0 %v1249_v13 }
  0x44   : > { %1260 = vmatpush3.bf16.msra.mxu1 %v1249_v13 }
  0x46   : > { %1190 = vmatmul.mubr.msk.f32.vlgmr.msra.gmra.mrb[0].mxu0 %vm314_vm0, %v275_v14 }
  0x47   : > { %1192 = vmatprep.mubr.msk.f32.mxu0 %vm314_vm0, %v276_v15  ;;  %1214 = vmatmul.mubr.msk.f32.vlgmr.msra.gmra.mrb[0].mxu1 %vm314_vm0, %v291_v16 }
  0x48   : > { %1216 = vmatprep.mubr.msk.f32.mxu1 %vm314_vm0, %v292_v17 }
  0x4a   : > { %1193 = vmatmul.mubr.msk.f32.gmra.mrb[2].mxu0 %vm314_vm0, %v277_v18 }
  0x4b   : > { %1195 = vmatprep.mubr.msk.f32.mxu0 %vm314_vm0, %v278_v19  ;;  %1217 = vmatmul.mubr.msk.f32.gmra.mrb[2].mxu1 %vm314_vm0, %v293_v20 }
  0x4c   : > { %1219 = vmatprep.mubr.msk.f32.mxu1 %vm314_vm0, %v294_v21 }
  0x4e   : > { %1196 = vmatmul.mubr.msk.f32.gmra.mrb[4].mxu0 %vm314_vm0, %v279_v22 }
  0x4f   : > { %1198 = vmatprep.mubr.msk.f32.mxu0 %vm314_vm0, %v280_v23  ;;  %1220 = vmatmul.mubr.msk.f32.gmra.mrb[4].mxu1 %vm314_vm0, %v295_v24 }
  0x50   : > { %1222 = vmatprep.mubr.msk.f32.mxu1 %vm314_vm0, %v296_v25 }
  0x52   : > { %1199 = vmatmul.mubr.msk.f32.gmra.mrb[6].mxu0 %vm314_vm0, %v281_v26 }
  0x53   : > { %1201 = vmatprep.mubr.msk.f32.mxu0 %vm314_vm0, %v282_v27  ;;  %1223 = vmatmul.mubr.msk.f32.gmra.mrb[6].mxu1 %vm314_vm0, %v297_v28 }
  0x54   : > { %1225 = vmatprep.mubr.msk.f32.mxu1 %vm314_vm0, %v298_v29 }
  0x56   : > { %1202 = vmatmul.mubr.msk.f32.gmra.mrb[8].mxu0 %vm314_vm0, %v283_v30 }
  0x57   : > { %1204 = vmatprep.mubr.msk.f32.mxu0 %vm314_vm0, %v284_v31  ;;  %1226 = vmatmul.mubr.msk.f32.gmra.mrb[8].mxu1 %vm314_vm0, %v299_v32 }
  0x58   : > { %1228 = vmatprep.mubr.msk.f32.mxu1 %vm314_vm0, %v300_v33 }
  0x5a   : > { %1205 = vmatmul.mubr.msk.f32.gmra.mrb[10].mxu0 %vm314_vm0, %v285_v34 }
  0x5b   : > { %1207 = vmatprep.mubr.msk.f32.mxu0 %vm314_vm0, %v286_v35  ;;  %1229 = vmatmul.mubr.msk.f32.gmra.mrb[10].mxu1 %vm314_vm0, %v301_v36 }
  0x5c   : > { %1231 = vmatprep.mubr.msk.f32.mxu1 %vm314_vm0, %v302_v37 }
  0x5e   : > { %1208 = vmatmul.mubr.msk.f32.gmra.mrb[12].mxu0 %vm314_vm0, %v287_v38 }
  0x5f   : > { %1210 = vmatprep.mubr.msk.f32.mxu0 %vm314_vm0, %v288_v39  ;;  %1232 = vmatmul.mubr.msk.f32.gmra.mrb[12].mxu1 %vm314_vm0, %v303_v40 }
  0x60   : > { %1234 = vmatprep.mubr.msk.f32.mxu1 %vm314_vm0, %v304_v41 }
  0x62   : > { %1211 = vmatmul.mubr.msk.f32.gmra.mrb[14].mxu0 %vm314_vm0, %v289_v42 }
  0x63   : > { %1235 = vmatmul.mubr.msk.f32.gmra.mrb[14].mxu1 %vm314_vm0, %v305_v43 }
 0x119   : > { %v1191_v44 = vpop.f32.mrb[0].mxu0 }
 0x11a   : > { %804 = vst [vmem:[%s1623_s7 + $0x8] sm:$0xff] %v1191_v44  ;;  %v874_v45 = vmul.f32 %v1191_v44, %v1191_v44  ;;  %v477_v46 = vpop.f32.mrb[1].mxu0  ;;  %v1626_v47 = vpop.f32.mrb[0].mxu1 }
 0x11b   : > { %803 = vst [vmem:[%s1623_s7] sm:$0xff] %v477_v46  ;;  %v835_v48 = vadd.f32 %v1191_v44, %v477_v46  ;;  %v873_v49 = vmul.f32 %v477_v46, %v477_v46  ;;  %820 = vst [vmem:[%s1623_s7 + $0x88] sm:$0xff] %v1626_v47  ;;  %v1631_v50 = vpop.f32.mrb[1].mxu1 }
 0x11c   : > { %819 = vst [vmem:[%s1623_s7 + $0x80] sm:$0xff] %v1631_v50 }
 0x11d   : > { %v905_v51 = vadd.f32 %v874_v45, %v873_v49  ;;  %v1194_v52 = vpop.f32.mrb[2].mxu0 }
 0x11e   : > { %806 = vst [vmem:[%s1623_s7 + $0x18] sm:$0xff] %v1194_v52  ;;  %v487_v53 = vpop.f32.mrb[3].mxu0  ;;  %v1636_v54 = vpop.f32.mrb[2].mxu1  ;;  %v876_v58 = vmul.f32 %v1194_v52, %v1194_v52 }
 0x11f   : > { %805 = vst [vmem:[%s1623_s7 + $0x10] sm:$0xff] %v487_v53  ;;  %v836_v55 = vadd.f32 %v835_v48, %v487_v53  ;;  %v875_v56 = vmul.f32 %v487_v53, %v487_v53  ;;  %822 = vst [vmem:[%s1623_s7 + $0x98] sm:$0xff] %v1636_v54  ;;  %v1641_v57 = vpop.f32.mrb[3].mxu1 }
 0x120   : > { %821 = vst [vmem:[%s1623_s7 + $0x90] sm:$0xff] %v1641_v57 }
 0x121   : > { %v906_v59 = vadd.f32 %v905_v51, %v875_v56  ;;  %v1197_v60 = vpop.f32.mrb[4].mxu0  ;;  %v837_v61 = vadd.f32 %v1194_v52, %v836_v55 }
 0x122   : > { %808 = vst [vmem:[%s1623_s7 + $0x28] sm:$0xff] %v1197_v60  ;;  %v497_v62 = vpop.f32.mrb[5].mxu0  ;;  %v1646_v63 = vpop.f32.mrb[4].mxu1  ;;  %v878_v4 = vmul.f32 %v1197_v60, %v1197_v60 }
 0x123   : > { %807 = vst [vmem:[%s1623_s7 + $0x20] sm:$0xff] %v497_v62  ;;  %v838_v0 = vadd.f32 %v837_v61, %v497_v62  ;;  %v877_v1 = vmul.f32 %v497_v62, %v497_v62  ;;  %v907_v2 = vadd.f32 %v906_v59, %v876_v58  ;;  %824 = vst [vmem:[%s1623_s7 + $0xa8] sm:$0xff] %v1646_v63  ;;  %v1651_v3 = vpop.f32.mrb[5].mxu1 }
 0x124   : > { %823 = vst [vmem:[%s1623_s7 + $0xa0] sm:$0xff] %v1651_v3  ;;  %v889_v61 = vmul.f32 %v1631_v50, %v1631_v50 }
 0x125   : > { %v908_v5 = vadd.f32 %v907_v2, %v877_v1  ;;  %v1200_v6 = vpop.f32.mrb[6].mxu0  ;;  %v839_v7 = vadd.f32 %v1197_v60, %v838_v0  ;;  %v890_v1 = vmul.f32 %v1626_v47, %v1626_v47 }
 0x126   : > { %810 = vst [vmem:[%s1623_s7 + $0x38] sm:$0xff] %v1200_v6  ;;  %v507_v8 = vpop.f32.mrb[7].mxu0  ;;  %v1656_v9 = vpop.f32.mrb[6].mxu1  ;;  %v880_v14 = vmul.f32 %v1200_v6, %v1200_v6 }
 0x127   : > { %809 = vst [vmem:[%s1623_s7 + $0x30] sm:$0xff] %v507_v8  ;;  %v840_v10 = vadd.f32 %v839_v7, %v507_v8  ;;  %v879_v11 = vmul.f32 %v507_v8, %v507_v8  ;;  %v909_v12 = vadd.f32 %v908_v5, %v878_v4  ;;  %826 = vst [vmem:[%s1623_s7 + $0xb8] sm:$0xff] %v1656_v9  ;;  %v1661_v13 = vpop.f32.mrb[7].mxu1 }
 0x128   : > { %825 = vst [vmem:[%s1623_s7 + $0xb0] sm:$0xff] %v1661_v13  ;;  %v891_v5 = vmul.f32 %v1641_v57, %v1641_v57  ;;  %v892_v8 = vmul.f32 %v1636_v54, %v1636_v54 }
 0x129   : > { %v910_v15 = vadd.f32 %v909_v12, %v879_v11  ;;  %v1203_v16 = vpop.f32.mrb[8].mxu0  ;;  %v841_v17 = vadd.f32 %v1200_v6, %v840_v10 }
 0x12a   : > { %812 = vst [vmem:[%s1623_s7 + $0x48] sm:$0xff] %v1203_v16  ;;  %v517_v18 = vpop.f32.mrb[9].mxu0  ;;  %v1666_v19 = vpop.f32.mrb[8].mxu1  ;;  %v882_v24 = vmul.f32 %v1203_v16, %v1203_v16 }
 0x12b   : > { %811 = vst [vmem:[%s1623_s7 + $0x40] sm:$0xff] %v517_v18  ;;  %v842_v20 = vadd.f32 %v841_v17, %v517_v18  ;;  %v881_v21 = vmul.f32 %v517_v18, %v517_v18  ;;  %v911_v22 = vadd.f32 %v910_v15, %v880_v14  ;;  %828 = vst [vmem:[%s1623_s7 + $0xc8] sm:$0xff] %v1666_v19  ;;  %v1671_v23 = vpop.f32.mrb[9].mxu1 }
 0x12c   : > { %827 = vst [vmem:[%s1623_s7 + $0xc0] sm:$0xff] %v1671_v23 }
 0x12d   : > { %v912_v25 = vadd.f32 %v911_v22, %v881_v21  ;;  %v1206_v26 = vpop.f32.mrb[10].mxu0  ;;  %v843_v27 = vadd.f32 %v1203_v16, %v842_v20 }
 0x12e   : > { %814 = vst [vmem:[%s1623_s7 + $0x58] sm:$0xff] %v1206_v26  ;;  %v527_v28 = vpop.f32.mrb[11].mxu0  ;;  %v1676_v29 = vpop.f32.mrb[10].mxu1  ;;  %v884_v34 = vmul.f32 %v1206_v26, %v1206_v26 }
 0x12f   : > { %813 = vst [vmem:[%s1623_s7 + $0x50] sm:$0xff] %v527_v28  ;;  %v844_v30 = vadd.f32 %v843_v27, %v527_v28  ;;  %v883_v31 = vmul.f32 %v527_v28, %v527_v28  ;;  %v913_v32 = vadd.f32 %v912_v25, %v882_v24  ;;  %830 = vst [vmem:[%s1623_s7 + $0xd8] sm:$0xff] %v1676_v29  ;;  %v1681_v33 = vpop.f32.mrb[11].mxu1 }
 0x130   : > { %829 = vst [vmem:[%s1623_s7 + $0xd0] sm:$0xff] %v1681_v33 }
 0x131   : > { %v914_v35 = vadd.f32 %v913_v32, %v883_v31  ;;  %v1209_v36 = vpop.f32.mrb[12].mxu0  ;;  %v845_v37 = vadd.f32 %v1206_v26, %v844_v30 }
 0x132   : > { %816 = vst [vmem:[%s1623_s7 + $0x68] sm:$0xff] %v1209_v36  ;;  %v537_v38 = vpop.f32.mrb[13].mxu0  ;;  %v1686_v39 = vpop.f32.mrb[12].mxu1  ;;  %v886_v44 = vmul.f32 %v1209_v36, %v1209_v36 }
 0x133   : > { %815 = vst [vmem:[%s1623_s7 + $0x60] sm:$0xff] %v537_v38  ;;  %v846_v40 = vadd.f32 %v845_v37, %v537_v38  ;;  %v885_v41 = vmul.f32 %v537_v38, %v537_v38  ;;  %v915_v42 = vadd.f32 %v914_v35, %v884_v34  ;;  %832 = vst [vmem:[%s1623_s7 + $0xe8] sm:$0xff] %v1686_v39  ;;  %v617_v43 = vpop.f32.mrb[13].mxu1 }
 0x134   : > { %831 = vst [vmem:[%s1623_s7 + $0xe0] sm:$0xff] %v617_v43  ;;  %v901_v31 = vmul.f32 %v617_v43, %v617_v43  ;;  %v902_v35 = vmul.f32 %v1686_v39, %v1686_v39 }
 0x135   : > { %v916_v45 = vadd.f32 %v915_v42, %v885_v41  ;;  %v1212_v46 = vpop.f32.mrb[14].mxu0  ;;  %v847_v48 = vadd.f32 %v1209_v36, %v846_v40 }
 0x136   : > { %818 = vst [vmem:[%s1623_s7 + $0x78] sm:$0xff] %v1212_v46  ;;  %v547_v49 = vpop.f32.mrb[15].mxu0  ;;  %v1236_v51 = vpop.f32.mrb[14].mxu1  ;;  %v888_v58 = vmul.f32 %v1212_v46, %v1212_v46 }
 0x137   : > { %817 = vst [vmem:[%s1623_s7 + $0x70] sm:$0xff] %v547_v49  ;;  %v848_v52 = vadd.f32 %v847_v48, %v547_v49  ;;  %v887_v53 = vmul.f32 %v547_v49, %v547_v49  ;;  %v917_v55 = vadd.f32 %v916_v45, %v886_v44  ;;  %834 = vst [vmem:[%s1623_s7 + $0xf8] sm:$0xff] %v1236_v51  ;;  %v627_v56 = vpop.f32.mrb[15].mxu1 }
 0x138   : > { %833 = vst [vmem:[%s1623_s7 + $0xf0] sm:$0xff] %v627_v56  ;;  %v903_v37 = vmul.f32 %v627_v56, %v627_v56  ;;  %v904_v40 = vmul.f32 %v1236_v51, %v1236_v51 }
 0x139   : > { %v849_v59 = vadd.f32 %v1212_v46, %v848_v52  ;;  %v918_v60 = vadd.f32 %v917_v55, %v887_v53 }
 0x13b   : > { %v919_v62 = vadd.f32 %v918_v60, %v888_v58  ;;  %v850_v0 = vadd.f32 %v849_v59, %v1631_v50  ;;  %v893_v50 = vmul.f32 %v1651_v3, %v1651_v3 }
 0x13d   : > { %v920_v2 = vadd.f32 %v919_v62, %v889_v61  ;;  %v851_v4 = vadd.f32 %v1626_v47, %v850_v0  ;;  %v894_v47 = vmul.f32 %v1646_v63, %v1646_v63 }
 0x13f   : > { %v852_v6 = vadd.f32 %v851_v4, %v1641_v57  ;;  %v921_v7 = vadd.f32 %v920_v2, %v890_v1  ;;  %v895_v57 = vmul.f32 %v1661_v13, %v1661_v13 }
 0x141   : > { %v922_v10 = vadd.f32 %v921_v7, %v891_v5  ;;  %v853_v11 = vadd.f32 %v1636_v54, %v852_v6  ;;  %v896_v54 = vmul.f32 %v1656_v9, %v1656_v9 }
 0x143   : > { %v854_v12 = vadd.f32 %v853_v11, %v1651_v3  ;;  %v923_v14 = vadd.f32 %v922_v10, %v892_v8  ;;  %v897_v3 = vmul.f32 %v1671_v23, %v1671_v23 }
 0x145   : > { %v924_v15 = vadd.f32 %v923_v14, %v893_v50  ;;  %v855_v16 = vadd.f32 %v1646_v63, %v854_v12  ;;  %v898_v63 = vmul.f32 %v1666_v19, %v1666_v19 }
 0x147   : > { %v856_v17 = vadd.f32 %v855_v16, %v1661_v13  ;;  %v925_v18 = vadd.f32 %v924_v15, %v894_v47  ;;  %v899_v13 = vmul.f32 %v1681_v33, %v1681_v33 }
 0x149   : > { %v926_v20 = vadd.f32 %v925_v18, %v895_v57  ;;  %v857_v21 = vadd.f32 %v1656_v9, %v856_v17  ;;  %v900_v9 = vmul.f32 %v1676_v29, %v1676_v29 }
 0x14b   : > { %v858_v22 = vadd.f32 %v857_v21, %v1671_v23  ;;  %v927_v24 = vadd.f32 %v926_v20, %v896_v54 }
 0x14d   : > { %v928_v25 = vadd.f32 %v927_v24, %v897_v3  ;;  %v859_v26 = vadd.f32 %v1666_v19, %v858_v22 }
 0x14f   : > { %v860_v27 = vadd.f32 %v859_v26, %v1681_v33  ;;  %v929_v28 = vadd.f32 %v928_v25, %v898_v63 }
 0x151   : > { %v930_v30 = vadd.f32 %v929_v28, %v899_v13  ;;  %v861_v23 = vadd.f32 %v1676_v29, %v860_v27 }
 0x153   : > { %v862_v32 = vadd.f32 %v861_v23, %v617_v43  ;;  %v931_v34 = vadd.f32 %v930_v30, %v900_v9 }
 0x155   : > { %v932_v19 = vadd.f32 %v931_v34, %v901_v31  ;;  %v863_v36 = vadd.f32 %v1686_v39, %v862_v32 }
 0x157   : > { %v864_v33 = vadd.f32 %v863_v36, %v627_v56  ;;  %v933_v38 = vadd.f32 %v932_v19, %v902_v35 }
 0x159   : > { %v865_v41 = vadd.f32 %v1236_v51, %v864_v33  ;;  %v934_v42 = vadd.f32 %v933_v38, %v903_v37 }
 0x15b   : > { %v866_v44 = vrot.slane %v865_v41, 4  ;;  %v935_v45 = vadd.f32 %v934_v42, %v904_v40 }
 0x15d   : > { %v867_v29 = vadd.f32 %v866_v44, %v865_v41  ;;  %v936_v46 = vrot.slane %v935_v45, 4 }
 0x15f   : > { %v868_v43 = vrot.slane %v867_v29, 2  ;;  %v937_v48 = vadd.f32 %v936_v46, %v935_v45 }
 0x161   : > { %v869_v49 = vadd.f32 %v868_v43, %v867_v29  ;;  %v938_v52 = vrot.slane %v937_v48, 2 }
 0x163   : > { %v870_v53 = vrot.slane %v869_v49, 1  ;;  %v939_v55 = vadd.f32 %v938_v52, %v937_v48 }
 0x165   : > { %v871_v39 = vadd.f32 %v870_v53, %v869_v49  ;;  %v940_v56 = vrot.slane %v939_v55, 1 }
 0x167   : > { %872 = vst [vmem:[%s270_s10] sm:$0x1] %v871_v39  ;;  %v941_v51 = vadd.f32 %v940_v56, %v939_v55 }
 0x169   : > { %942 = vst [vmem:[%s273_s23] sm:$0x1] %v941_v51 }
 0x16a PF: > { %s18_s20 = sadd.s32 1, %s1398_s20   ;;  %s1769_s15 = smov %s1382_s16 }
 0x16b   : > { %p15_p4 = scmp.ge.s32.totalorder %s18_s20, 4   ;;  %s1770_s16 = smov %s1386_s17 }
 0x16c   : > { %s1771_s17 = smov %s1477_s27  ;;  %s1772_s18 = smov %s1394_s19 }
 0x16d   : > { %s1773_s19 = smov %s1775_s22  ;;  %17 = sbr.rel (!%p15_p4) target bundleno = 4 (0x4), region = 103 }
 0x174   :  { %989 = vsyncpa [#allocation4], 1 }
 0x175   :  { %991 = vsyncpa [#allocation4 + $0x1], 1 }

// kernel: bottleneck_forward.7
= control target key start
LH: loop header
LB: loop body
LE: loop exit
PB: predicated region body
PF: predicated region fallthrough
CT: control target
= control target key end

     0   :  { %s975_s21 = smov 0   ;;  %s977_s22 = smov 0   ;;  %s1100_s0 = inlined_call_operand.vmem [shape: f32[128,128], index: 0, kind: input, shape index: {}]   ;;  %s1101_s1 = inlined_call_operand.vmem [shape: f32[128,128], index: 1, kind: input, shape index: {}]   ;;  %s1102_s2 = inlined_call_operand.vmem [shape: f32[1,128], index: 2, kind: input, shape index: {}]   ;;  %s1103_s3 = inlined_call_operand.vmem [shape: f32[1,128], index: 3, kind: input, shape index: {}]   ;;  %s1104_s4 = inlined_call_operand.vmem [shape: f32[128,128], index: 4, kind: output, shape index: {0}]   ;;  %s1105_s5 = inlined_call_operand.vmem [shape: f32[2,1,128], index: 5, kind: output, shape index: {1}]   ;;  %s1106_s6 = inlined_call_operand.vmem [shape: f32[2,1,128], index: 6, kind: output, shape index: {2}]  }
   0x1   :  { %s979_s23 = smov 0  }
   0x2 LB: > { %s29_s24 = sadd.s32 1, %s934_s22  ;;  %p767_p0 = scmp.ge.s32.totalorder %s938_s23, 1  ;;  %s938_s23 = sphi %s979_s23, %s17_s23   ;;  %s934_s22 = sphi %s977_s22, %s1108_s22   ;;  %s930_s21 = sphi %s975_s21, %s1107_s21  }
   0x3   : > { %p31_p1 = scmp.ge.s32.totalorder %s29_s24, 2  ;;  %p262_p2 = scmp.lt.s32.totalorder %s938_s23, 3 }
   0x5   : > { %s1110_s24 = smov (%p31_p1, %s29_s24), 0  ;;  %p263_p3 = pnand %p767_p0, %p262_p2 }
   0x6   : > { %v391_v0 = vld [vmem:[%s1101_s1] sm:$0xff] (!%p263_p3)  ;;  %v392_v1 = vld [vmem:[%s1101_s1 + $0x8] sm:$0xff] (!%p263_p3)  ;;  %v393_v2 = vld [vmem:[%s1101_s1 + $0x10] sm:$0xff] (!%p263_p3)  ;;  %s768_s7 = sshll.u32 (!%p263_p3), %s930_s21, 3  ;;  %p339_p5 = scmp.lt.s32.totalorder (!%p263_p3), %s930_s21, 1 }
   0x7   : > { %266 = sbr.rel (%p263_p3) target bundleno = 285 (0x11d), region = 36  ;;  %v844_v3 = vpack.c.bf16 (!%p263_p3), %v392_v1, %v391_v0  ;;  %v394_v4 = vld [vmem:[%s1101_s1 + $0x18] sm:$0xff] (!%p263_p3)  ;;  %p313_p4 = scmp.lt.s32.totalorder (!%p263_p3), %s768_s7, 15  ;;  %v395_v6 = vld [vmem:[%s1101_s1 + $0x20] sm:$0xff] (!%p263_p3)  ;;  %v396_v7 = vld [vmem:[%s1101_s1 + $0x28] sm:$0xff] (!%p263_p3) }
   0x8   : > { %v848_v5 = vpack.c.bf16 (!%p263_p3), %v394_v4, %v393_v2  ;;  %v852_v8 = vpack.c.bf16 (!%p263_p3), %v396_v7, %v395_v6  ;;  %v772_v9 = vld [vmem:[%s1102_s2] ss:$0 sm:$0xff] (!%p263_p3)  ;;  %v397_v10 = vld [vmem:[%s1101_s1 + $0x30] sm:$0xff] (!%p263_p3)  ;;  %v398_v11 = vld [vmem:[%s1101_s1 + $0x38] sm:$0xff] (!%p263_p3) }
   0x9   : > { %845 = vmatprep.subr.bf16.mxu0 (!%p263_p3), %v844_v3  ;;  %876 = vmatprep.subr.bf16.mxu1 (!%p263_p3), %v844_v3  ;;  %v1037_v13 = vld [vmem:[%s1103_s3] ss:$0 sm:$0xff] (!%p263_p3)  ;;  %v856_v16 = vpack.c.bf16 (!%p263_p3), %v398_v11, %v397_v10  ;;  %v400_v19 = vld [vmem:[%s1101_s1 + $0x48] sm:$0xff] (!%p263_p3)  ;;  %v401_v25 = vld [vmem:[%s1101_s1 + $0x50] sm:$0xff] (!%p263_p3) }
   0xa   : > { %847 = vmatpush3.bf16.msra.mxu0 (!%p263_p3), %v844_v3  ;;  %884 = vmatpush3.bf16.msra.mxu1 (!%p263_p3), %v844_v3  ;;  %v399_v18 = vld [vmem:[%s1101_s1 + $0x40] sm:$0xff] (!%p263_p3)  ;;  %v402_v26 = vld [vmem:[%s1101_s1 + $0x58] sm:$0xff] (!%p263_p3)  ;;  %v404_v29 = vld [vmem:[%s1101_s1 + $0x68] sm:$0xff] (!%p263_p3) }
   0xb   : > { %849 = vmatprep.subr.bf16.mxu0 (!%p263_p3), %v848_v5  ;;  %877 = vmatprep.subr.bf16.mxu1 (!%p263_p3), %v848_v5  ;;  %v860_v23 = vpack.c.bf16 (!%p263_p3), %v400_v19, %v399_v18  ;;  %v864_v27 = vpack.c.bf16 (!%p263_p3), %v402_v26, %v401_v25  ;;  %v403_v28 = vld [vmem:[%s1101_s1 + $0x60] sm:$0xff] (!%p263_p3)  ;;  %v405_v35 = vld [vmem:[%s1101_s1 + $0x70] sm:$0xff] (!%p263_p3)  ;;  %v406_v36 = vld [vmem:[%s1101_s1 + $0x78] sm:$0xff] (!%p263_p3) }
   0xc   : > { %v868_v32 = vpack.c.bf16 (!%p263_p3), %v404_v29, %v403_v28  ;;  %v872_v43 = vpack.c.bf16 (!%p263_p3), %v406_v36, %v405_v35 }
   0xe   : > { %s1112_s7 = smov (!%p313_p4, %s768_s7), 15  ;;  %851 = vmatpush3.bf16.msra.mxu0 %v848_v5  ;;  %885 = vmatpush3.bf16.msra.mxu1 %v848_v5  ;;  %s1114_s21 = smov (!%p339_p5, %s930_s21), 1 }
   0xf   : > { %s769_s14 = sshll.u32 %s1112_s7, 3  ;;  %853 = vmatprep.subr.bf16.mxu0 %v852_v8  ;;  %878 = vmatprep.subr.bf16.mxu1 %v852_v8  ;;  %s341_s8 = scalar_lea.vmem %s1105_s5, %s1114_s21 }
  0x10   : > { %s1031_s27 = scalar_lea.vmem %s1100_s0, %s769_s14  ;;  %s337_s30 = scalar_lea.vmem %s1104_s4, %s769_s14 }
  0x11   : > { %v345_v12 = vld [vmem:[%s1031_s27] sm:$0xff]  ;;  %v346_v30 = vld [vmem:[%s1031_s27 + $0x8] sm:$0xff]  ;;  %v347_v33 = vld [vmem:[%s1031_s27 + $0x10] sm:$0xff]  ;;  %s344_s11 = scalar_lea.vmem %s1106_s6, %s1114_s21 }
  0x12   : > { %v360_v14 = vmul.f32 %v772_v9, %v345_v12  ;;  %v349_v15 = vld [vmem:[%s1031_s27 + $0x20] sm:$0xff]  ;;  %855 = vmatpush3.bf16.msra.mxu0 %v852_v8  ;;  %886 = vmatpush3.bf16.msra.mxu1 %v852_v8  ;;  %v350_v31 = vld [vmem:[%s1031_s27 + $0x28] sm:$0xff]  ;;  %v351_v34 = vld [vmem:[%s1031_s27 + $0x30] sm:$0xff]  ;;  %v361_v37 = vmul.f32 %v772_v9, %v346_v30  ;;  %v362_v39 = vmul.f32 %v772_v9, %v347_v33 }
  0x13   : > { %v364_v17 = vmul.f32 %v772_v9, %v349_v15  ;;  %857 = vmatprep.subr.bf16.mxu0 %v856_v16  ;;  %879 = vmatprep.subr.bf16.mxu1 %v856_v16  ;;  %v365_v38 = vmul.f32 %v772_v9, %v350_v31  ;;  %v348_v40 = vld [vmem:[%s1031_s27 + $0x18] sm:$0xff]  ;;  %v366_v41 = vmul.f32 %v772_v9, %v351_v34 }
  0x14   : > { %v375_v20 = vadd.f32 %v1037_v13, %v360_v14  ;;  %v352_v42 = vld [vmem:[%s1031_s27 + $0x38] sm:$0xff]  ;;  %v376_v44 = vadd.f32 %v1037_v13, %v361_v37  ;;  %v363_v45 = vmul.f32 %v772_v9, %v348_v40  ;;  %v377_v48 = vadd.f32 %v1037_v13, %v362_v39 }
  0x15   : > { %v379_v21 = vadd.f32 %v1037_v13, %v364_v17  ;;  %v380_v46 = vadd.f32 %v1037_v13, %v365_v38  ;;  %v367_v47 = vmul.f32 %v772_v9, %v352_v42  ;;  %v381_v49 = vadd.f32 %v1037_v13, %v366_v41 }
  0x16   : > { %v383_v22 = vmax.f32 %v375_v20, 0.0  ;;  %859 = vmatpush3.bf16.msra.mxu0 %v856_v16  ;;  %887 = vmatpush3.bf16.msra.mxu1 %v856_v16  ;;  %v384_v50 = vmax.f32 %v376_v44, 0.0  ;;  %v378_v51 = vadd.f32 %v1037_v13, %v363_v45  ;;  %v385_v54 = vmax.f32 %v377_v48, 0.0 }
  0x17   : > { %v387_v24 = vmax.f32 %v379_v21, 0.0  ;;  %861 = vmatprep.subr.bf16.mxu0 %v860_v23  ;;  %880 = vmatprep.subr.bf16.mxu1 %v860_v23  ;;  %v388_v52 = vmax.f32 %v380_v46, 0.0  ;;  %v382_v53 = vadd.f32 %v1037_v13, %v367_v47  ;;  %v389_v55 = vmax.f32 %v381_v49, 0.0 }
  0x18   : > { %832 = vmatprep.mubr.f32.mxu0 %v383_v22  ;;  %v386_v56 = vmax.f32 %v378_v51, 0.0 }
  0x19   : > { %838 = vmatprep.mubr.f32.mxu1 %v387_v24  ;;  %v390_v57 = vmax.f32 %v382_v53, 0.0 }
  0x1a   : > { %863 = vmatpush3.bf16.msra.mxu0 %v860_v23  ;;  %888 = vmatpush3.bf16.msra.mxu1 %v860_v23 }
  0x1b   : > { %865 = vmatprep.subr.bf16.mxu0 %v864_v27  ;;  %881 = vmatprep.subr.bf16.mxu1 %v864_v27 }
  0x1e   : > { %867 = vmatpush3.bf16.msra.mxu0 %v864_v27  ;;  %889 = vmatpush3.bf16.msra.mxu1 %v864_v27 }
  0x1f   : > { %869 = vmatprep.subr.bf16.mxu0 %v868_v32  ;;  %882 = vmatprep.subr.bf16.mxu1 %v868_v32 }
  0x22   : > { %871 = vmatpush3.bf16.msra.mxu0 %v868_v32  ;;  %890 = vmatpush3.bf16.msra.mxu1 %v868_v32 }
  0x23   : > { %873 = vmatprep.subr.bf16.mxu0 %v872_v43  ;;  %883 = vmatprep.subr.bf16.mxu1 %v872_v43 }
  0x26   : > { %875 = vmatpush3.bf16.msra.mxu0 %v872_v43  ;;  %891 = vmatpush3.bf16.msra.mxu1 %v872_v43 }
  0x29   : > { %833 = vmatmul.mubr.f32.vlgmr.msra.gmra.mrb[0].mxu0 %v384_v50  ;;  %839 = vmatmul.mubr.f32.vlgmr.msra.gmra.mrb[0].mxu1 %v388_v52 }
  0x2a   : > { %835 = vmatprep.mubr.f32.mxu0 %v385_v54  ;;  %841 = vmatprep.mubr.f32.mxu1 %v389_v55 }
  0x2d   : > { %836 = vmatmul.mubr.f32.gmra.mrb[2].mxu0 %v386_v56  ;;  %842 = vmatmul.mubr.f32.gmra.mrb[2].mxu1 %v390_v57 }
  0xfc   : > { %v834_v58 = vpop.f32.mrb[0].mxu0  ;;  %v840_v59 = vpop.f32.mrb[0].mxu1 }
  0xfd   : > { %560 = vst [vmem:[%s337_s30 + $0x8] sm:$0xff] %v834_v58  ;;  %v582_v60 = vmul.f32 %v834_v58, %v834_v58  ;;  %v473_v61 = vpop.f32.mrb[1].mxu0  ;;  %564 = vst [vmem:[%s337_s30 + $0x28] sm:$0xff] %v840_v59  ;;  %v493_v62 = vpop.f32.mrb[1].mxu1  ;;  %v586_v14 = vmul.f32 %v840_v59, %v840_v59 }
  0xfe   : > { %559 = vst [vmem:[%s337_s30] sm:$0xff] %v473_v61  ;;  %v567_v63 = vadd.f32 %v834_v58, %v473_v61  ;;  %v581_v0 = vmul.f32 %v473_v61, %v473_v61  ;;  %563 = vst [vmem:[%s337_s30 + $0x20] sm:$0xff] %v493_v62  ;;  %v585_v11 = vmul.f32 %v493_v62, %v493_v62 }
 0x100   : > { %v589_v1 = vadd.f32 %v582_v60, %v581_v0  ;;  %v837_v2 = vpop.f32.mrb[2].mxu0  ;;  %v843_v3 = vpop.f32.mrb[2].mxu1 }
 0x101   : > { %562 = vst [vmem:[%s337_s30 + $0x18] sm:$0xff] %v837_v2  ;;  %v483_v4 = vpop.f32.mrb[3].mxu0  ;;  %566 = vst [vmem:[%s337_s30 + $0x38] sm:$0xff] %v843_v3  ;;  %v503_v5 = vpop.f32.mrb[3].mxu1  ;;  %v584_v8 = vmul.f32 %v837_v2, %v837_v2  ;;  %v588_v20 = vmul.f32 %v843_v3, %v843_v3 }
 0x102   : > { %561 = vst [vmem:[%s337_s30 + $0x10] sm:$0xff] %v483_v4  ;;  %v568_v6 = vadd.f32 %v567_v63, %v483_v4  ;;  %v583_v7 = vmul.f32 %v483_v4, %v483_v4  ;;  %565 = vst [vmem:[%s337_s30 + $0x30] sm:$0xff] %v503_v5  ;;  %v587_v17 = vmul.f32 %v503_v5, %v503_v5 }
 0x104   : > { %v569_v9 = vadd.f32 %v837_v2, %v568_v6  ;;  %v590_v10 = vadd.f32 %v589_v1, %v583_v7 }
 0x106   : > { %v591_v12 = vadd.f32 %v590_v10, %v584_v8  ;;  %v570_v13 = vadd.f32 %v569_v9, %v493_v62 }
 0x108   : > { %v592_v15 = vadd.f32 %v591_v12, %v585_v11  ;;  %v571_v16 = vadd.f32 %v840_v59, %v570_v13 }
 0x10a   : > { %v572_v18 = vadd.f32 %v571_v16, %v503_v5  ;;  %v593_v19 = vadd.f32 %v592_v15, %v586_v14 }
 0x10c   : > { %v573_v21 = vadd.f32 %v843_v3, %v572_v18  ;;  %v594_v22 = vadd.f32 %v593_v19, %v587_v17 }
 0x10e   : > { %v574_v23 = vrot.slane %v573_v21, 4  ;;  %v595_v24 = vadd.f32 %v594_v22, %v588_v20 }
 0x110   : > { %v575_v25 = vadd.f32 %v574_v23, %v573_v21  ;;  %v596_v26 = vrot.slane %v595_v24, 4 }
 0x112   : > { %v576_v27 = vrot.slane %v575_v25, 2  ;;  %v597_v28 = vadd.f32 %v596_v26, %v595_v24 }
 0x114   : > { %v577_v29 = vadd.f32 %v576_v27, %v575_v25  ;;  %v598_v30 = vrot.slane %v597_v28, 2 }
 0x116   : > { %v578_v31 = vrot.slane %v577_v29, 1  ;;  %v599_v32 = vadd.f32 %v598_v30, %v597_v28 }
 0x118   : > { %v579_v33 = vadd.f32 %v578_v31, %v577_v29  ;;  %v600_v34 = vrot.slane %v599_v32, 1 }
 0x11a   : > { %580 = vst [vmem:[%s341_s8] sm:$0x1] %v579_v33  ;;  %v601_v35 = vadd.f32 %v600_v34, %v599_v32 }
 0x11c   : > { %602 = vst [vmem:[%s344_s11] sm:$0x1] %v601_v35 }
 0x11d PF: > { %s17_s23 = sadd.s32 1, %s938_s23   ;;  %s1107_s21 = smov %s934_s22 }
 0x11e   : > { %p14_p6 = scmp.ge.s32.totalorder %s17_s23, 4   ;;  %s1108_s22 = smov %s1110_s24 }
 0x120   :  { %16 = sbr.rel (!%p14_p6) target bundleno = 2 (0x2), region = 107 }

// kernel: bottleneck_forward.8
= control target key start
LH: loop header
LB: loop body
LE: loop exit
PB: predicated region body
PF: predicated region fallthrough
CT: control target
= control target key end

     0   :  { %s869_s15 = smov 0   ;;  %s871_s16 = smov 0   ;;  %s1000_s0 = inlined_call_operand.vmem [shape: f32[16,2,8,128], index: 0, kind: input, shape index: {}]   ;;  %s1001_s1 = inlined_call_operand.vmem [shape: f32[128,128], index: 1, kind: input, shape index: {}]   ;;  %s1002_s2 = inlined_call_operand.vmem [shape: f32[128,128], index: 2, kind: output, shape index: {0}]   ;;  %s1003_s3 = inlined_call_operand.vmem [shape: f32[2,1,128], index: 3, kind: output, shape index: {1}]   ;;  %s1004_s4 = inlined_call_operand.vmem [shape: f32[2,1,128], index: 4, kind: output, shape index: {2}]  }
   0x1   :  { %s873_s17 = smov 0   ;;  %s875_s18 = smov 0  }
   0x2   :  { %s877_s19 = smov 0  }
   0x3 LB: > { %s27_s20 = sadd.s32 1, %s838_s18  ;;  %p43_p1 = scmp.ne.s32.totalorder %s830_s16, %s826_s15  ;;  %s842_s19 = sphi %s877_s19, %s15_s19   ;;  %s838_s18 = sphi %s875_s18, %s1008_s18   ;;  %s834_s17 = sphi %s873_s17, %s1007_s17   ;;  %s830_s16 = sphi %s871_s16, %s1006_s16   ;;  %s826_s15 = sphi %s869_s15, %s1005_s15  }
   0x4   : > { %p29_p0 = scmp.ge.s32.totalorder %s27_s20, 2  ;;  %p44_p2 = scmp.eq.s32.totalorder %s842_s19, 0 }
   0x5   : > { %s36_s22 = sadd.s32 1, %s830_s16  ;;  %p635_p5 = scmp.ge.s32.totalorder %s842_s19, 2 }
   0x6   : > { %s1010_s20 = smov (%p29_p0, %s27_s20), 0  ;;  %p45_p3 = por %p44_p2, %p43_p1 }
   0x7   : > { %s33_s21 = ssub.s32 %s838_s18, %s1010_s20  ;;  %177 = sbr.rel (%p635_p5) target bundleno = 22 (0x16), region = 20 }
   0x8   : > { %p34_p4 = scmp.eq.s32.totalorder %s33_s21, 0 }
   0xa   : > { %s904_s23 = scalar_select %p34_p4, %s830_s16, %s36_s22  }
   0xe   : > { %180 = sbr.rel (!%p45_p3) target bundleno = 22 (0x16), region = 24  ;;  %s182_s24 = sand.u32 (%p45_p3), 1, %s830_s16  }
   0xf   : > { %s647_s25 = sshll.u32 (%p45_p3), %s838_s18, 7  ;;  %s636_s26 = sshll.u32 (%p45_p3), %s182_s24, 6 }
  0x10   : > { %s189_s29 = scalar_lea.vmem (%p45_p3), %s1000_s0, %s647_s25  ;;  %s184_s30 = scalar_lea.vmem (%p45_p3), [#allocation3], %s636_s26 }
  0x11   : > { %v231_v0 = vld [vmem:[%s189_s29] sm:$0xff] (%p45_p3)  ;;  %v233_v1 = vld [vmem:[%s189_s29 + $0x10] sm:$0xff] (%p45_p3) }
  0x12   : > { %v235_v2 = vld [vmem:[%s189_s29 + $0x20] sm:$0xff] (%p45_p3)  ;;  %232 = vst [vmem:[%s184_s30] sm:$0xff] (%p45_p3), %v231_v0  ;;  %234 = vst [vmem:[%s184_s30 + $0x8] sm:$0xff] (%p45_p3), %v233_v1  ;;  %v237_v3 = vld [vmem:[%s189_s29 + $0x30] sm:$0xff] (%p45_p3) }
  0x13   : > { %236 = vst [vmem:[%s184_s30 + $0x10] sm:$0xff] (%p45_p3), %v235_v2  ;;  %v239_v4 = vld [vmem:[%s189_s29 + $0x40] sm:$0xff] (%p45_p3)  ;;  %v241_v5 = vld [vmem:[%s189_s29 + $0x50] sm:$0xff] (%p45_p3)  ;;  %238 = vst [vmem:[%s184_s30 + $0x18] sm:$0xff] (%p45_p3), %v237_v3 }
  0x14   : > { %240 = vst [vmem:[%s184_s30 + $0x20] sm:$0xff] (%p45_p3), %v239_v4  ;;  %242 = vst [vmem:[%s184_s30 + $0x28] sm:$0xff] (%p45_p3), %v241_v5  ;;  %v243_v6 = vld [vmem:[%s189_s29 + $0x60] sm:$0xff] (%p45_p3)  ;;  %v245_v7 = vld [vmem:[%s189_s29 + $0x70] sm:$0xff] (%p45_p3) }
  0x15   : > { %244 = vst [vmem:[%s184_s30 + $0x30] sm:$0xff] %v243_v6  ;;  %246 = vst [vmem:[%s184_s30 + $0x38] sm:$0xff] %v245_v7 }
  0x16 PF: > { %p640_p6 = scmp.ge.s32.totalorder %s842_s19, 1  ;;  %p251_p7 = scmp.lt.s32.totalorder %s842_s19, 3 }
  0x18   : > { %p252_p8 = pnand %p640_p6, %p251_p7 }
  0x19   : > { %v320_v8 = vld [vmem:[%s1001_s1] sm:$0xff] (!%p252_p8)  ;;  %v321_v9 = vld [vmem:[%s1001_s1 + $0x8] sm:$0xff] (!%p252_p8)  ;;  %v322_v10 = vld [vmem:[%s1001_s1 + $0x10] sm:$0xff] (!%p252_p8)  ;;  %s258_s11 = sand.u32 (!%p252_p8), 1, %s826_s15   ;;  %s642_s27 = sshll.u32 (!%p252_p8), %s834_s17, 3 }
  0x1a   : > { %255 = sbr.rel (%p252_p8) target bundleno = 304 (0x130), region = 62  ;;  %v716_v11 = vpack.c.bf16 (!%p252_p8), %v321_v9, %v320_v8  ;;  %v323_v12 = vld [vmem:[%s1001_s1 + $0x18] sm:$0xff] (!%p252_p8)  ;;  %s641_s14 = sshll.u32 (!%p252_p8), %s258_s11, 6  ;;  %v324_v14 = vld [vmem:[%s1001_s1 + $0x20] sm:$0xff] (!%p252_p8)  ;;  %v325_v15 = vld [vmem:[%s1001_s1 + $0x28] sm:$0xff] (!%p252_p8) }
  0x1b   : > { %v720_v13 = vpack.c.bf16 (!%p252_p8), %v323_v12, %v322_v10  ;;  %v724_v16 = vpack.c.bf16 (!%p252_p8), %v325_v15, %v324_v14  ;;  %s933_s15 = scalar_lea.vmem (!%p252_p8), [#allocation3], %s641_s14  ;;  %v326_v18 = vld [vmem:[%s1001_s1 + $0x30] sm:$0xff] (!%p252_p8)  ;;  %v327_v19 = vld [vmem:[%s1001_s1 + $0x38] sm:$0xff] (!%p252_p8)  ;;  %v328_v22 = vld [vmem:[%s1001_s1 + $0x40] sm:$0xff] (!%p252_p8)  ;;  %p296_p9 = scmp.lt.s32.totalorder (!%p252_p8), %s642_s27, 15 }
  0x1c   : > { %717 = vmatprep.subr.bf16.mxu0 (!%p252_p8), %v716_v11  ;;  %748 = vmatprep.subr.bf16.mxu1 (!%p252_p8), %v716_v11  ;;  %v312_v17 = vld [vmem:[%s933_s15] sm:$0xff] (!%p252_p8)  ;;  %v728_v21 = vpack.c.bf16 (!%p252_p8), %v327_v19, %v326_v18  ;;  %v329_v23 = vld [vmem:[%s1001_s1 + $0x48] sm:$0xff] (!%p252_p8)  ;;  %v330_v25 = vld [vmem:[%s1001_s1 + $0x50] sm:$0xff] (!%p252_p8)  ;;  %p303_p10 = scmp.lt.s32.totalorder (!%p252_p8), %s834_s17, 1 }
  0x1d   : > { %719 = vmatpush3.bf16.msra.mxu0 (!%p252_p8), %v716_v11  ;;  %756 = vmatpush3.bf16.msra.mxu1 (!%p252_p8), %v716_v11  ;;  %v316_v20 = vld [vmem:[%s933_s15 + $0x20] sm:$0xff] (!%p252_p8)  ;;  %v732_v24 = vpack.c.bf16 (!%p252_p8), %v329_v23, %v328_v22  ;;  %v331_v26 = vld [vmem:[%s1001_s1 + $0x58] sm:$0xff] (!%p252_p8)  ;;  %v333_v29 = vld [vmem:[%s1001_s1 + $0x68] sm:$0xff] (!%p252_p8) }
  0x1e   : > { %721 = vmatprep.subr.bf16.mxu0 (!%p252_p8), %v720_v13  ;;  %749 = vmatprep.subr.bf16.mxu1 (!%p252_p8), %v720_v13  ;;  %v736_v27 = vpack.c.bf16 (!%p252_p8), %v331_v26, %v330_v25  ;;  %v332_v28 = vld [vmem:[%s1001_s1 + $0x60] sm:$0xff] (!%p252_p8)  ;;  %v334_v31 = vld [vmem:[%s1001_s1 + $0x70] sm:$0xff] (!%p252_p8)  ;;  %v335_v32 = vld [vmem:[%s1001_s1 + $0x78] sm:$0xff] (!%p252_p8) }
  0x1f   : > { %704 = vmatprep.mubr.f32.mxu0 (!%p252_p8), %v312_v17  ;;  %710 = vmatprep.mubr.f32.mxu1 (!%p252_p8), %v316_v20  ;;  %v740_v30 = vpack.c.bf16 (!%p252_p8), %v333_v29, %v332_v28  ;;  %v744_v33 = vpack.c.bf16 (!%p252_p8), %v335_v32, %v334_v31  ;;  %v313_v34 = vld [vmem:[%s933_s15 + $0x8] sm:$0xff] (!%p252_p8)  ;;  %v314_v36 = vld [vmem:[%s933_s15 + $0x10] sm:$0xff] (!%p252_p8)  ;;  %v315_v38 = vld [vmem:[%s933_s15 + $0x18] sm:$0xff] (!%p252_p8) }
  0x20   : > { %v317_v35 = vld [vmem:[%s933_s15 + $0x28] sm:$0xff] (!%p252_p8)  ;;  %v318_v37 = vld [vmem:[%s933_s15 + $0x30] sm:$0xff] (!%p252_p8)  ;;  %v319_v39 = vld [vmem:[%s933_s15 + $0x38] sm:$0xff] (!%p252_p8) }
  0x21   : > { %723 = vmatpush3.bf16.msra.mxu0 %v720_v13  ;;  %757 = vmatpush3.bf16.msra.mxu1 %v720_v13  ;;  %s1012_s27 = smov (!%p296_p9, %s642_s27), 15  ;;  %s1014_s17 = smov (!%p303_p10, %s834_s17), 1 }
  0x22   : > { %725 = vmatprep.subr.bf16.mxu0 %v724_v16  ;;  %750 = vmatprep.subr.bf16.mxu1 %v724_v16  ;;  %s643_s28 = sshll.u32 %s1012_s27, 3  ;;  %s305_s7 = scalar_lea.vmem %s1003_s3, %s1014_s17 }
  0x23   : > { %s299_s5 = scalar_lea.vmem %s1002_s2, %s643_s28  ;;  %s310_s10 = scalar_lea.vmem %s1004_s4, %s1014_s17 }
  0x25   : > { %727 = vmatpush3.bf16.msra.mxu0 %v724_v16  ;;  %758 = vmatpush3.bf16.msra.mxu1 %v724_v16 }
  0x26   : > { %729 = vmatprep.subr.bf16.mxu0 %v728_v21  ;;  %751 = vmatprep.subr.bf16.mxu1 %v728_v21 }
  0x29   : > { %731 = vmatpush3.bf16.msra.mxu0 %v728_v21  ;;  %759 = vmatpush3.bf16.msra.mxu1 %v728_v21 }
  0x2a   : > { %733 = vmatprep.subr.bf16.mxu0 %v732_v24  ;;  %752 = vmatprep.subr.bf16.mxu1 %v732_v24 }
  0x2d   : > { %735 = vmatpush3.bf16.msra.mxu0 %v732_v24  ;;  %760 = vmatpush3.bf16.msra.mxu1 %v732_v24 }
  0x2e   : > { %737 = vmatprep.subr.bf16.mxu0 %v736_v27  ;;  %753 = vmatprep.subr.bf16.mxu1 %v736_v27 }
  0x31   : > { %739 = vmatpush3.bf16.msra.mxu0 %v736_v27  ;;  %761 = vmatpush3.bf16.msra.mxu1 %v736_v27 }
  0x32   : > { %741 = vmatprep.subr.bf16.mxu0 %v740_v30  ;;  %754 = vmatprep.subr.bf16.mxu1 %v740_v30 }
  0x35   : > { %743 = vmatpush3.bf16.msra.mxu0 %v740_v30  ;;  %762 = vmatpush3.bf16.msra.mxu1 %v740_v30 }
  0x36   : > { %745 = vmatprep.subr.bf16.mxu0 %v744_v33  ;;  %755 = vmatprep.subr.bf16.mxu1 %v744_v33 }
  0x39   : > { %747 = vmatpush3.bf16.msra.mxu0 %v744_v33  ;;  %763 = vmatpush3.bf16.msra.mxu1 %v744_v33 }
  0x3c   : > { %705 = vmatmul.mubr.f32.vlgmr.msra.gmra.mrb[0].mxu0 %v313_v34  ;;  %711 = vmatmul.mubr.f32.vlgmr.msra.gmra.mrb[0].mxu1 %v317_v35 }
  0x3d   : > { %707 = vmatprep.mubr.f32.mxu0 %v314_v36  ;;  %713 = vmatprep.mubr.f32.mxu1 %v318_v37 }
  0x40   : > { %708 = vmatmul.mubr.f32.gmra.mrb[2].mxu0 %v315_v38  ;;  %714 = vmatmul.mubr.f32.gmra.mrb[2].mxu1 %v319_v39 }
 0x10f   : > { %v706_v40 = vpop.f32.mrb[0].mxu0  ;;  %v712_v41 = vpop.f32.mrb[0].mxu1 }
 0x110   : > { %458 = vst [vmem:[%s299_s5 + $0x8] sm:$0xff] %v706_v40  ;;  %v480_v42 = vmul.f32 %v706_v40, %v706_v40  ;;  %v402_v43 = vpop.f32.mrb[1].mxu0  ;;  %462 = vst [vmem:[%s299_s5 + $0x28] sm:$0xff] %v712_v41  ;;  %v422_v44 = vpop.f32.mrb[1].mxu1  ;;  %v484_v60 = vmul.f32 %v712_v41, %v712_v41 }
 0x111   : > { %457 = vst [vmem:[%s299_s5] sm:$0xff] %v402_v43  ;;  %v465_v45 = vadd.f32 %v706_v40, %v402_v43  ;;  %v479_v46 = vmul.f32 %v402_v43, %v402_v43  ;;  %461 = vst [vmem:[%s299_s5 + $0x20] sm:$0xff] %v422_v44  ;;  %v483_v57 = vmul.f32 %v422_v44, %v422_v44 }
 0x113   : > { %v487_v47 = vadd.f32 %v480_v42, %v479_v46  ;;  %v709_v48 = vpop.f32.mrb[2].mxu0  ;;  %v715_v49 = vpop.f32.mrb[2].mxu1 }
 0x114   : > { %460 = vst [vmem:[%s299_s5 + $0x18] sm:$0xff] %v709_v48  ;;  %v412_v50 = vpop.f32.mrb[3].mxu0  ;;  %464 = vst [vmem:[%s299_s5 + $0x38] sm:$0xff] %v715_v49  ;;  %v432_v51 = vpop.f32.mrb[3].mxu1  ;;  %v482_v54 = vmul.f32 %v709_v48, %v709_v48  ;;  %v486_v2 = vmul.f32 %v715_v49, %v715_v49 }
 0x115   : > { %459 = vst [vmem:[%s299_s5 + $0x10] sm:$0xff] %v412_v50  ;;  %v466_v52 = vadd.f32 %v465_v45, %v412_v50  ;;  %v481_v53 = vmul.f32 %v412_v50, %v412_v50  ;;  %463 = vst [vmem:[%s299_s5 + $0x30] sm:$0xff] %v432_v51  ;;  %v485_v63 = vmul.f32 %v432_v51, %v432_v51 }
 0x117   : > { %v467_v55 = vadd.f32 %v709_v48, %v466_v52  ;;  %v488_v56 = vadd.f32 %v487_v47, %v481_v53 }
 0x119   : > { %v489_v58 = vadd.f32 %v488_v56, %v482_v54  ;;  %v468_v59 = vadd.f32 %v467_v55, %v422_v44 }
 0x11b   : > { %v490_v61 = vadd.f32 %v489_v58, %v483_v57  ;;  %v469_v62 = vadd.f32 %v712_v41, %v468_v59 }
 0x11d   : > { %v470_v0 = vadd.f32 %v469_v62, %v432_v51  ;;  %v491_v1 = vadd.f32 %v490_v61, %v484_v60 }
 0x11f   : > { %v471_v3 = vadd.f32 %v715_v49, %v470_v0  ;;  %v492_v4 = vadd.f32 %v491_v1, %v485_v63 }
 0x121   : > { %v472_v5 = vrot.slane %v471_v3, 4  ;;  %v493_v6 = vadd.f32 %v492_v4, %v486_v2 }
 0x123   : > { %v473_v7 = vadd.f32 %v472_v5, %v471_v3  ;;  %v494_v8 = vrot.slane %v493_v6, 4 }
 0x125   : > { %v474_v9 = vrot.slane %v473_v7, 2  ;;  %v495_v10 = vadd.f32 %v494_v8, %v493_v6 }
 0x127   : > { %v475_v11 = vadd.f32 %v474_v9, %v473_v7  ;;  %v496_v12 = vrot.slane %v495_v10, 2 }
 0x129   : > { %v476_v13 = vrot.slane %v475_v11, 1  ;;  %v497_v14 = vadd.f32 %v496_v12, %v495_v10 }
 0x12b   : > { %v477_v15 = vadd.f32 %v476_v13, %v475_v11  ;;  %v498_v16 = vrot.slane %v497_v14, 1 }
 0x12d   : > { %478 = vst [vmem:[%s305_s7] sm:$0x1] %v477_v15  ;;  %v499_v17 = vadd.f32 %v498_v16, %v497_v14 }
 0x12f   : > { %500 = vst [vmem:[%s310_s10] sm:$0x1] %v499_v17 }
 0x130 PF: > { %s15_s19 = sadd.s32 1, %s842_s19   ;;  %s1005_s15 = smov %s830_s16 }
 0x131   : > { %p12_p11 = scmp.ge.s32.totalorder %s15_s19, 4   ;;  %s1006_s16 = smov %s904_s23 }
 0x132   : > { %s1007_s17 = smov %s838_s18  ;;  %s1008_s18 = smov %s1010_s20 }
 0x133   :  { %14 = sbr.rel (!%p12_p11) target bundleno = 3 (0x3), region = 125 }

// kernel: bottleneck_forward.9
= control target key start
LH: loop header
LB: loop body
LE: loop exit
PB: predicated region body
PF: predicated region fallthrough
CT: control target
= control target key end

     0   :  { %11 = vsyncpa [#allocation3], 0  ;;  %s809_s0 = inlined_call_operand.vmem [shape: f32[128,128], index: 0, kind: input, shape index: {}]   ;;  %s810_s1 = inlined_call_operand.vmem [shape: f32[1,128], index: 1, kind: input, shape index: {}]   ;;  %s811_s2 = inlined_call_operand.vmem [shape: f32[1,128], index: 2, kind: input, shape index: {}]   ;;  %s812_s3 = inlined_call_operand.vmem [shape: f32[128,128], index: 3, kind: input, shape index: {}]   ;;  %s813_s4 = inlined_call_operand.vmem [shape: f32[1,128], index: 4, kind: input, shape index: {}]   ;;  %s814_s5 = inlined_call_operand.vmem [shape: f32[1,128], index: 5, kind: input, shape index: {}]   ;;  %s815_s6 = inlined_call_operand.hbm [shape: f32[128,128], index: 6, kind: output, shape index: {}]  }
   0x1   :  { %13 = vsyncpa [#allocation3 + $0x1], 0  ;;  %s625_s21 = smov 0   ;;  %s627_s22 = smov 0  }
   0x2   :  { %s629_s23 = smov 0   ;;  %s631_s24 = smov 0  }
   0x3 LB: > { %s646_s25 = sadd.s32 4294967295, %s585_s24   ;;  %s463_s26 = sadd.s32 4294967294, %s585_s24   ;;  %s585_s24 = sphi %s631_s24, %s821_s24   ;;  %s581_s23 = sphi %s629_s23, %s820_s23   ;;  %s577_s22 = sphi %s627_s22, %s819_s22   ;;  %s573_s21 = sphi %s625_s21, %s818_s21  }
   0x4   : > { %s650_s27 = sadd.s32 1, %s585_s24   ;;  %s162_s28 = sadd.s32 1, %s581_s23 }
   0x5   : > { %s159_s29 = ssub.s32 %s585_s24, %s650_s27  ;;  %p172_p0 = scmp.ne.s32.totalorder %s581_s23, %s577_s22 }
   0x6   : > { %p160_p1 = scmp.eq.s32.totalorder %s159_s29, 0  ;;  %p173_p2 = scmp.eq.s32.totalorder %s646_s25, 1 }
   0x7   : > { %p178_p3 = scmp.ne.s32.totalorder %s577_s22, %s573_s21  ;;  %p179_p4 = scmp.eq.s32.totalorder %s463_s26, 1 }
   0x8   : > { %s661_s30 = scalar_select %p160_p1, %s581_s23, %s162_s28  }
   0x9   : > { %p663_p5 = por %p173_p2, %p172_p0  ;;  %p667_p6 = por %p179_p4, %p178_p3 }
   0xa   : > { %p466_p7 = scmp.ge.s32.totalorder %s585_s24, 1  ;;  %p227_p8 = scmp.lt.s32.totalorder %s585_s24, 3 }
   0xc   : > { %p228_p9 = pnand %p466_p7, %p227_p8 }
   0xd   : > { %s468_s9 = sshll.u32 (!%p228_p9), %s646_s25, 3  ;;  %v677_v0 = vld [vmem:[%s810_s1] ss:$0 sm:$0xff] (!%p228_p9)  ;;  %s259_s11 = sand.u32 (!%p228_p9), 1, %s577_s22  }
   0xe   : > { %231 = sbr.rel (%p228_p9) target bundleno = 57 (0x39), region = 44  ;;  %p263_p10 = scmp.lt.s32.totalorder (!%p228_p9), %s468_s9, 15  ;;  %v682_v1 = vld [vmem:[%s813_s4] ss:$0 sm:$0xff] (!%p228_p9) }
   0xf   : > { %v697_v2 = vld [vmem:[%s811_s2] ss:$0 sm:$0xff] (!%p228_p9)  ;;  %s481_s14 = sshll.u32 (!%p228_p9), %s646_s25, 10  ;;  %s768_s25 = scalar_lea.sflag (!%p228_p9), [#allocation3], %s259_s11 }
  0x10   : > { %v702_v3 = vld [vmem:[%s814_s5] ss:$0 sm:$0xff] (!%p228_p9)  ;;  %s587_s19 = smov (!%p228_p9), [#allocation2]  }
  0x15   : > { %s823_s9 = smov (!%p263_p10, %s468_s9), 15 }
  0x16   : > { %s469_s10 = sshll.u32 %s823_s9, 3 }
  0x17   : > { %s687_s17 = scalar_lea.vmem %s809_s0, %s469_s10  ;;  %s692_s20 = scalar_lea.vmem %s812_s3, %s469_s10 }
  0x18   : > { %v275_v4 = vld [vmem:[%s687_s17] sm:$0xff]  ;;  %v276_v6 = vld [vmem:[%s687_s17 + $0x8] sm:$0xff]  ;;  %v277_v11 = vld [vmem:[%s687_s17 + $0x10] sm:$0xff]  ;;  %s722_s10 = sshll.u32 %s259_s11, 6 }
  0x19   : > { %v313_v5 = vld [vmem:[%s692_s20] sm:$0xff]  ;;  %v290_v7 = vmul.f32 %v677_v0, %v275_v4  ;;  %v291_v9 = vmul.f32 %v677_v0, %v276_v6  ;;  %v314_v10 = vld [vmem:[%s692_s20 + $0x8] sm:$0xff]  ;;  %v315_v12 = vld [vmem:[%s692_s20 + $0x10] sm:$0xff]  ;;  %v292_v14 = vmul.f32 %v677_v0, %v277_v11  ;;  %s261_s12 = scalar_lea.vmem [#allocation2], %s722_s10 }
  0x1a   : > { %v328_v8 = vmul.f32 %v682_v1, %v313_v5  ;;  %v329_v13 = vmul.f32 %v682_v1, %v314_v10  ;;  %v330_v15 = vmul.f32 %v682_v1, %v315_v12  ;;  %v278_v16 = vld [vmem:[%s687_s17 + $0x18] sm:$0xff]  ;;  %v279_v18 = vld [vmem:[%s687_s17 + $0x20] sm:$0xff]  ;;  %v280_v24 = vld [vmem:[%s687_s17 + $0x28] sm:$0xff]  ;;  %s389_s13 = sshll.u32 %s261_s12, 4  ;;  %s759_s13 = int_to_ptr.vmem [resolvable:$true] %s389_s13 }
  0x1b   : > { %v316_v17 = vld [vmem:[%s692_s20 + $0x18] sm:$0xff]  ;;  %v305_v19 = vadd.f32 %v697_v2, %v290_v7  ;;  %v306_v21 = vadd.f32 %v697_v2, %v291_v9  ;;  %v293_v22 = vmul.f32 %v677_v0, %v278_v16  ;;  %v317_v23 = vld [vmem:[%s692_s20 + $0x20] sm:$0xff]  ;;  %v307_v26 = vadd.f32 %v697_v2, %v292_v14  ;;  %v318_v29 = vld [vmem:[%s692_s20 + $0x28] sm:$0xff]  ;;  %s523_s18 = scalar_lea.vmem %s759_s13, 1024 }
  0x1c   : > { %v343_v20 = vadd.f32 %v702_v3, %v328_v8  ;;  %v344_v25 = vadd.f32 %v702_v3, %v329_v13  ;;  %v345_v27 = vadd.f32 %v702_v3, %v330_v15  ;;  %v331_v28 = vmul.f32 %v682_v1, %v316_v17  ;;  %v281_v38 = vld [vmem:[%s687_s17 + $0x30] sm:$0xff]  ;;  %v282_v44 = vld [vmem:[%s687_s17 + $0x38] sm:$0xff]  ;;  %s764_s17 = scalar_lea.hbm %s815_s6, %s481_s14  ;;  %p524_p11 = scmp.ne.s32.totalorder %s759_s13, %s523_s18 }
  0x1d   : > { %v308_v31 = vadd.f32 %v697_v2, %v293_v22  ;;  %v294_v32 = vmul.f32 %v677_v0, %v279_v18  ;;  %v332_v33 = vmul.f32 %v682_v1, %v317_v23  ;;  %v295_v37 = vmul.f32 %v677_v0, %v280_v24  ;;  %v319_v39 = vld [vmem:[%s692_s20 + $0x30] sm:$0xff]  ;;  %v320_v45 = vld [vmem:[%s692_s20 + $0x38] sm:$0xff]  ;;  %s527_s20 = sshll.u32 %s587_s19, 4  ;;  %s528_s20 = int_to_ptr.vmem [resolvable:$false] %s527_s20 }
  0x1e   : > { %v351_v30 = vadd.f32 %v343_v20, %v305_v19  ;;  %v352_v34 = vadd.f32 %v344_v25, %v306_v21  ;;  %v353_v35 = vadd.f32 %v345_v27, %v307_v26  ;;  %v346_v36 = vadd.f32 %v702_v3, %v331_v28  ;;  %p525_p12 = pnand %p524_p11, %p663_p5  ;;  %s529_s26 = scalar_lea.vmem %s528_s20, 2048 }
  0x1f   : > { %v309_v41 = vadd.f32 %v697_v2, %v294_v32  ;;  %v347_v42 = vadd.f32 %v702_v3, %v332_v33  ;;  %v333_v43 = vmul.f32 %v682_v1, %v318_v29  ;;  %v310_v49 = vadd.f32 %v697_v2, %v295_v37  ;;  %p530_p0 = scmp.lt.s32.totalorder %s759_s13, %s528_s20  ;;  %p531_p1 = scmp.lt.s32.totalorder %s529_s26, %s523_s18 }
  0x20   : > { %v359_v40 = vmax.f32 %v351_v30, 0.0  ;;  %v360_v46 = vmax.f32 %v352_v34, 0.0  ;;  %v361_v47 = vmax.f32 %v353_v35, 0.0  ;;  %v354_v48 = vadd.f32 %v346_v36, %v308_v31  ;;  %p526_p13 = pneg %p525_p12 }
  0x21   : > { %v355_v50 = vadd.f32 %v347_v42, %v309_v41  ;;  %v348_v51 = vadd.f32 %v702_v3, %v333_v43  ;;  %v296_v52 = vmul.f32 %v677_v0, %v281_v38  ;;  %v334_v53 = vmul.f32 %v682_v1, %v319_v39  ;;  %p532_p2 = por %p531_p1, %p530_p0 }
  0x22   : > { %367 = vst [vmem:[%s261_s12] sm:$0xff] %v359_v40  ;;  %368 = vst [vmem:[%s261_s12 + $0x8] sm:$0xff] %v360_v46  ;;  %v362_v54 = vmax.f32 %v354_v48, 0.0  ;;  %v297_v55 = vmul.f32 %v677_v0, %v282_v44  ;;  %v335_v56 = vmul.f32 %v682_v1, %v320_v45 }
  0x23   : > { %369 = vst [vmem:[%s261_s12 + $0x10] sm:$0xff] %v361_v47  ;;  %v363_v57 = vmax.f32 %v355_v50, 0.0  ;;  %v356_v58 = vadd.f32 %v348_v51, %v310_v49  ;;  %v311_v59 = vadd.f32 %v697_v2, %v296_v52  ;;  %v349_v60 = vadd.f32 %v702_v3, %v334_v53  ;;  %p533_p3 = pnand %p532_p2, %p526_p13 }
  0x24   : > { %370 = vst [vmem:[%s261_s12 + $0x18] sm:$0xff] %v362_v54  ;;  %v312_v61 = vadd.f32 %v697_v2, %v297_v55  ;;  %v350_v62 = vadd.f32 %v702_v3, %v335_v56 }
  0x25   : > { %371 = vst [vmem:[%s261_s12 + $0x20] sm:$0xff] %v363_v57  ;;  %v364_v63 = vmax.f32 %v356_v58, 0.0  ;;  %v357_v0 = vadd.f32 %v349_v60, %v311_v59 }
  0x26   : > { %v358_v4 = vadd.f32 %v350_v62, %v312_v61 }
  0x27   : > { %372 = vst [vmem:[%s261_s12 + $0x28] sm:$0xff] %v364_v63  ;;  %v365_v1 = vmax.f32 %v357_v0, 0.0 }
  0x28   : > { %v366_v2 = vmax.f32 %v358_v4, 0.0 }
  0x29   : > { %373 = vst [vmem:[%s261_s12 + $0x30] sm:$0xff] %v365_v1 }
  0x2a   : > { %374 = vst [vmem:[%s261_s12 + $0x38] sm:$0xff] %v366_v2 }
  0x2b   : > { %536 = shalt.err (!%p533_p3)
}
  0x2c   : > { %s537_s28 = scalar_lea.hbm %s764_s17, 1024  ;;  %s541_s11 = scalar_lea.hbm %s815_s6, 2048 }
  0x2d   : > { %p538_p4 = scmp.ne.s32.totalorder %s764_s17, %s537_s28  ;;  %p542_p9 = scmp.lt.u32.totalorder %s764_s17, %s815_s6 }
  0x2e   : > { %p543_p10 = scmp.lt.u32.totalorder %s541_s11, %s537_s28  ;;  %p545_p12 = scmp.lt.u32.totalorder %s537_s28, %s764_s17 }
  0x2f   : > { %p539_p7 = pnand %p538_p4, %p663_p5 }
  0x30   : > { %p544_p11 = por %p543_p10, %p542_p9 }
  0x31   : > { %p540_p8 = pneg %p539_p7 }
  0x32   : > { %p546_p13 = por %p545_p12, %p544_p11 }
  0x34   : > { %p547_p0 = pnand %p546_p13, %p540_p8 }
  0x36   : > { %550 = shalt.err (!%p547_p0)
}
  0x37   : > { %s588_s14 = smov 128   ;;  %s589_s15 = smov 8  }
  0x38   : > { %482 = dma.vmem_to_hbm [thread:$0]  (%p663_p5), %s759_s13, 1024, %s764_s17, %s768_s25, %s588_s14, %s588_s14, %s589_s15  }
  0x39 PF: > { %p488_p1 = scmp.ge.s32.totalorder %s585_s24, 2  ;;  %s404_s16 = sand.u32 1, %s573_s21  }
  0x3a   : > { %s405_s18 = scalar_lea.sflag [#allocation3], %s404_s16 }
  0x3b   : > { %p485_p2 = pnand %p488_p1, %p667_p6 }
  0x3d   : > { %568 = dma.done.wait (!%p485_p2), %s405_s18, 1024  }
  0x3e   : > { %570 = vsyncadd (!%p485_p2), %s405_s18, 4294966272  ;;  %p16_p3 = scmp.ge.s32.totalorder %s650_s27, 4   ;;  %s818_s21 = smov %s577_s22 }
  0x3f   : > { %s819_s22 = smov %s581_s23  ;;  %s820_s23 = smov %s661_s30 }
  0x40   : > { %s821_s24 = smov %s650_s27  ;;  %18 = sbr.rel (!%p16_p3) target bundleno = 3 (0x3), region = 82 }
  0x47   :  { %410 = vsyncpa [#allocation3], 1 }
  0x48   :  { %412 = vsyncpa [#allocation3 + $0x1], 1 }

// kernel: bottleneck_forward.6
= control target key start
LH: loop header
LB: loop body
LE: loop exit
PB: predicated region body
PF: predicated region fallthrough
CT: control target
= control target key end

     0   :  { %s3994_s24 = smov 0   ;;  %s3996_s25 = smov 0   ;;  %s4861_s0 = inlined_call_operand.vmem [shape: f32[2,16,8,256], index: 0, kind: input, shape index: {}, may-alias: {0,1}]   ;;  %s4862_s1 = inlined_call_operand.vmem [shape: f32[2,16,8,256], index: 1, kind: input, shape index: {}, may-alias: {0,1}]   ;;  %s4863_s2 = inlined_call_operand.vmem [shape: f32[9,128,128], index: 2, kind: input, shape index: {}]   ;;  %s4864_s3 = inlined_call_operand.vmem [shape: f32[1,128], index: 3, kind: input, shape index: {}]   ;;  %s4865_s4 = inlined_call_operand.vmem [shape: f32[1,128], index: 4, kind: input, shape index: {}]   ;;  %s4866_s5 = inlined_call_operand.vmem [shape: f32[128,128], index: 5, kind: output, shape index: {0}]   ;;  %s4867_s6 = inlined_call_operand.vmem [shape: f32[2,1,128], index: 6, kind: output, shape index: {1}]   ;;  %s4868_s7 = inlined_call_operand.vmem [shape: f32[2,1,128], index: 7, kind: output, shape index: {2}]  }
   0x1   :  { %s3998_s26 = smov 0   ;;  %s4000_s27 = smov 0  }
   0x2   :  { %s4002_s28 = smov 0  }
   0x3 LB: > { %s30_s29 = sadd.s32 1, %s3947_s27  ;;  %p44_p1 = scmp.ne.s32.totalorder %s3939_s25, %s3935_s24  ;;  %s3951_s28 = sphi %s4002_s28, %s18_s28   ;;  %s3947_s27 = sphi %s4000_s27, %s4873_s27   ;;  %s3943_s26 = sphi %s3998_s26, %s4872_s26   ;;  %s3939_s25 = sphi %s3996_s25, %s4871_s25   ;;  %s3935_s24 = sphi %s3994_s24, %s4870_s24  }
   0x4   : > { %p32_p0 = scmp.ge.s32.totalorder %s30_s29, 2  ;;  %p45_p2 = scmp.eq.s32.totalorder %s3951_s28, 0 }
   0x5   : > { %s37_s9 = sadd.s32 1, %s3939_s25  ;;  %p2700_p5 = scmp.ge.s32.totalorder %s3951_s28, 2 }
   0x6   : > { %s4875_s29 = smov (%p32_p0, %s30_s29), 0  ;;  %p4025_p3 = por %p45_p2, %p44_p1 }
   0x7   : > { %s34_s8 = ssub.s32 %s3947_s27, %s4875_s29  ;;  %252 = sbr.rel (%p2700_p5) target bundleno = 38 (0x26), region = 28 }
   0x8   : > { %p35_p4 = scmp.eq.s32.totalorder %s34_s8, 0 }
   0xa   : > { %s4033_s10 = scalar_select %p35_p4, %s3939_s25, %s37_s9  }
   0xe   : > { %255 = sbr.rel (!%p4025_p3) target bundleno = 26 (0x1a), region = 32  ;;  %s257_s11 = sand.u32 (%p4025_p3), 1, %s3939_s25  }
   0xf   : > { %s2890_s12 = sshll.u32 (%p4025_p3), %s3947_s27, 8  ;;  %s2701_s13 = sshll.u32 (%p4025_p3), %s257_s11, 7 }
  0x10   : > { %s4043_s16 = scalar_lea.vmem (%p4025_p3), %s4861_s0, %s2890_s12  ;;  %s259_s17 = scalar_lea.vmem (%p4025_p3), [#allocation5], %s2701_s13 }
  0x11   : > { %v320_v0 = vld [vmem:[%s4043_s16] sm:$0xff] (%p4025_p3)  ;;  %v322_v1 = vld [vmem:[%s4043_s16 + $0x10] sm:$0xff] (%p4025_p3) }
  0x12   : > { %v324_v2 = vld [vmem:[%s4043_s16 + $0x20] sm:$0xff] (%p4025_p3)  ;;  %321 = vst [vmem:[%s259_s17] sm:$0xff] (%p4025_p3), %v320_v0  ;;  %323 = vst [vmem:[%s259_s17 + $0x8] sm:$0xff] (%p4025_p3), %v322_v1  ;;  %v326_v3 = vld [vmem:[%s4043_s16 + $0x30] sm:$0xff] (%p4025_p3) }
  0x13   : > { %325 = vst [vmem:[%s259_s17 + $0x10] sm:$0xff] (%p4025_p3), %v324_v2  ;;  %v328_v4 = vld [vmem:[%s4043_s16 + $0x40] sm:$0xff] (%p4025_p3)  ;;  %v330_v5 = vld [vmem:[%s4043_s16 + $0x50] sm:$0xff] (%p4025_p3)  ;;  %327 = vst [vmem:[%s259_s17 + $0x18] sm:$0xff] (%p4025_p3), %v326_v3 }
  0x14   : > { %329 = vst [vmem:[%s259_s17 + $0x20] sm:$0xff] (%p4025_p3), %v328_v4  ;;  %331 = vst [vmem:[%s259_s17 + $0x28] sm:$0xff] (%p4025_p3), %v330_v5  ;;  %v332_v6 = vld [vmem:[%s4043_s16 + $0x60] sm:$0xff] (%p4025_p3)  ;;  %v334_v7 = vld [vmem:[%s4043_s16 + $0x70] sm:$0xff] (%p4025_p3) }
  0x15   : > { %v336_v8 = vld [vmem:[%s4043_s16 + $0x80] sm:$0xff]  ;;  %333 = vst [vmem:[%s259_s17 + $0x30] sm:$0xff] %v332_v6  ;;  %335 = vst [vmem:[%s259_s17 + $0x38] sm:$0xff] %v334_v7  ;;  %v338_v9 = vld [vmem:[%s4043_s16 + $0x90] sm:$0xff] }
  0x16   : > { %337 = vst [vmem:[%s259_s17 + $0x40] sm:$0xff] %v336_v8  ;;  %v340_v10 = vld [vmem:[%s4043_s16 + $0xa0] sm:$0xff]  ;;  %v342_v11 = vld [vmem:[%s4043_s16 + $0xb0] sm:$0xff]  ;;  %339 = vst [vmem:[%s259_s17 + $0x48] sm:$0xff] %v338_v9 }
  0x17   : > { %341 = vst [vmem:[%s259_s17 + $0x50] sm:$0xff] %v340_v10  ;;  %343 = vst [vmem:[%s259_s17 + $0x58] sm:$0xff] %v342_v11  ;;  %v344_v12 = vld [vmem:[%s4043_s16 + $0xc0] sm:$0xff]  ;;  %v346_v13 = vld [vmem:[%s4043_s16 + $0xd0] sm:$0xff] }
  0x18   : > { %v348_v14 = vld [vmem:[%s4043_s16 + $0xe0] sm:$0xff]  ;;  %345 = vst [vmem:[%s259_s17 + $0x60] sm:$0xff] %v344_v12  ;;  %347 = vst [vmem:[%s259_s17 + $0x68] sm:$0xff] %v346_v13  ;;  %v350_v15 = vld [vmem:[%s4043_s16 + $0xf0] sm:$0xff] }
  0x19   : > { %349 = vst [vmem:[%s259_s17 + $0x70] sm:$0xff] %v348_v14  ;;  %351 = vst [vmem:[%s259_s17 + $0x78] sm:$0xff] %v350_v15 }
  0x1a PF: > { %357 = sbr.rel (!%p4025_p3) target bundleno = 38 (0x26), region = 70  ;;  %s359_s18 = sand.u32 (%p4025_p3), 1, %s3939_s25  }
  0x1b   : > { %s2891_s19 = sshll.u32 (%p4025_p3), %s3947_s27, 8  ;;  %s2704_s20 = sshll.u32 (%p4025_p3), %s359_s18, 7 }
  0x1c   : > { %s4068_s23 = scalar_lea.vmem (%p4025_p3), %s4862_s1, %s2891_s19  ;;  %s361_s30 = scalar_lea.vmem (%p4025_p3), [#allocation6], %s2704_s20 }
  0x1d   : > { %v2707_v16 = vld [vmem:[%s4068_s23 + $0x8] sm:$0xff] (%p4025_p3)  ;;  %v2708_v17 = vld [vmem:[%s4068_s23 + $0x18] sm:$0xff] (%p4025_p3) }
  0x1e   : > { %v2709_v18 = vld [vmem:[%s4068_s23 + $0x28] sm:$0xff] (%p4025_p3)  ;;  %424 = vst [vmem:[%s361_s30] sm:$0xff] (%p4025_p3), %v2707_v16  ;;  %426 = vst [vmem:[%s361_s30 + $0x8] sm:$0xff] (%p4025_p3), %v2708_v17  ;;  %v2710_v19 = vld [vmem:[%s4068_s23 + $0x38] sm:$0xff] (%p4025_p3) }
  0x1f   : > { %428 = vst [vmem:[%s361_s30 + $0x10] sm:$0xff] (%p4025_p3), %v2709_v18  ;;  %v2711_v20 = vld [vmem:[%s4068_s23 + $0x48] sm:$0xff] (%p4025_p3)  ;;  %v2712_v21 = vld [vmem:[%s4068_s23 + $0x58] sm:$0xff] (%p4025_p3)  ;;  %430 = vst [vmem:[%s361_s30 + $0x18] sm:$0xff] (%p4025_p3), %v2710_v19 }
  0x20   : > { %432 = vst [vmem:[%s361_s30 + $0x20] sm:$0xff] (%p4025_p3), %v2711_v20  ;;  %434 = vst [vmem:[%s361_s30 + $0x28] sm:$0xff] (%p4025_p3), %v2712_v21  ;;  %v2713_v22 = vld [vmem:[%s4068_s23 + $0x68] sm:$0xff] (%p4025_p3)  ;;  %v2714_v23 = vld [vmem:[%s4068_s23 + $0x78] sm:$0xff] (%p4025_p3) }
  0x21   : > { %v2715_v24 = vld [vmem:[%s4068_s23 + $0x88] sm:$0xff]  ;;  %436 = vst [vmem:[%s361_s30 + $0x30] sm:$0xff] %v2713_v22  ;;  %438 = vst [vmem:[%s361_s30 + $0x38] sm:$0xff] %v2714_v23  ;;  %v2716_v25 = vld [vmem:[%s4068_s23 + $0x98] sm:$0xff] }
  0x22   : > { %440 = vst [vmem:[%s361_s30 + $0x40] sm:$0xff] %v2715_v24  ;;  %v2717_v26 = vld [vmem:[%s4068_s23 + $0xa8] sm:$0xff]  ;;  %v2718_v27 = vld [vmem:[%s4068_s23 + $0xb8] sm:$0xff]  ;;  %442 = vst [vmem:[%s361_s30 + $0x48] sm:$0xff] %v2716_v25 }
  0x23   : > { %444 = vst [vmem:[%s361_s30 + $0x50] sm:$0xff] %v2717_v26  ;;  %446 = vst [vmem:[%s361_s30 + $0x58] sm:$0xff] %v2718_v27  ;;  %v2719_v28 = vld [vmem:[%s4068_s23 + $0xc8] sm:$0xff]  ;;  %v2720_v29 = vld [vmem:[%s4068_s23 + $0xd8] sm:$0xff] }
  0x24   : > { %v2721_v30 = vld [vmem:[%s4068_s23 + $0xe8] sm:$0xff]  ;;  %448 = vst [vmem:[%s361_s30 + $0x60] sm:$0xff] %v2719_v28  ;;  %450 = vst [vmem:[%s361_s30 + $0x68] sm:$0xff] %v2720_v29  ;;  %v2722_v31 = vld [vmem:[%s4068_s23 + $0xf8] sm:$0xff] }
  0x25   : > { %452 = vst [vmem:[%s361_s30 + $0x70] sm:$0xff] %v2721_v30  ;;  %454 = vst [vmem:[%s361_s30 + $0x78] sm:$0xff] %v2722_v31 }
  0x26 PF: > { %p2723_p6 = scmp.ge.s32.totalorder %s3951_s28, 1  ;;  %p459_p7 = scmp.lt.s32.totalorder %s3951_s28, 3 }
  0x28   : > { %p460_p8 = pnand %p2723_p6, %p459_p7 }
  0x29   : > { %v1066_v32 = vld [vmem:[%s4863_s2] sm:$0xff] (!%p460_p8)  ;;  %v1067_v33 = vld [vmem:[%s4863_s2 + $0x8] sm:$0xff] (!%p460_p8)  ;;  %v1068_v37 = vld [vmem:[%s4863_s2 + $0x10] sm:$0xff] (!%p460_p8)  ;;  %v3953_v39 = vmov (!%p460_p8), 0.0   ;;  %s466_s17 = sand.u32 (!%p460_p8), 1, %s3935_s24   ;;  %s2726_s12 = sshll.u32 (!%p460_p8), %s3943_s26, 3 }
  0x2a   : > { %463 = sbr.rel (%p460_p8) target bundleno = 451 (0x1c3), region = 108  ;;  %v2808_v34 = vld [vmem:[%s4863_s2 + $0x200] sm:$0xff] (!%p460_p8)  ;;  %v3504_v35 = vpack.c.bf16 (!%p460_p8), %v1067_v33, %v1066_v32  ;;  %v2809_v36 = vld [vmem:[%s4863_s2 + $0x208] sm:$0xff] (!%p460_p8)  ;;  %v1069_v38 = vld [vmem:[%s4863_s2 + $0x18] sm:$0xff] (!%p460_p8)  ;;  %537 = vst [vmem:[#allocation3] sm:$0x1] (!%p460_p8), %v3953_v39 }
  0x2b   : > { %594 = vst [vmem:[#allocation3 + $0x1] sm:$0xff] (!%p460_p8), %v3953_v39  ;;  %538 = vst [vmem:[#allocation3 + $0x10] sm:$0x1] (!%p460_p8), %v3953_v39  ;;  %v3632_v40 = vpack.c.bf16 (!%p460_p8), %v2809_v36, %v2808_v34  ;;  %v3508_v41 = vpack.c.bf16 (!%p460_p8), %v1069_v38, %v1068_v37  ;;  %v2810_v42 = vld [vmem:[%s4863_s2 + $0x210] sm:$0xff] (!%p460_p8)  ;;  %v2811_v43 = vld [vmem:[%s4863_s2 + $0x218] sm:$0xff] (!%p460_p8)  ;;  %s2724_s24 = sshll.u32 (!%p460_p8), %s466_s17, 7 }
  0x2c   : > { %539 = vst [vmem:[#allocation3 + $0x20] sm:$0x1] (!%p460_p8), %v3953_v39  ;;  %540 = vst [vmem:[#allocation3 + $0x30] sm:$0x1] (!%p460_p8), %v3953_v39  ;;  %v1070_v44 = vld [vmem:[%s4863_s2 + $0x20] sm:$0xff] (!%p460_p8)  ;;  %3505 = vmatprep.subr.bf16.mxu1 (!%p460_p8), %v3504_v35  ;;  %v3636_v45 = vpack.c.bf16 (!%p460_p8), %v2811_v43, %v2810_v42  ;;  %v1071_v46 = vld [vmem:[%s4863_s2 + $0x28] sm:$0xff] (!%p460_p8) }
  0x2d   : > { %541 = vst [vmem:[#allocation3 + $0x40] sm:$0x1] (!%p460_p8), %v3953_v39  ;;  %542 = vst [vmem:[#allocation3 + $0x50] sm:$0x1] (!%p460_p8), %v3953_v39  ;;  %v2812_v47 = vld [vmem:[%s4863_s2 + $0x220] sm:$0xff] (!%p460_p8)  ;;  %v2813_v48 = vld [vmem:[%s4863_s2 + $0x228] sm:$0xff] (!%p460_p8)  ;;  %3633 = vmatprep.subr.bf16.mxu0 (!%p460_p8), %v3632_v40  ;;  %3507 = vmatpush3.bf16.msra.mxu1 (!%p460_p8), %v3504_v35  ;;  %v3512_v49 = vpack.c.bf16 (!%p460_p8), %v1071_v46, %v1070_v44 }
  0x2e   : > { %543 = vst [vmem:[#allocation3 + $0x60] sm:$0x1] (!%p460_p8), %v3953_v39  ;;  %544 = vst [vmem:[#allocation3 + $0x70] sm:$0x1] (!%p460_p8), %v3953_v39  ;;  %3635 = vmatpush3.bf16.msra.mxu0 (!%p460_p8), %v3632_v40  ;;  %3509 = vmatprep.subr.bf16.mxu1 (!%p460_p8), %v3508_v41  ;;  %v3640_v50 = vpack.c.bf16 (!%p460_p8), %v2813_v48, %v2812_v47  ;;  %v1072_v51 = vld [vmem:[%s4863_s2 + $0x30] sm:$0xff] (!%p460_p8)  ;;  %v1073_v52 = vld [vmem:[%s4863_s2 + $0x38] sm:$0xff] (!%p460_p8) }
  0x2f   : > { %545 = vst [vmem:[#allocation3 + $0x80] sm:$0x1] (!%p460_p8), %v3953_v39  ;;  %546 = vst [vmem:[#allocation3 + $0x90] sm:$0x1] (!%p460_p8), %v3953_v39  ;;  %3637 = vmatprep.subr.bf16.mxu0 (!%p460_p8), %v3636_v45  ;;  %v2814_v53 = vld [vmem:[%s4863_s2 + $0x230] sm:$0xff] (!%p460_p8)  ;;  %v2815_v54 = vld [vmem:[%s4863_s2 + $0x238] sm:$0xff] (!%p460_p8)  ;;  %v3516_v55 = vpack.c.bf16 (!%p460_p8), %v1073_v52, %v1072_v51 }
  0x30   : > { %547 = vst [vmem:[#allocation3 + $0xa0] sm:$0x1] (!%p460_p8), %v3953_v39  ;;  %548 = vst [vmem:[#allocation3 + $0xb0] sm:$0x1] (!%p460_p8), %v3953_v39  ;;  %v3644_v56 = vpack.c.bf16 (!%p460_p8), %v2815_v54, %v2814_v53  ;;  %v1074_v57 = vld [vmem:[%s4863_s2 + $0x40] sm:$0xff] (!%p460_p8)  ;;  %v1075_v58 = vld [vmem:[%s4863_s2 + $0x48] sm:$0xff] (!%p460_p8) }
  0x31   : > { %549 = vst [vmem:[#allocation3 + $0xc0] sm:$0x1] %v3953_v39  ;;  %550 = vst [vmem:[#allocation3 + $0xd0] sm:$0x1] %v3953_v39  ;;  %3511 = vmatpush3.bf16.msra.mxu1 %v3508_v41  ;;  %v2816_v60 = vld [vmem:[%s4863_s2 + $0x240] sm:$0xff]  ;;  %v2817_v61 = vld [vmem:[%s4863_s2 + $0x248] sm:$0xff]  ;;  %v3520_v0 = vpack.c.bf16 %v1075_v58, %v1074_v57 }
  0x32   : > { %551 = vst [vmem:[#allocation3 + $0xe0] sm:$0x1] %v3953_v39  ;;  %552 = vst [vmem:[#allocation3 + $0xf0] sm:$0x1] %v3953_v39  ;;  %3639 = vmatpush3.bf16.msra.mxu0 %v3636_v45  ;;  %3513 = vmatprep.subr.bf16.mxu1 %v3512_v49  ;;  %v1058_v59 = vld [vmem:[#allocation3] sm:$0xff]  ;;  %s4172_s20 = scalar_lea.vmem [#allocation5], %s2724_s24  ;;  %v3648_v4 = vpack.c.bf16 %v2817_v61, %v2816_v60 }
  0x33   : > { %553 = vst [vmem:[#allocation3 + $0x100] sm:$0x1] %v3953_v39  ;;  %3641 = vmatprep.subr.bf16.mxu0 %v3640_v50  ;;  %3140 = vmatprep.mubr.f32.mxu1 %v1058_v59  ;;  %v4170_v62 = vld [vmem:[%s4864_s3] ss:$0 sm:$0xff]  ;;  %s4181_s23 = scalar_lea.vmem [#allocation6], %s2724_s24  ;;  %v1076_v5 = vld [vmem:[%s4863_s2 + $0x50] sm:$0xff] }
  0x34   : > { %v605_v63 = vld [vmem:[%s4172_s20] sm:$0xff]  ;;  %v2731_v3 = vld [vmem:[%s4181_s23 + $0x8] sm:$0xff]  ;;  %v1077_v6 = vld [vmem:[%s4863_s2 + $0x58] sm:$0xff]  ;;  %p519_p9 = scmp.lt.s32.totalorder %s2726_s12, 15  ;;  %p526_p10 = scmp.lt.s32.totalorder %s3943_s26, 1 }
  0x35   : > { %3515 = vmatpush3.bf16.msra.mxu1 %v3512_v49  ;;  %v4178_v1 = vld [vmem:[%s4865_s4] ss:$0 sm:$0xff]  ;;  %v606_v2 = vmul.f32 %v4170_v62, %v605_v63  ;;  %v646_v7 = vmul.f32 %v2731_v3, %v4170_v62  ;;  %v2818_v8 = vld [vmem:[%s4863_s2 + $0x250] sm:$0xff]  ;;  %v2819_v9 = vld [vmem:[%s4863_s2 + $0x258] sm:$0xff]  ;;  %v3524_v12 = vpack.c.bf16 %v1077_v6, %v1076_v5 }
  0x36   : > { %3643 = vmatpush3.bf16.msra.mxu0 %v3640_v50  ;;  %3517 = vmatprep.subr.bf16.mxu1 %v3516_v55  ;;  %v3652_v14 = vpack.c.bf16 %v2819_v9, %v2818_v8  ;;  %v1078_v15 = vld [vmem:[%s4863_s2 + $0x60] sm:$0xff]  ;;  %v1079_v16 = vld [vmem:[%s4863_s2 + $0x68] sm:$0xff]  ;;  %v2732_v20 = vld [vmem:[%s4172_s20 + $0x10] sm:$0xff]  ;;  %s4877_s12 = smov (!%p519_p9, %s2726_s12), 15  ;;  %s4879_s26 = smov (!%p526_p10, %s3943_s26), 1 }
  0x37   : > { %3645 = vmatprep.subr.bf16.mxu0 %v3644_v56  ;;  %v607_v10 = vadd.f32 %v4178_v1, %v606_v2  ;;  %v4199_v11 = vadd.f32 %v4178_v1, %v646_v7  ;;  %v2820_v17 = vld [vmem:[%s4863_s2 + $0x260] sm:$0xff]  ;;  %v2821_v19 = vld [vmem:[%s4863_s2 + $0x268] sm:$0xff]  ;;  %v2735_v21 = vld [vmem:[%s4181_s23 + $0x18] sm:$0xff]  ;;  %v3528_v23 = vpack.c.bf16 %v1079_v16, %v1078_v15  ;;  %v664_v28 = vmul.f32 %v2732_v20, %v4170_v62  ;;  %s2727_s13 = sshll.u32 %s4877_s12, 3  ;;  %s528_s18 = scalar_lea.vmem %s4867_s6, %s4879_s26 }
  0x38   : > { %v704_v22 = vmul.f32 %v2735_v21, %v4170_v62  ;;  %v2739_v24 = vld [vmem:[%s4181_s23 + $0x28] sm:$0xff]  ;;  %v3656_v25 = vpack.c.bf16 %v2821_v19, %v2820_v17  ;;  %v1080_v26 = vld [vmem:[%s4863_s2 + $0x70] sm:$0xff]  ;;  %v1081_v27 = vld [vmem:[%s4863_s2 + $0x78] sm:$0xff]  ;;  %s522_s15 = scalar_lea.vmem %s4866_s5, %s2727_s13  ;;  %s533_s22 = scalar_lea.vmem %s4868_s7, %s4879_s26 }
  0x39   : > { %3519 = vmatpush3.bf16.msra.mxu1 %v3516_v55  ;;  %v608_v13 = vmax.f32 %v607_v10, 0.0  ;;  %v648_v18 = vmax.f32 %v4199_v11, 0.0  ;;  %v762_v30 = vmul.f32 %v2739_v24, %v4170_v62  ;;  %v2743_v31 = vld [vmem:[%s4181_s23 + $0x38] sm:$0xff]  ;;  %v2822_v32 = vld [vmem:[%s4863_s2 + $0x270] sm:$0xff]  ;;  %v2736_v36 = vld [vmem:[%s4172_s20 + $0x20] sm:$0xff]  ;;  %v3532_v41 = vpack.c.bf16 %v1081_v27, %v1080_v26 }
  0x3a   : > { %3647 = vmatpush3.bf16.msra.mxu0 %v3644_v56  ;;  %3521 = vmatprep.subr.bf16.mxu1 %v3520_v0  ;;  %v705_v29 = vadd.f32 %v4178_v1, %v704_v22  ;;  %v2823_v33 = vld [vmem:[%s4863_s2 + $0x278] sm:$0xff]  ;;  %v820_v34 = vmul.f32 %v2743_v31, %v4170_v62  ;;  %v2747_v38 = vld [vmem:[%s4181_s23 + $0x48] sm:$0xff]  ;;  %v2740_v42 = vld [vmem:[%s4172_s20 + $0x30] sm:$0xff]  ;;  %v4253_v48 = vadd.f32 %v4178_v1, %v664_v28 }
  0x3b   : > { %3649 = vmatprep.subr.bf16.mxu0 %v3648_v4  ;;  %3316 = vmatprep.mubr.f32.mxu0 %v608_v13  ;;  %651 = vst [vmem:[#allocation3 + $0x11] sm:$0xff] %v648_v18  ;;  %v763_v37 = vadd.f32 %v4178_v1, %v762_v30  ;;  %v2751_v40 = vld [vmem:[%s4181_s23 + $0x58] sm:$0xff]  ;;  %v878_v44 = vmul.f32 %v2747_v38, %v4170_v62  ;;  %v2760_v46 = vld [vmem:[%s4863_s2 + $0x80] sm:$0xff]  ;;  %v2761_v47 = vld [vmem:[%s4863_s2 + $0x88] sm:$0xff] }
  0x3c   : > { %v4237_v35 = vmax.f32 %v705_v29, 0.0  ;;  %v821_v43 = vadd.f32 %v4178_v1, %v820_v34  ;;  %v3660_v45 = vpack.c.bf16 %v2823_v33, %v2822_v32  ;;  %v2755_v50 = vld [vmem:[%s4181_s23 + $0x68] sm:$0xff]  ;;  %v2824_v51 = vld [vmem:[%s4863_s2 + $0x280] sm:$0xff]  ;;  %v722_v53 = vmul.f32 %v2736_v36, %v4170_v62  ;;  %v2748_v63 = vld [vmem:[%s4172_s20 + $0x50] sm:$0xff] }
  0x3d   : > { %3523 = vmatpush3.bf16.msra.mxu1 %v3520_v0  ;;  %v4256_v49 = vmax.f32 %v763_v37, 0.0  ;;  %v2825_v52 = vld [vmem:[%s4863_s2 + $0x288] sm:$0xff]  ;;  %v879_v55 = vadd.f32 %v4178_v1, %v878_v44  ;;  %v936_v56 = vmul.f32 %v2751_v40, %v4170_v62  ;;  %v780_v57 = vmul.f32 %v2740_v42, %v4170_v62  ;;  %v2744_v58 = vld [vmem:[%s4172_s20 + $0x40] sm:$0xff]  ;;  %v2733_v3 = vld [vmem:[%s4181_s23 + $0x10] sm:$0xff] }
  0x3e   : > { %3651 = vmatpush3.bf16.msra.mxu0 %v3648_v4  ;;  %3525 = vmatprep.subr.bf16.mxu1 %v3524_v12  ;;  %709 = vst [vmem:[#allocation3 + $0x21] sm:$0xff] %v4237_v35  ;;  %v4266_v54 = vmax.f32 %v821_v43, 0.0  ;;  %v616_v59 = vld [vmem:[%s4181_s23] sm:$0xff]  ;;  %v3536_v60 = vpack.c.bf16 %v2761_v47, %v2760_v46  ;;  %v994_v2 = vmul.f32 %v2755_v50, %v4170_v62  ;;  %v666_v5 = vmax.f32 %v4253_v48, 0.0  ;;  %v2762_v6 = vld [vmem:[%s4863_s2 + $0x90] sm:$0xff]  ;;  %v2763_v7 = vld [vmem:[%s4863_s2 + $0x98] sm:$0xff] }
  0x3f   : > { %3653 = vmatprep.subr.bf16.mxu0 %v3652_v14  ;;  %767 = vst [vmem:[#allocation3 + $0x31] sm:$0xff] %v4256_v49  ;;  %v4275_v61 = vmax.f32 %v879_v55, 0.0  ;;  %v937_v0 = vadd.f32 %v4178_v1, %v936_v56  ;;  %v3664_v4 = vpack.c.bf16 %v2825_v52, %v2824_v51  ;;  %v617_v8 = vmul.f32 %v4170_v62, %v616_v59  ;;  %v2826_v9 = vld [vmem:[%s4863_s2 + $0x290] sm:$0xff]  ;;  %v2827_v10 = vld [vmem:[%s4863_s2 + $0x298] sm:$0xff]  ;;  %v2752_v20 = vld [vmem:[%s4172_s20 + $0x60] sm:$0xff] }
  0x40   : > { %825 = vst [vmem:[#allocation3 + $0x41] sm:$0xff] %v4266_v54  ;;  %v838_v13 = vmul.f32 %v2744_v58, %v4170_v62  ;;  %v995_v15 = vadd.f32 %v4178_v1, %v994_v2  ;;  %v781_v17 = vadd.f32 %v4178_v1, %v780_v57  ;;  %v896_v19 = vmul.f32 %v2748_v63, %v4170_v62  ;;  %v2764_v27 = vld [vmem:[%s4863_s2 + $0xa0] sm:$0xff]  ;;  %v2765_v28 = vld [vmem:[%s4863_s2 + $0xa8] sm:$0xff]  ;;  %v2766_v47 = vld [vmem:[%s4863_s2 + $0xb0] sm:$0xff] }
  0x41   : > { %3527 = vmatpush3.bf16.msra.mxu1 %v3524_v12  ;;  %v723_v12 = vadd.f32 %v4178_v1, %v722_v53  ;;  %883 = vst [vmem:[#allocation3 + $0x51] sm:$0xff] %v4275_v61  ;;  %v4307_v21 = vadd.f32 %v4178_v1, %v617_v8  ;;  %v675_v22 = vmul.f32 %v2733_v3, %v4170_v62  ;;  %v2828_v31 = vld [vmem:[%s4863_s2 + $0x2a0] sm:$0xff]  ;;  %v2829_v32 = vld [vmem:[%s4863_s2 + $0x2a8] sm:$0xff]  ;;  %v2767_v48 = vld [vmem:[%s4863_s2 + $0xb8] sm:$0xff] }
  0x42   : > { %3655 = vmatpush3.bf16.msra.mxu0 %v3652_v14  ;;  %3529 = vmatprep.subr.bf16.mxu1 %v3528_v23  ;;  %v4298_v14 = vmax.f32 %v937_v0, 0.0  ;;  %v4301_v16 = vld [vmem:[#allocation3 + $0x10] sm:$0xff]  ;;  %v4311_v24 = vmax.f32 %v995_v15, 0.0  ;;  %v3668_v26 = vpack.c.bf16 %v2827_v10, %v2826_v9  ;;  %v839_v36 = vadd.f32 %v4178_v1, %v838_v13  ;;  %v2831_v52 = vld [vmem:[%s4863_s2 + $0x2b8] sm:$0xff]  ;;  %v2745_v2 = vld [vmem:[%s4181_s23 + $0x40] sm:$0xff] }
  0x43   : > { %3657 = vmatprep.subr.bf16.mxu0 %v3656_v25  ;;  %v619_v29 = vmax.f32 %v4307_v21, 0.0  ;;  %v4322_v30 = vadd.f32 %v4178_v1, %v675_v22  ;;  %v724_v34 = vmax.f32 %v723_v12, 0.0  ;;  %v954_v37 = vmul.f32 %v2752_v20, %v4170_v62  ;;  %v2830_v50 = vld [vmem:[%s4863_s2 + $0x2b0] sm:$0xff]  ;;  %v2832_v8 = vld [vmem:[%s4863_s2 + $0x2c0] sm:$0xff]  ;;  %v2833_v13 = vld [vmem:[%s4863_s2 + $0x2c8] sm:$0xff] }
  0x44   : > { %941 = vst [vmem:[#allocation3 + $0x61] sm:$0xff] %v4298_v14  ;;  %999 = vst [vmem:[#allocation3 + $0x71] sm:$0xff] %v4311_v24  ;;  %v782_v40 = vmax.f32 %v781_v17, 0.0  ;;  %v3544_v44 = vpack.c.bf16 %v2765_v28, %v2764_v27  ;;  %v3672_v46 = vpack.c.bf16 %v2829_v32, %v2828_v31  ;;  %v840_v55 = vmax.f32 %v839_v36, 0.0  ;;  %v2741_v57 = vld [vmem:[%s4181_s23 + $0x30] sm:$0xff]  ;;  %v2753_v22 = vld [vmem:[%s4181_s23 + $0x60] sm:$0xff] }
  0x45   : > { %3531 = vmatpush3.bf16.msra.mxu1 %v3528_v23  ;;  %v3540_v23 = vpack.c.bf16 %v2763_v7, %v2762_v6  ;;  %v4331_v33 = vld [vmem:[#allocation3 + $0x20] sm:$0xff]  ;;  %622 = vst [vmem:[#allocation3 + $0x91] sm:$0xff] %v619_v29  ;;  %v677_v43 = vmax.f32 %v4322_v30, 0.0  ;;  %v955_v56 = vadd.f32 %v4178_v1, %v954_v37  ;;  %v791_v0 = vmul.f32 %v2741_v57, %v4170_v62  ;;  %v2769_v7 = vld [vmem:[%s4863_s2 + $0xc8] sm:$0xff]  ;;  %v2749_v12 = vld [vmem:[%s4181_s23 + $0x50] sm:$0xff] }
  0x46   : > { %3659 = vmatpush3.bf16.msra.mxu0 %v3656_v25  ;;  %3533 = vmatprep.subr.bf16.mxu1 %v3532_v41  ;;  %v2756_v25 = vld [vmem:[%s4172_s20 + $0x70] sm:$0xff]  ;;  %v3548_v3 = vpack.c.bf16 %v2767_v48, %v2766_v47  ;;  %v3676_v6 = vpack.c.bf16 %v2831_v52, %v2830_v50  ;;  %v907_v20 = vmul.f32 %v2749_v12, %v4170_v62  ;;  %v2772_v52 = vld [vmem:[%s4863_s2 + $0xe0] sm:$0xff]  ;;  %v2837_v57 = vld [vmem:[%s4863_s2 + $0x2e8] sm:$0xff] }
  0x47   : > { %3661 = vmatprep.subr.bf16.mxu0 %v3660_v45  ;;  %v4336_v38 = vld [vmem:[#allocation3 + $0x30] sm:$0xff]  ;;  %v1012_v42 = vmul.f32 %v2756_v25, %v4170_v62  ;;  %680 = vst [vmem:[#allocation3 + $0xa1] sm:$0xff] %v677_v43  ;;  %v4361_v53 = vld [vmem:[#allocation3 + $0x40] sm:$0xff]  ;;  %v4386_v10 = vadd.f32 %v4178_v1, %v791_v0  ;;  %v956_v17 = vmax.f32 %v955_v56, 0.0  ;;  %v965_v32 = vmul.f32 %v2753_v22, %v4170_v62  ;;  %v2777_v22 = vld [vmem:[%s4863_s2 + $0x108] sm:$0xff] }
  0x48   : > { %v4365_v58 = vld [vmem:[#allocation3 + $0x50] sm:$0xff]  ;;  %v4407_v31 = vadd.f32 %v4178_v1, %v907_v20  ;;  %v3680_v36 = vpack.c.bf16 %v2833_v13, %v2832_v8  ;;  %v2836_v56 = vld [vmem:[%s4863_s2 + $0x2e0] sm:$0xff]  ;;  %v2738_v8 = vld [vmem:[%s4172_s20 + $0x28] sm:$0xff] }
  0x49   : > { %3535 = vmatpush3.bf16.msra.mxu1 %v3532_v41  ;;  %v897_v41 = vadd.f32 %v4178_v1, %v896_v19  ;;  %v2770_v37 = vld [vmem:[%s4863_s2 + $0xd0] sm:$0xff]  ;;  %v2776_v20 = vld [vmem:[%s4863_s2 + $0x100] sm:$0xff] }
  0x4a   : > { %3663 = vmatpush3.bf16.msra.mxu0 %v3660_v45  ;;  %3537 = vmatprep.subr.bf16.mxu1 %v3536_v60  ;;  %v2737_v45 = vld [vmem:[%s4181_s23 + $0x20] sm:$0xff]  ;;  %v2774_v21 = vld [vmem:[%s4863_s2 + $0xf0] sm:$0xff] }
  0x4b   : > { %3665 = vmatprep.subr.bf16.mxu0 %v3664_v4  ;;  %v733_v51 = vmul.f32 %v2737_v45, %v4170_v62  ;;  %v898_v59 = vmax.f32 %v897_v41, 0.0  ;;  %v4393_v15 = vld [vmem:[#allocation3 + $0x60] sm:$0xff]  ;;  %v2834_v41 = vld [vmem:[%s4863_s2 + $0x2d0] sm:$0xff]  ;;  %v4431_v45 = vadd.f32 %v4178_v1, %v965_v32 }
  0x4c   : > { %3141 = vmatmul.mubr.f32.vlgmr.msra.gmra.mrb[0].mxu1 %v4301_v16  ;;  %v2840_v32 = vld [vmem:[%s4863_s2 + $0x300] sm:$0xff]  ;;  %v2798_v11 = vld [vmem:[%s4863_s2 + $0x1b0] sm:$0xff] }
  0x4d   : > { %3539 = vmatpush3.bf16.msra.mxu1 %v3536_v60  ;;  %3317 = vmatmul.mubr.f32.vlgmr.msra.gmra.mrb[0].mxu0 %v666_v5  ;;  %v1013_v60 = vadd.f32 %v4178_v1, %v1012_v42  ;;  %v4369_v63 = vadd.f32 %v4178_v1, %v733_v51  ;;  %v849_v5 = vmul.f32 %v2745_v2, %v4170_v62  ;;  %v2835_v42 = vld [vmem:[%s4863_s2 + $0x2d8] sm:$0xff]  ;;  %v967_v48 = vmax.f32 %v4431_v45, 0.0  ;;  %v2789_v45 = vld [vmem:[%s4863_s2 + $0x168] sm:$0xff] }
  0x4e   : > { %3667 = vmatpush3.bf16.msra.mxu0 %v3664_v4  ;;  %3541 = vmatprep.subr.bf16.mxu1 %v3540_v23  ;;  %v2768_v4 = vld [vmem:[%s4863_s2 + $0xc0] sm:$0xff]  ;;  %v3684_v51 = vpack.c.bf16 %v2835_v42, %v2834_v41  ;;  %v3688_v2 = vpack.c.bf16 %v2837_v57, %v2836_v56  ;;  %v2746_v41 = vld [vmem:[%s4172_s20 + $0x48] sm:$0xff] }
  0x4f   : > { %3669 = vmatprep.subr.bf16.mxu0 %v3668_v26  ;;  %3143 = vmatprep.mubr.f32.mxu1 %v4331_v33  ;;  %v735_v9 = vmax.f32 %v4369_v63, 0.0  ;;  %v4396_v19 = vadd.f32 %v4178_v1, %v849_v5  ;;  %v1014_v25 = vmax.f32 %v1013_v60, 0.0  ;;  %v3552_v27 = vpack.c.bf16 %v2769_v7, %v2768_v4  ;;  %970 = vst [vmem:[#allocation3 + $0xf1] sm:$0xff] %v967_v48  ;;  %v2730_v60 = vld [vmem:[%s4172_s20 + $0x8] sm:$0xff]  ;;  %v2839_v4 = vld [vmem:[%s4863_s2 + $0x2f8] sm:$0xff]  ;;  %v2784_v63 = vld [vmem:[%s4863_s2 + $0x140] sm:$0xff] }
  0x50   : > { %3319 = vmatprep.mubr.f32.mxu0 %v724_v34  ;;  %3144 = vmatmul.mubr.f32.gmra.mrb[2].mxu1 %v4336_v38  ;;  %v2757_v34 = vld [vmem:[%s4181_s23 + $0x70] sm:$0xff]  ;;  %v635_v5 = vmul.f32 %v2730_v60, %v4170_v62  ;;  %v2759_v7 = vld [vmem:[%s4181_s23 + $0x78] sm:$0xff] }
  0x51   : > { %3543 = vmatpush3.bf16.msra.mxu1 %v3540_v23  ;;  %3320 = vmatmul.mubr.f32.gmra.mrb[2].mxu0 %v782_v40  ;;  %v4400_v23 = vld [vmem:[#allocation3 + $0x70] sm:$0xff]  ;;  %738 = vst [vmem:[#allocation3 + $0xb1] sm:$0xff] %v735_v9  ;;  %v851_v28 = vmax.f32 %v4396_v19, 0.0  ;;  %v2771_v40 = vld [vmem:[%s4863_s2 + $0xd8] sm:$0xff]  ;;  %v1052_v12 = vmul.f32 %v2759_v7, %v4170_v62 }
  0x52   : > { %3671 = vmatpush3.bf16.msra.mxu0 %v3668_v26  ;;  %3545 = vmatprep.subr.bf16.mxu1 %v3544_v44  ;;  %v793_v26 = vmax.f32 %v4386_v10, 0.0  ;;  %v3556_v47 = vpack.c.bf16 %v2771_v40, %v2770_v37  ;;  %v751_v37 = vmul.f32 %v2738_v8, %v4170_v62  ;;  %v2742_v40 = vld [vmem:[%s4172_s20 + $0x38] sm:$0xff]  ;;  %v2848_v10 = vld [vmem:[%s4863_s2 + $0x340] sm:$0xff] }
  0x53   : > { %3673 = vmatprep.subr.bf16.mxu0 %v3672_v46  ;;  %3146 = vmatprep.mubr.f32.mxu1 %v4361_v53  ;;  %854 = vst [vmem:[#allocation3 + $0xd1] sm:$0xff] %v851_v28  ;;  %v809_v57 = vmul.f32 %v2742_v40, %v4170_v62  ;;  %v2787_v19 = vld [vmem:[%s4863_s2 + $0x158] sm:$0xff] }
  0x54   : > { %3322 = vmatprep.mubr.f32.mxu0 %v840_v55  ;;  %3147 = vmatmul.mubr.f32.gmra.mrb[4].mxu1 %v4365_v58  ;;  %796 = vst [vmem:[#allocation3 + $0xc1] sm:$0xff] %v793_v26  ;;  %v2773_v55 = vld [vmem:[%s4863_s2 + $0xe8] sm:$0xff] }
  0x55   : > { %3547 = vmatpush3.bf16.msra.mxu1 %v3544_v44  ;;  %3323 = vmatmul.mubr.f32.gmra.mrb[4].mxu0 %v898_v59  ;;  %v909_v44 = vmax.f32 %v4407_v31, 0.0  ;;  %v3560_v0 = vpack.c.bf16 %v2773_v55, %v2772_v52  ;;  %v2778_v52 = vld [vmem:[%s4863_s2 + $0x110] sm:$0xff]  ;;  %v2779_v55 = vld [vmem:[%s4863_s2 + $0x118] sm:$0xff] }
  0x56   : > { %3675 = vmatpush3.bf16.msra.mxu0 %v3672_v46  ;;  %3549 = vmatprep.subr.bf16.mxu1 %v3548_v3  ;;  %v1023_v46 = vmul.f32 %v2757_v34, %v4170_v62  ;;  %v2841_v34 = vld [vmem:[%s4863_s2 + $0x308] sm:$0xff]  ;;  %v3572_v7 = vpack.c.bf16 %v2779_v55, %v2778_v52  ;;  %v2782_v52 = vld [vmem:[%s4863_s2 + $0x130] sm:$0xff]  ;;  %v2783_v55 = vld [vmem:[%s4863_s2 + $0x138] sm:$0xff] }
  0x57   : > { %3677 = vmatprep.subr.bf16.mxu0 %v3676_v6  ;;  %3149 = vmatprep.mubr.f32.mxu1 %v4393_v15  ;;  %912 = vst [vmem:[#allocation3 + $0xe1] sm:$0xff] %v909_v44  ;;  %v2851_v31 = vld [vmem:[%s4863_s2 + $0x358] sm:$0xff] }
  0x58   : > { %3325 = vmatprep.mubr.f32.mxu0 %v956_v17  ;;  %3150 = vmatmul.mubr.f32.gmra.mrb[6].mxu1 %v4400_v23  ;;  %v4438_v50 = vadd.f32 %v4178_v1, %v1023_v46  ;;  %v3568_v46 = vpack.c.bf16 %v2777_v22, %v2776_v20  ;;  %v2781_v20 = vld [vmem:[%s4863_s2 + $0x128] sm:$0xff] }
  0x59   : > { %3551 = vmatpush3.bf16.msra.mxu1 %v3548_v3  ;;  %3326 = vmatmul.mubr.f32.gmra.mrb[6].mxu0 %v1014_v25  ;;  %v2838_v3 = vld [vmem:[%s4863_s2 + $0x2f0] sm:$0xff] }
  0x5a   : > { %3679 = vmatpush3.bf16.msra.mxu0 %v3676_v6  ;;  %3553 = vmatprep.subr.bf16.mxu1 %v3552_v27  ;;  %v1025_v59 = vmax.f32 %v4438_v50, 0.0  ;;  %v2734_v6 = vld [vmem:[%s4172_s20 + $0x18] sm:$0xff]  ;;  %v3692_v17 = vpack.c.bf16 %v2839_v4, %v2838_v3  ;;  %v867_v3 = vmul.f32 %v2746_v41, %v4170_v62  ;;  %v2853_v50 = vld [vmem:[%s4863_s2 + $0x368] sm:$0xff] }
  0x5b   : > { %3681 = vmatprep.subr.bf16.mxu0 %v3680_v36  ;;  %3184 = vmatprep.mubr.f32.mxu1 %v3953_v39  ;;  %v693_v25 = vmul.f32 %v2734_v6, %v4170_v62  ;;  %v2750_v4 = vld [vmem:[%s4172_s20 + $0x58] sm:$0xff] }
  0x5c   : > { %3360 = vmatprep.mubr.f32.mxu0 %v619_v29  ;;  %1028 = vst [vmem:[#allocation3 + $0x101] sm:$0xff] %v1025_v59  ;;  %v2775_v29 = vld [vmem:[%s4863_s2 + $0xf8] sm:$0xff] }
  0x5d   : > { %3555 = vmatpush3.bf16.msra.mxu1 %v3552_v27  ;;  %v3564_v13 = vpack.c.bf16 %v2775_v29, %v2774_v21  ;;  %v4486_v27 = vadd.f32 %v4178_v1, %v1052_v12  ;;  %v4509_v56 = vadd.f32 %v4178_v1, %v693_v25  ;;  %v2843_v21 = vld [vmem:[%s4863_s2 + $0x318] sm:$0xff]  ;;  %v4523_v29 = vadd.f32 %v4178_v1, %v751_v37  ;;  %v2780_v12 = vld [vmem:[%s4863_s2 + $0x120] sm:$0xff] }
  0x5e   : > { %3683 = vmatpush3.bf16.msra.mxu0 %v3680_v36  ;;  %3557 = vmatprep.subr.bf16.mxu1 %v3556_v47  ;;  %v4495_v36 = vadd.f32 %v4178_v1, %v635_v5  ;;  %v2754_v5 = vld [vmem:[%s4172_s20 + $0x68] sm:$0xff]  ;;  %v925_v25 = vmul.f32 %v2750_v4, %v4170_v62  ;;  %v4552_v37 = vadd.f32 %v4178_v1, %v867_v3 }
  0x5f   : > { %3685 = vmatprep.subr.bf16.mxu0 %v3684_v51  ;;  %v1054_v42 = vmax.f32 %v4486_v27, 0.0  ;;  %v695_v22 = vmax.f32 %v4509_v56, 0.0  ;;  %v983_v40 = vmul.f32 %v2754_v5, %v4170_v62  ;;  %v3576_v41 = vpack.c.bf16 %v2781_v20, %v2780_v12  ;;  %v2786_v5 = vld [vmem:[%s4863_s2 + $0x150] sm:$0xff]  ;;  %v2791_v20 = vld [vmem:[%s4863_s2 + $0x178] sm:$0xff] }
  0x60   : > { %v4567_v30 = vadd.f32 %v4178_v1, %v925_v25  ;;  %v2854_v25 = vld [vmem:[%s4863_s2 + $0x370] sm:$0xff]  ;;  %v2879_v56 = vld [vmem:[%s4863_s2 + $0x438] sm:$0xff] }
  0x61   : > { %3559 = vmatpush3.bf16.msra.mxu1 %v3556_v47  ;;  %v2758_v47 = vld [vmem:[%s4172_s20 + $0x78] sm:$0xff]  ;;  %1057 = vst [vmem:[#allocation3 + $0x81] sm:$0xff] %v1054_v42 }
  0x62   : > { %3687 = vmatpush3.bf16.msra.mxu0 %v3684_v51  ;;  %3561 = vmatprep.subr.bf16.mxu1 %v3560_v0  ;;  %v3696_v51 = vpack.c.bf16 %v2841_v34, %v2840_v32  ;;  %v1041_v60 = vmul.f32 %v2758_v47, %v4170_v62  ;;  %v2845_v32 = vld [vmem:[%s4863_s2 + $0x328] sm:$0xff]  ;;  %v753_v34 = vmax.f32 %v4523_v29, 0.0  ;;  %v1509_v29 = vld [vmem:[#allocation3 + $0xf0] sm:$0xff] }
  0x63   : > { %3689 = vmatprep.subr.bf16.mxu0 %v3688_v2 }
  0x64   : > { %v4529_v6 = vadd.f32 %v4178_v1, %v1041_v60  ;;  %v3580_v60 = vpack.c.bf16 %v2783_v55, %v2782_v52  ;;  %v2857_v52 = vld [vmem:[%s4863_s2 + $0x388] sm:$0xff] }
  0x65   : > { %3563 = vmatpush3.bf16.msra.mxu1 %v3560_v0  ;;  %v637_v0 = vmax.f32 %v4495_v36, 0.0  ;;  %v2871_v36 = vld [vmem:[%s4863_s2 + $0x3f8] sm:$0xff] }
  0x66   : > { %3691 = vmatpush3.bf16.msra.mxu0 %v3688_v2  ;;  %3565 = vmatprep.subr.bf16.mxu1 %v3564_v13  ;;  %v2842_v2 = vld [vmem:[%s4863_s2 + $0x310] sm:$0xff] }
  0x67   : > { %3693 = vmatprep.subr.bf16.mxu0 %v3692_v17  ;;  %v3700_v8 = vpack.c.bf16 %v2843_v21, %v2842_v2 }
  0x69   : > { %3567 = vmatpush3.bf16.msra.mxu1 %v3564_v13  ;;  %v4539_v13 = vadd.f32 %v4178_v1, %v809_v57  ;;  %v4581_v57 = vadd.f32 %v4178_v1, %v983_v40  ;;  %v927_v1 = vmax.f32 %v4567_v30, 0.0  ;;  %v2792_v40 = vld [vmem:[%s4863_s2 + $0x180] sm:$0xff]  ;;  %v2883_v30 = vld [vmem:[%s4863_s2 + $0x458] sm:$0xff] }
  0x6a   : > { %3695 = vmatpush3.bf16.msra.mxu0 %v3692_v17  ;;  %3569 = vmatprep.subr.bf16.mxu1 %v3568_v46  ;;  %v2844_v17 = vld [vmem:[%s4863_s2 + $0x320] sm:$0xff] }
  0x6b   : > { %3697 = vmatprep.subr.bf16.mxu0 %v3696_v51  ;;  %v3704_v47 = vpack.c.bf16 %v2845_v32, %v2844_v17  ;;  %v811_v62 = vmax.f32 %v4539_v13, 0.0  ;;  %v985_v21 = vmax.f32 %v4581_v57, 0.0  ;;  %v1510_v13 = vld [vmem:[#allocation3 + $0x100] sm:$0xff] }
  0x6c   : > { %3185 = vmatmul.mubr.f32.vlgmr.msra.gmra.mrb[0].mxu1 %v637_v0  ;;  %v2884_v57 = vld [vmem:[%s4863_s2 + $0x460] sm:$0xff] }
  0x6d   : > { %3571 = vmatpush3.bf16.msra.mxu1 %v3568_v46  ;;  %3361 = vmatmul.mubr.f32.vlgmr.msra.gmra.mrb[0].mxu0 %v677_v43  ;;  %v2846_v43 = vld [vmem:[%s4863_s2 + $0x330] sm:$0xff]  ;;  %v2847_v46 = vld [vmem:[%s4863_s2 + $0x338] sm:$0xff] }
  0x6e   : > { %3699 = vmatpush3.bf16.msra.mxu0 %v3696_v51  ;;  %3573 = vmatprep.subr.bf16.mxu1 %v3572_v7  ;;  %v869_v51 = vmax.f32 %v4552_v37, 0.0  ;;  %v3708_v2 = vpack.c.bf16 %v2847_v46, %v2846_v43  ;;  %v2794_v46 = vld [vmem:[%s4863_s2 + $0x190] sm:$0xff]  ;;  %v1043_v37 = vmax.f32 %v4529_v6, 0.0 }
  0x6f   : > { %3701 = vmatprep.subr.bf16.mxu0 %v3700_v8  ;;  %3187 = vmatprep.mubr.f32.mxu1 %v695_v22 }
  0x70   : > { %3363 = vmatprep.mubr.f32.mxu0 %v735_v9  ;;  %3188 = vmatmul.mubr.f32.gmra.mrb[2].mxu1 %v753_v34  ;;  %v2785_v9 = vld [vmem:[%s4863_s2 + $0x148] sm:$0xff] }
  0x71   : > { %3575 = vmatpush3.bf16.msra.mxu1 %v3572_v7  ;;  %3364 = vmatmul.mubr.f32.gmra.mrb[2].mxu0 %v793_v26  ;;  %v2849_v26 = vld [vmem:[%s4863_s2 + $0x348] sm:$0xff]  ;;  %v3584_v3 = vpack.c.bf16 %v2785_v9, %v2784_v63  ;;  %v2859_v63 = vld [vmem:[%s4863_s2 + $0x398] sm:$0xff] }
  0x72   : > { %3703 = vmatpush3.bf16.msra.mxu0 %v3700_v8  ;;  %3577 = vmatprep.subr.bf16.mxu1 %v3576_v41  ;;  %v3712_v4 = vpack.c.bf16 %v2849_v26, %v2848_v10  ;;  %v2788_v8 = vld [vmem:[%s4863_s2 + $0x160] sm:$0xff] }
  0x73   : > { %3705 = vmatprep.subr.bf16.mxu0 %v3704_v47  ;;  %3190 = vmatprep.mubr.f32.mxu1 %v811_v62  ;;  %v2796_v26 = vld [vmem:[%s4863_s2 + $0x1a0] sm:$0xff] }
  0x74   : > { %3366 = vmatprep.mubr.f32.mxu0 %v851_v28  ;;  %3191 = vmatmul.mubr.f32.gmra.mrb[4].mxu1 %v869_v51  ;;  %v2850_v28 = vld [vmem:[%s4863_s2 + $0x350] sm:$0xff] }
  0x75   : > { %3579 = vmatpush3.bf16.msra.mxu1 %v3576_v41  ;;  %3367 = vmatmul.mubr.f32.gmra.mrb[4].mxu0 %v909_v44  ;;  %v3588_v44 = vpack.c.bf16 %v2787_v19, %v2786_v5  ;;  %v3716_v7 = vpack.c.bf16 %v2851_v31, %v2850_v28  ;;  %v2793_v41 = vld [vmem:[%s4863_s2 + $0x188] sm:$0xff]  ;;  %v2862_v31 = vld [vmem:[%s4863_s2 + $0x3b0] sm:$0xff] }
  0x76   : > { %3707 = vmatpush3.bf16.msra.mxu0 %v3704_v47  ;;  %3581 = vmatprep.subr.bf16.mxu1 %v3580_v60  ;;  %v2856_v47 = vld [vmem:[%s4863_s2 + $0x380] sm:$0xff]  ;;  %v3600_v55 = vpack.c.bf16 %v2793_v41, %v2792_v40  ;;  %v2861_v5 = vld [vmem:[%s4863_s2 + $0x3a8] sm:$0xff] }
  0x77   : > { %3709 = vmatprep.subr.bf16.mxu0 %v3708_v2  ;;  %3193 = vmatprep.mubr.f32.mxu1 %v927_v1  ;;  %v3728_v43 = vpack.c.bf16 %v2857_v52, %v2856_v47  ;;  %v2869_v40 = vld [vmem:[%s4863_s2 + $0x3e8] sm:$0xff]  ;;  %v2806_v52 = vld [vmem:[%s4863_s2 + $0x1f0] sm:$0xff] }
  0x78   : > { %3369 = vmatprep.mubr.f32.mxu0 %v967_v48  ;;  %3194 = vmatmul.mubr.f32.gmra.mrb[6].mxu1 %v985_v21  ;;  %v2852_v48 = vld [vmem:[%s4863_s2 + $0x360] sm:$0xff] }
  0x79   : > { %3583 = vmatpush3.bf16.msra.mxu1 %v3580_v60  ;;  %3370 = vmatmul.mubr.f32.gmra.mrb[6].mxu0 %v1025_v59  ;;  %v3592_v59 = vpack.c.bf16 %v2789_v45, %v2788_v8  ;;  %v3720_v12 = vpack.c.bf16 %v2853_v50, %v2852_v48  ;;  %v2795_v60 = vld [vmem:[%s4863_s2 + $0x198] sm:$0xff]  ;;  %v2800_v8 = vld [vmem:[%s4863_s2 + $0x1c0] sm:$0xff]  ;;  %v2801_v45 = vld [vmem:[%s4863_s2 + $0x1c8] sm:$0xff] }
  0x7a   : > { %3711 = vmatpush3.bf16.msra.mxu0 %v3708_v2  ;;  %3585 = vmatprep.subr.bf16.mxu1 %v3584_v3  ;;  %v2858_v2 = vld [vmem:[%s4863_s2 + $0x390] sm:$0xff]  ;;  %v3604_v9 = vpack.c.bf16 %v2795_v60, %v2794_v46  ;;  %v3616_v48 = vpack.c.bf16 %v2801_v45, %v2800_v8  ;;  %v1972_v50 = vld [vmem:[#allocation3 + $0x80] sm:$0xff]  ;;  %v2887_v45 = vld [vmem:[%s4863_s2 + $0x478] sm:$0xff] }
  0x7b   : > { %3713 = vmatprep.subr.bf16.mxu0 %v3712_v4  ;;  %3228 = vmatprep.mubr.f32.mxu1 %v3953_v39  ;;  %v2790_v39 = vld [vmem:[%s4863_s2 + $0x170] sm:$0xff]  ;;  %v3732_v10 = vpack.c.bf16 %v2859_v63, %v2858_v2  ;;  %v2872_v60 = vld [vmem:[%s4863_s2 + $0x400] sm:$0xff]  ;;  %v2873_v2 = vld [vmem:[%s4863_s2 + $0x408] sm:$0xff] }
  0x7c   : > { %3404 = vmatprep.mubr.f32.mxu0 %v4301_v16  ;;  %v2855_v16 = vld [vmem:[%s4863_s2 + $0x378] sm:$0xff]  ;;  %v3596_v17 = vpack.c.bf16 %v2791_v20, %v2790_v39  ;;  %v1503_v20 = vld [vmem:[#allocation3 + $0x90] sm:$0xff]  ;;  %v3760_v63 = vpack.c.bf16 %v2873_v2, %v2872_v60 }
  0x7d   : > { %3587 = vmatpush3.bf16.msra.mxu1 %v3584_v3  ;;  %v3724_v32 = vpack.c.bf16 %v2855_v16, %v2854_v25  ;;  %v2797_v3 = vld [vmem:[%s4863_s2 + $0x1a8] sm:$0xff]  ;;  %v2803_v39 = vld [vmem:[%s4863_s2 + $0x1d8] sm:$0xff]  ;;  %v2886_v8 = vld [vmem:[%s4863_s2 + $0x470] sm:$0xff] }
  0x7e   : > { %3715 = vmatpush3.bf16.msra.mxu0 %v3712_v4  ;;  %3589 = vmatprep.subr.bf16.mxu1 %v3588_v44  ;;  %v2860_v4 = vld [vmem:[%s4863_s2 + $0x3a0] sm:$0xff]  ;;  %v3608_v19 = vpack.c.bf16 %v2797_v3, %v2796_v26  ;;  %v1505_v3 = vld [vmem:[#allocation3 + $0xb0] sm:$0xff] }
  0x7f   : > { %3717 = vmatprep.subr.bf16.mxu0 %v3716_v7  ;;  %v3736_v28 = vpack.c.bf16 %v2861_v5, %v2860_v4  ;;  %v1504_v26 = vld [vmem:[#allocation3 + $0xa0] sm:$0xff] }
  0x80   : > { %v2876_v5 = vld [vmem:[%s4863_s2 + $0x420] sm:$0xff] }
  0x81   : > { %3591 = vmatpush3.bf16.msra.mxu1 %v3588_v44 }
  0x82   : > { %3719 = vmatpush3.bf16.msra.mxu0 %v3716_v7  ;;  %3593 = vmatprep.subr.bf16.mxu1 %v3592_v59 }
  0x83   : > { %3721 = vmatprep.subr.bf16.mxu0 %v3720_v12 }
  0x85   : > { %3595 = vmatpush3.bf16.msra.mxu1 %v3592_v59 }
  0x86   : > { %3723 = vmatpush3.bf16.msra.mxu0 %v3720_v12  ;;  %3597 = vmatprep.subr.bf16.mxu1 %v3596_v17  ;;  %v2802_v12 = vld [vmem:[%s4863_s2 + $0x1d0] sm:$0xff] }
  0x87   : > { %3725 = vmatprep.subr.bf16.mxu0 %v3724_v32  ;;  %v3620_v25 = vpack.c.bf16 %v2803_v39, %v2802_v12 }
  0x89   : > { %3599 = vmatpush3.bf16.msra.mxu1 %v3596_v17  ;;  %v2804_v17 = vld [vmem:[%s4863_s2 + $0x1e0] sm:$0xff] }
  0x8a   : > { %3727 = vmatpush3.bf16.msra.mxu0 %v3724_v32  ;;  %3601 = vmatprep.subr.bf16.mxu1 %v3600_v55  ;;  %v2805_v32 = vld [vmem:[%s4863_s2 + $0x1e8] sm:$0xff] }
  0x8b   : > { %3729 = vmatprep.subr.bf16.mxu0 %v3728_v43  ;;  %v3624_v41 = vpack.c.bf16 %v2805_v32, %v2804_v17 }
  0x8c   : > { %3229 = vmatmul.mubr.f32.vlgmr.msra.gmra.mrb[0].mxu1 %v648_v18  ;;  %v2799_v18 = vld [vmem:[%s4863_s2 + $0x1b8] sm:$0xff] }
  0x8d   : > { %3603 = vmatpush3.bf16.msra.mxu1 %v3600_v55  ;;  %3405 = vmatmul.mubr.f32.vlgmr.msra.gmra.mrb[0].mxu0 %v4331_v33  ;;  %v2863_v33 = vld [vmem:[%s4863_s2 + $0x3b8] sm:$0xff]  ;;  %v3612_v44 = vpack.c.bf16 %v2799_v18, %v2798_v11  ;;  %v1507_v11 = vld [vmem:[#allocation3 + $0xd0] sm:$0xff] }
  0x8e   : > { %3731 = vmatpush3.bf16.msra.mxu0 %v3728_v43  ;;  %3605 = vmatprep.subr.bf16.mxu1 %v3604_v9  ;;  %v3740_v7 = vpack.c.bf16 %v2863_v33, %v2862_v31  ;;  %v2807_v55 = vld [vmem:[%s4863_s2 + $0x1f8] sm:$0xff]  ;;  %v2870_v43 = vld [vmem:[%s4863_s2 + $0x3f0] sm:$0xff]  ;;  %v2880_v33 = vld [vmem:[%s4863_s2 + $0x440] sm:$0xff] }
  0x8f   : > { %3733 = vmatprep.subr.bf16.mxu0 %v3732_v10  ;;  %3231 = vmatprep.mubr.f32.mxu1 %v4237_v35  ;;  %v3756_v46 = vpack.c.bf16 %v2871_v36, %v2870_v43  ;;  %v2878_v31 = vld [vmem:[%s4863_s2 + $0x430] sm:$0xff] }
  0x90   : > { %3407 = vmatprep.mubr.f32.mxu0 %v4336_v38  ;;  %3232 = vmatmul.mubr.f32.gmra.mrb[2].mxu1 %v4256_v49  ;;  %v2864_v38 = vld [vmem:[%s4863_s2 + $0x3c0] sm:$0xff] }
  0x91   : > { %3607 = vmatpush3.bf16.msra.mxu1 %v3604_v9  ;;  %3408 = vmatmul.mubr.f32.gmra.mrb[2].mxu0 %v4361_v53  ;;  %v2865_v53 = vld [vmem:[%s4863_s2 + $0x3c8] sm:$0xff]  ;;  %v2874_v9 = vld [vmem:[%s4863_s2 + $0x410] sm:$0xff] }
  0x92   : > { %3735 = vmatpush3.bf16.msra.mxu0 %v3732_v10  ;;  %3609 = vmatprep.subr.bf16.mxu1 %v3608_v19  ;;  %v3744_v59 = vpack.c.bf16 %v2865_v53, %v2864_v38  ;;  %v2875_v10 = vld [vmem:[%s4863_s2 + $0x418] sm:$0xff]  ;;  %v3788_v38 = vpack.c.bf16 %v2887_v45, %v2886_v8 }
  0x93   : > { %3737 = vmatprep.subr.bf16.mxu0 %v3736_v28  ;;  %3234 = vmatprep.mubr.f32.mxu1 %v4266_v54  ;;  %v3764_v4 = vpack.c.bf16 %v2875_v10, %v2874_v9 }
  0x94   : > { %3410 = vmatprep.mubr.f32.mxu0 %v4365_v58  ;;  %3235 = vmatmul.mubr.f32.gmra.mrb[4].mxu1 %v4275_v61  ;;  %v2866_v58 = vld [vmem:[%s4863_s2 + $0x3d0] sm:$0xff] }
  0x95   : > { %3611 = vmatpush3.bf16.msra.mxu1 %v3608_v19  ;;  %3411 = vmatmul.mubr.f32.gmra.mrb[4].mxu0 %v4393_v15  ;;  %v2867_v15 = vld [vmem:[%s4863_s2 + $0x3d8] sm:$0xff]  ;;  %v2877_v19 = vld [vmem:[%s4863_s2 + $0x428] sm:$0xff] }
  0x96   : > { %3739 = vmatpush3.bf16.msra.mxu0 %v3736_v28  ;;  %3613 = vmatprep.subr.bf16.mxu1 %v3612_v44  ;;  %v3748_v16 = vpack.c.bf16 %v2867_v15, %v2866_v58  ;;  %v1506_v28 = vld [vmem:[#allocation3 + $0xc0] sm:$0xff]  ;;  %v3768_v18 = vpack.c.bf16 %v2877_v19, %v2876_v5 }
  0x97   : > { %3741 = vmatprep.subr.bf16.mxu0 %v3740_v7  ;;  %3237 = vmatprep.mubr.f32.mxu1 %v4298_v14 }
  0x98   : > { %3413 = vmatprep.mubr.f32.mxu0 %v4400_v23  ;;  %3238 = vmatmul.mubr.f32.gmra.mrb[6].mxu1 %v4311_v24  ;;  %v2868_v23 = vld [vmem:[%s4863_s2 + $0x3e0] sm:$0xff] }
  0x99   : > { %3615 = vmatpush3.bf16.msra.mxu1 %v3612_v44  ;;  %3414 = vmatmul.mubr.f32.gmra.mrb[6].mxu0 %v1972_v50  ;;  %v3752_v47 = vpack.c.bf16 %v2869_v40, %v2868_v23  ;;  %v2881_v44 = vld [vmem:[%s4863_s2 + $0x448] sm:$0xff] }
  0x9a   : > { %3743 = vmatpush3.bf16.msra.mxu0 %v3740_v7  ;;  %3617 = vmatprep.subr.bf16.mxu1 %v3616_v48 }
  0x9b   : > { %3745 = vmatprep.subr.bf16.mxu0 %v3744_v59  ;;  %3272 = vmatprep.mubr.f32.mxu1 %v1503_v20 }
  0x9c   : > { %3448 = vmatprep.mubr.f32.mxu0 %v637_v0  ;;  %v3628_v0 = vpack.c.bf16 %v2807_v55, %v2806_v52 }
  0x9d   : > { %3619 = vmatpush3.bf16.msra.mxu1 %v3616_v48 }
  0x9e   : > { %3747 = vmatpush3.bf16.msra.mxu0 %v3744_v59  ;;  %3621 = vmatprep.subr.bf16.mxu1 %v3620_v25 }
  0x9f   : > { %3749 = vmatprep.subr.bf16.mxu0 %v3748_v16 }
  0xa1   : > { %3623 = vmatpush3.bf16.msra.mxu1 %v3620_v25 }
  0xa2   : > { %3751 = vmatpush3.bf16.msra.mxu0 %v3748_v16  ;;  %3625 = vmatprep.subr.bf16.mxu1 %v3624_v41 }
  0xa3   : > { %3753 = vmatprep.subr.bf16.mxu0 %v3752_v47 }
  0xa5   : > { %3627 = vmatpush3.bf16.msra.mxu1 %v3624_v41 }
  0xa6   : > { %3755 = vmatpush3.bf16.msra.mxu0 %v3752_v47  ;;  %3629 = vmatprep.subr.bf16.mxu1 %v3628_v0 }
  0xa7   : > { %3757 = vmatprep.subr.bf16.mxu0 %v3756_v46 }
  0xa9   : > { %3631 = vmatpush3.bf16.msra.mxu1 %v3628_v0 }
  0xaa   : > { %3759 = vmatpush3.bf16.msra.mxu0 %v3756_v46  ;;  %3792 = vmatprep.subr.bf16.mxu1 %v3760_v63 }
  0xab   : > { %3761 = vmatprep.subr.bf16.mxu0 %v3760_v63 }
  0xac   : > { %3273 = vmatmul.mubr.f32.vlgmr.msra.gmra.mrb[0].mxu1 %v1504_v26 }
  0xad   : > { %3449 = vmatmul.mubr.f32.vlgmr.msra.gmra.mrb[0].mxu0 %v695_v22  ;;  %3800 = vmatpush3.bf16.msra.mxu1 %v3760_v63  ;;  %v1508_v22 = vld [vmem:[#allocation3 + $0xe0] sm:$0xff] }
  0xae   : > { %3763 = vmatpush3.bf16.msra.mxu0 %v3760_v63  ;;  %3275 = vmatprep.mubr.f32.mxu1 %v1505_v3 }
  0xaf   : > { %3451 = vmatprep.mubr.f32.mxu0 %v753_v34  ;;  %3765 = vmatprep.subr.bf16.mxu0 %v3764_v4  ;;  %v3772_v34 = vpack.c.bf16 %v2879_v56, %v2878_v31 }
  0xb0   : > { %3276 = vmatmul.mubr.f32.gmra.mrb[2].mxu1 %v1506_v28  ;;  %3793 = vmatprep.subr.bf16.mxu1 %v3764_v4 }
  0xb1   : > { %3452 = vmatmul.mubr.f32.gmra.mrb[2].mxu0 %v811_v62  ;;  %3801 = vmatpush3.bf16.msra.mxu1 %v3764_v4  ;;  %v3776_v62 = vpack.c.bf16 %v2881_v44, %v2880_v33 }
  0xb2   : > { %3767 = vmatpush3.bf16.msra.mxu0 %v3764_v4  ;;  %3278 = vmatprep.mubr.f32.mxu1 %v1507_v11 }
  0xb3   : > { %3454 = vmatprep.mubr.f32.mxu0 %v869_v51  ;;  %3769 = vmatprep.subr.bf16.mxu0 %v3768_v18  ;;  %v2882_v51 = vld [vmem:[%s4863_s2 + $0x450] sm:$0xff] }
  0xb4   : > { %3279 = vmatmul.mubr.f32.gmra.mrb[4].mxu1 %v1508_v22  ;;  %3794 = vmatprep.subr.bf16.mxu1 %v3768_v18  ;;  %v3780_v6 = vpack.c.bf16 %v2883_v30, %v2882_v51 }
  0xb5   : > { %3455 = vmatmul.mubr.f32.gmra.mrb[4].mxu0 %v927_v1  ;;  %3802 = vmatpush3.bf16.msra.mxu1 %v3768_v18  ;;  %v2273_v1 = vld [vmem:[#allocation3 + $0x11] sm:$0xff] }
  0xb6   : > { %3771 = vmatpush3.bf16.msra.mxu0 %v3768_v18  ;;  %3281 = vmatprep.mubr.f32.mxu1 %v1509_v29 }
  0xb7   : > { %3457 = vmatprep.mubr.f32.mxu0 %v985_v21  ;;  %3773 = vmatprep.subr.bf16.mxu0 %v3772_v34  ;;  %v2885_v21 = vld [vmem:[%s4863_s2 + $0x468] sm:$0xff] }
  0xb8   : > { %3282 = vmatmul.mubr.f32.gmra.mrb[6].mxu1 %v1510_v13  ;;  %3795 = vmatprep.subr.bf16.mxu1 %v3772_v34  ;;  %v3784_v7 = vpack.c.bf16 %v2885_v21, %v2884_v57 }
  0xb9   : > { %3458 = vmatmul.mubr.f32.gmra.mrb[6].mxu0 %v1043_v37  ;;  %3803 = vmatpush3.bf16.msra.mxu1 %v3772_v34 }
  0xba   : > { %3775 = vmatpush3.bf16.msra.mxu0 %v3772_v34  ;;  %3796 = vmatprep.subr.bf16.mxu1 %v3776_v62 }
  0xbb   : > { %3777 = vmatprep.subr.bf16.mxu0 %v3776_v62  ;;  %3492 = vmatprep.mubr.f32.mxu0 %v2273_v1 }
  0xbc   : > { %3498 = vmatprep.mubr.f32.mxu1 %v4275_v61 }
  0xbd   : > { %3804 = vmatpush3.bf16.msra.mxu1 %v3776_v62 }
  0xbe   : > { %3779 = vmatpush3.bf16.msra.mxu0 %v3776_v62  ;;  %3797 = vmatprep.subr.bf16.mxu1 %v3780_v6 }
  0xbf   : > { %3781 = vmatprep.subr.bf16.mxu0 %v3780_v6 }
  0xc1   : > { %3805 = vmatpush3.bf16.msra.mxu1 %v3780_v6 }
  0xc2   : > { %3783 = vmatpush3.bf16.msra.mxu0 %v3780_v6  ;;  %3798 = vmatprep.subr.bf16.mxu1 %v3784_v7 }
  0xc3   : > { %3785 = vmatprep.subr.bf16.mxu0 %v3784_v7 }
  0xc5   : > { %3806 = vmatpush3.bf16.msra.mxu1 %v3784_v7 }
  0xc6   : > { %3787 = vmatpush3.bf16.msra.mxu0 %v3784_v7  ;;  %3799 = vmatprep.subr.bf16.mxu1 %v3788_v38 }
  0xc7   : > { %3789 = vmatprep.subr.bf16.mxu0 %v3788_v38 }
  0xc9   : > { %3807 = vmatpush3.bf16.msra.mxu1 %v3788_v38 }
  0xca   : > { %3791 = vmatpush3.bf16.msra.mxu0 %v3788_v38 }
  0xcc   : > { %3499 = vmatmul.mubr.f32.vlgmr.msra.gmra.mrb[8].mxu1 %v4298_v14 }
  0xcd   : > { %3493 = vmatmul.mubr.f32.vlgmr.msra.gmra.mrb[0].mxu0 %v4237_v35  ;;  %3501 = vmatprep.mubr.f32.mxu1 %v4311_v24 }
  0xce   : > { %3495 = vmatprep.mubr.f32.mxu0 %v4256_v49 }
  0xd0   : > { %3502 = vmatmul.mubr.f32.gmra.mrb[10].mxu1 %v1054_v42 }
  0xd1   : > { %3496 = vmatmul.mubr.f32.gmra.mrb[2].mxu0 %v4266_v54 }
 0x17f   : > { %v3274_v61 = vpop.f32.mrb[0].mxu1 }
 0x180   : > { %v1594_v53 = vpop.f32.mrb[1].mxu1 }
 0x183   : > { %v3277_v48 = vpop.f32.mrb[2].mxu1 }
 0x184   : > { %v1604_v50 = vpop.f32.mrb[3].mxu1 }
 0x187   : > { %v3280_v59 = vpop.f32.mrb[4].mxu1 }
 0x188   : > { %v3456_v12 = vpop.f32.mrb[4].mxu0  ;;  %v1614_v39 = vpop.f32.mrb[5].mxu1 }
 0x189   : > { %v3812_v14 = vadd.f32 %v3456_v12, %v3280_v59  ;;  %v2230_v58 = vpop.f32.mrb[5].mxu0 }
 0x18a   : > { %v3814_v35 = vadd.f32 %v2230_v58, %v1614_v39 }
 0x18b   : > { %v3283_v15 = vpop.f32.mrb[6].mxu1 }
 0x18c   : > { %v3459_v24 = vpop.f32.mrb[6].mxu0  ;;  %v1624_v20 = vpop.f32.mrb[7].mxu1 }
 0x18d   : > { %v3816_v49 = vadd.f32 %v3459_v24, %v3283_v15  ;;  %v2240_v25 = vpop.f32.mrb[7].mxu0 }
 0x18e   : > { %v3818_v27 = vadd.f32 %v2240_v25, %v1624_v20 }
 0x19f   : > { %v3500_v54 = vpop.f32.mrb[8].mxu1 }
 0x1a0   : > { %v3494_v42 = vpop.f32.mrb[0].mxu0  ;;  %v3813_v16 = vadd.f32 %v3812_v14, %v3500_v54  ;;  %v2384_v17 = vpop.f32.mrb[9].mxu1 }
 0x1a1   : > { %v3808_v32 = vadd.f32 %v3494_v42, %v3274_v61  ;;  %v2364_v23 = vpop.f32.mrb[1].mxu0  ;;  %v3815_v40 = vadd.f32 %v3814_v35, %v2384_v17 }
 0x1a2   : > { %2440 = vst [vmem:[%s522_s15 + $0x28] sm:$0xff] %v3813_v16  ;;  %v3809_v41 = vadd.f32 %v2364_v23, %v1594_v53  ;;  %v2462_v31 = vmul.f32 %v3813_v16, %v3813_v16 }
 0x1a3   : > { %2436 = vst [vmem:[%s522_s15 + $0x8] sm:$0xff] %v3808_v32  ;;  %v2458_v47 = vmul.f32 %v3808_v32, %v3808_v32  ;;  %2439 = vst [vmem:[%s522_s15 + $0x20] sm:$0xff] %v3815_v40  ;;  %v3503_v52 = vpop.f32.mrb[10].mxu1  ;;  %v2461_v28 = vmul.f32 %v3815_v40, %v3815_v40 }
 0x1a4   : > { %2435 = vst [vmem:[%s522_s15] sm:$0xff] %v3809_v41  ;;  %v2443_v55 = vadd.f32 %v3809_v41, %v3808_v32  ;;  %v2457_v43 = vmul.f32 %v3809_v41, %v3809_v41  ;;  %v3497_v36 = vpop.f32.mrb[2].mxu0  ;;  %v3817_v0 = vadd.f32 %v3816_v49, %v3503_v52  ;;  %v2394_v46 = vpop.f32.mrb[11].mxu1 }
 0x1a5   : > { %v3810_v60 = vadd.f32 %v3497_v36, %v3277_v48  ;;  %v2374_v2 = vpop.f32.mrb[3].mxu0  ;;  %v3819_v63 = vadd.f32 %v3818_v27, %v2394_v46 }
 0x1a6   : > { %v2465_v9 = vadd.f32 %v2458_v47, %v2457_v43  ;;  %2442 = vst [vmem:[%s522_s15 + $0x38] sm:$0xff] %v3817_v0  ;;  %v3811_v10 = vadd.f32 %v2374_v2, %v1604_v50  ;;  %v2464_v44 = vmul.f32 %v3817_v0, %v3817_v0 }
 0x1a7   : > { %2438 = vst [vmem:[%s522_s15 + $0x18] sm:$0xff] %v3810_v60  ;;  %2441 = vst [vmem:[%s522_s15 + $0x30] sm:$0xff] %v3819_v63  ;;  %v2460_v4 = vmul.f32 %v3810_v60, %v3810_v60  ;;  %v2463_v34 = vmul.f32 %v3819_v63, %v3819_v63 }
 0x1a8   : > { %2437 = vst [vmem:[%s522_s15 + $0x10] sm:$0xff] %v3811_v10  ;;  %v2444_v26 = vadd.f32 %v3811_v10, %v2443_v55  ;;  %v2459_v3 = vmul.f32 %v3811_v10, %v3811_v10 }
 0x1aa   : > { %v2445_v5 = vadd.f32 %v3810_v60, %v2444_v26  ;;  %v2466_v19 = vadd.f32 %v2465_v9, %v2459_v3 }
 0x1ac   : > { %v2467_v11 = vadd.f32 %v2466_v19, %v2460_v4  ;;  %v2446_v18 = vadd.f32 %v3815_v40, %v2445_v5 }
 0x1ae   : > { %v2447_v56 = vadd.f32 %v3813_v16, %v2446_v18  ;;  %v2468_v22 = vadd.f32 %v2467_v11, %v2461_v28 }
 0x1b0   : > { %v2448_v29 = vadd.f32 %v3819_v63, %v2447_v56  ;;  %v2469_v33 = vadd.f32 %v2468_v22, %v2462_v31 }
 0x1b2   : > { %v2449_v13 = vadd.f32 %v3817_v0, %v2448_v29  ;;  %v2470_v37 = vadd.f32 %v2469_v33, %v2463_v34 }
 0x1b4   : > { %v2450_v62 = vrot.slane %v2449_v13, 4  ;;  %v2471_v51 = vadd.f32 %v2470_v37, %v2464_v44 }
 0x1b6   : > { %v2451_v30 = vadd.f32 %v2450_v62, %v2449_v13  ;;  %v2472_v1 = vrot.slane %v2471_v51, 4 }
 0x1b8   : > { %v2452_v6 = vrot.slane %v2451_v30, 2  ;;  %v2473_v57 = vadd.f32 %v2472_v1, %v2471_v51 }
 0x1ba   : > { %v2453_v21 = vadd.f32 %v2452_v6, %v2451_v30  ;;  %v2474_v7 = vrot.slane %v2473_v57, 2 }
 0x1bc   : > { %v2454_v8 = vrot.slane %v2453_v21, 1  ;;  %v2475_v45 = vadd.f32 %v2474_v7, %v2473_v57 }
 0x1be   : > { %v2455_v38 = vadd.f32 %v2454_v8, %v2453_v21  ;;  %v2476_v61 = vrot.slane %v2475_v45, 1 }
 0x1c0   : > { %2456 = vst [vmem:[%s528_s18] sm:$0x1] %v2455_v38  ;;  %v2477_v53 = vadd.f32 %v2476_v61, %v2475_v45 }
 0x1c2   : > { %2478 = vst [vmem:[%s533_s22] sm:$0x1] %v2477_v53 }
 0x1c3 PF: > { %s18_s28 = sadd.s32 1, %s3951_s28   ;;  %s4870_s24 = smov %s3939_s25 }
 0x1c4   : > { %p15_p11 = scmp.ge.s32.totalorder %s18_s28, 4   ;;  %s4871_s25 = smov %s4033_s10 }
 0x1c5   : > { %s4872_s26 = smov %s3947_s27  ;;  %s4873_s27 = smov %s4875_s29 }
 0x1c6   :  { %17 = sbr.rel (!%p15_p11) target bundleno = 3 (0x3), region = 257 }

</bundles_post_ra>
